<compile_context>
chip_gen: v7x
topology: tpu7x:2x2x1
jax: 0.10.0
libtpu: 0.0.40
codegen_flags: <defaults>
</compile_context>

<pallas_src>
import functools

import jax
import jax.numpy as jnp
from jax.experimental import pallas as pl
from jax.experimental.pallas import tpu as pltpu


# ----------------------------------------------------------------------------
# Pallas kernel: entire forward pass fused, one batch tile per grid step
# ----------------------------------------------------------------------------
def salary_predictor_kernel(
    x_ref,                 # (TB, F)    f32  (cast to bf16 in-kernel)
    wA_ref, bA_ref,        # fc1||res1 packed:  (F, 192)  bf16, (1, 192) f32
    w2_ref, b2_ref,        # fc2 (+bn2 folded): (128, 64) bf16, (1, 64)  f32
    wB_ref, bB_ref,        # fc3||res2 packed:  (64, 64)  bf16, (1, 64)  f32
    w4_ref, b4_ref,        # fc4 (+bn4 folded): (32, 16)  bf16, (1, 16)  f32
    w5_ref, b5_ref,        # fc5:               (1, 16)   bf16, (1, 1)   f32
    o_ref,                 # (1, 1, TB) f32 lane-packed scalar output
):
    bf16 = jnp.bfloat16
    f32 = jnp.float32
    x = x_ref[...].astype(bf16)                               # in-kernel cast

    # fused:  [fc1(x)+bn1  ||  res1(x)]   -> one MXU pass
    t = jnp.dot(x, wA_ref[...], preferred_element_type=f32) + bA_ref[...]
    h1 = jnp.maximum(t[:, :128], 0.0)                         # relu(bn1(fc1(x)))
    id1 = t[:, 128:192]                                       # identity1
    # dropout (eval) = identity

    # x = relu(bn2(fc2(x))) + identity1
    h2 = jnp.dot(h1.astype(bf16), w2_ref[...],
                 preferred_element_type=f32) + b2_ref[...]
    h2 = jnp.maximum(h2, 0.0) + id1
    # dropout (eval) = identity

    # fused:  [fc3(x)+bn3  ||  res2(x)]   -> one MXU pass
    t2 = jnp.dot(h2.astype(bf16), wB_ref[...],
                 preferred_element_type=f32) + bB_ref[...]
    h3 = jnp.maximum(t2[:, :32], 0.0) + t2[:, 32:64]          # relu(...) + identity2
    # dropout (eval) = identity

    # x = relu(bn4(fc4(x)))
    h4 = jnp.dot(h3.astype(bf16), w4_ref[...],
                 preferred_element_type=f32) + b4_ref[...]
    h4 = jnp.maximum(h4, 0.0)
    # dropout (eval) = identity

    # fc5 scalar head, lane-packed: out^T = w5 (1,16) . h4^T (16,TB) -> (1, TB).
    # Contracting the 16-wide feature dim of both operands keeps the result a
    # single lane-dense row (4 B of output per batch row, no zero-padding).
    out_row = jax.lax.dot_general(
        w5_ref[...], h4.astype(bf16),
        dimension_numbers=(((1,), (1,)), ((), ())),
        preferred_element_type=f32) + b5_ref[...]
    o_ref[...] = out_row.reshape(o_ref.shape).astype(o_ref.dtype)


# ----------------------------------------------------------------------------
# Wrapper: batch tiling, BlockSpecs, compiler hints
# ----------------------------------------------------------------------------
@functools.partial(jax.jit, static_argnames=("tile_b",))
def salary_predictor_forward(x, params, *, tile_b=1024):
    """Fused forward pass; tile_b = batch rows per grid step (multiple of 128).

    Per-generation tuning (see review): v7x keep tile_b <= ~4096 and
    batch >= 2*tile_b so both TensorCores get work; v6e/v5e can push 4096-8192.
    """
    B, F = x.shape

    # Don't allocate a tile (much) larger than the batch; keep it lane-aligned.
    tile_eff = max(128, min(tile_b, 128 * pl.cdiv(B, 128)))
    num_tiles = pl.cdiv(B, tile_eff)
    rows = num_tiles * tile_eff              # rows covered by the grid (>= B)

    weight_args = (
        params["wA"], params["bA"],
        params["w2"], params["b2"],
        params["wB"], params["bB"],
        params["w4"], params["b4"],
        params["w5"], params["b5"],
    )

    # x tiled over the batch; every weight/bias uses a full-shape BlockSpec with
    # a constant index_map so it stays VMEM-resident across grid steps.
    in_specs = [pl.BlockSpec((tile_eff, F), lambda i: (i, 0))] + [
        pl.BlockSpec(w.shape, lambda i: (0, 0)) for w in weight_args
    ]
    # Lane-packed scalar output: one (1, 1, tile_eff) f32 row per grid step.
    out_spec = pl.BlockSpec((1, 1, tile_eff), lambda i: (i, 0, 0))

    flops = 2 * rows * (F * 192 + 128 * 64 + 64 * 64 + 32 * 16 + 16 * 1)
    bytes_accessed = (
        B * F * x.dtype.itemsize
        + sum(int(w.size) * w.dtype.itemsize for w in weight_args)
        + rows * 4
    )
    # ~4 KiB/row of live intermediates + weights + double-buffered I/O tiles,
    # capped below v7x's 64 MiB physical VMEM.
    vmem_limit = min(48 * 1024 * 1024, 8 * 1024 * 1024 + tile_eff * 4 * 1024)

    out = pl.pallas_call(
        salary_predictor_kernel,
        out_shape=jax.ShapeDtypeStruct((num_tiles, 1, tile_eff), jnp.float32),
        grid=(num_tiles,),
        in_specs=in_specs,
        out_specs=out_spec,
        compiler_params=pltpu.CompilerParams(
            dimension_semantics=("parallel",),
            vmem_limit_bytes=int(vmem_limit),
        ),
        cost_estimate=pl.CostEstimate(
            flops=int(flops), transcendentals=0,
            bytes_accessed=int(bytes_accessed)),
    )(x, *weight_args)

    # Rows >= B of a partial last block are garbage (read past the batch end)
    # and are discarded here -- never relied upon to be zero.
    return out.reshape(-1)[:B].reshape(B, 1)


# ----------------------------------------------------------------------------
# Deterministic parameter construction (matches nn.Linear / BatchNorm1d init),
# BN folding, branch packing, dtype casting.
# ----------------------------------------------------------------------------
def kaiming_normal_fan_out(key, out_f, in_f):
    # nn.init.kaiming_normal_(mode='fan_out', nonlinearity='relu'):
    #   std = sqrt(2 / fan_out),  weight shape (out, in)
    std = jnp.sqrt(2.0 / out_f)
    return jax.random.normal(key, (out_f, in_f), dtype=jnp.float32) * std


def make_params(key, input_size):
    dims = {
        "fc1": (input_size, 128),
        "fc2": (128, 64),
        "fc3": (64, 32),
        "fc4": (32, 16),
        "fc5": (16, 1),
        "res1": (input_size, 64),
        "res2": (64, 32),
    }
    keys = jax.random.split(key, len(dims))
    raw = {}
    for k, (name, (fin, fout)) in zip(keys, dims.items()):
        w = kaiming_normal_fan_out(k, fout, fin)   # (out, in) like PyTorch
        b = jnp.zeros((fout,), jnp.float32)        # nn.init.constant_(bias, 0)
        raw[name] = (w, b)

    eps = 1e-5

    def fold_bn(w, b, feat):
        # Eval-mode BatchNorm1d with default buffers/affine params
        # (running_mean=0, running_var=1, gamma=1, beta=0) is a fixed affine op.
        # TODO(synk): fold trained running stats / gamma / beta here.
        gamma = jnp.ones((feat,), jnp.float32)
        beta = jnp.zeros((feat,), jnp.float32)
        rmean = jnp.zeros((feat,), jnp.float32)
        rvar = jnp.ones((feat,), jnp.float32)
        scale = gamma / jnp.sqrt(rvar + eps)
        w_eff = (w * scale[:, None]).T             # -> (in, out)
        b_eff = b * scale + beta - rmean * scale
        return w_eff, b_eff.reshape(1, feat)

    w1, b1 = fold_bn(*raw["fc1"], 128)
    w2, b2 = fold_bn(*raw["fc2"], 64)
    w3, b3 = fold_bn(*raw["fc3"], 32)
    w4, b4 = fold_bn(*raw["fc4"], 16)
    wr1, br1 = raw["res1"][0].T, raw["res1"][1].reshape(1, 64)
    wr2, br2 = raw["res2"][0].T, raw["res2"][1].reshape(1, 32)
    w5, b5 = raw["fc5"][0], raw["fc5"][1].reshape(1, 1)   # keep PyTorch (1,16) layout

    # Pack parallel branches that share an input (no feature-dim padding).
    wA = jnp.concatenate([w1, wr1], axis=1)    # (F, 192)
    bA = jnp.concatenate([b1, br1], axis=1)    # (1, 192)
    wB = jnp.concatenate([w3, wr2], axis=1)    # (64, 64)
    bB = jnp.concatenate([b3, br2], axis=1)    # (1, 64)

    bf16 = jnp.bfloat16
    return {
        "wA": wA.astype(bf16), "bA": bA,
        "w2": w2.astype(bf16), "b2": b2,
        "wB": wB.astype(bf16), "bB": bB,
        "w4": w4.astype(bf16), "b4": b4,
        "w5": w5.astype(bf16), "b5": b5,
    }


# ----------------------------------------------------------------------------
# Pure-JAX reference (same math / same bf16 casts, no Pallas)
# ----------------------------------------------------------------------------
def reference_forward(x, p):
    bf16, f32 = jnp.bfloat16, jnp.float32
    xb = x.astype(bf16)
    t = jnp.dot(xb, p["wA"], preferred_element_type=f32) + p["bA"]
    h1 = jnp.maximum(t[:, :128], 0.0)
    id1 = t[:, 128:192]
    h2 = jnp.maximum(
        jnp.dot(h1.astype(bf16), p["w2"], preferred_element_type=f32) + p["b2"],
        0.0) + id1
    t2 = jnp.dot(h2.astype(bf16), p["wB"], preferred_element_type=f32) + p["bB"]
    h3 = jnp.maximum(t2[:, :32], 0.0) + t2[:, 32:64]
    h4 = jnp.maximum(
        jnp.dot(h3.astype(bf16), p["w4"], preferred_element_type=f32) + p["b4"],
        0.0)
    out = jnp.dot(h4.astype(bf16), p["w5"].T, preferred_element_type=f32) + p["b5"]
    return out


if __name__ == "__main__":
    key = jax.random.PRNGKey(0)
    k_param, k_x = jax.random.split(key)

    input_size = 32
    params = make_params(k_param, input_size)

    # (batch, tile_b): two full tiles / one small full tile / three tiles with a
    # partial (remainder) last block handled by the cdiv grid + wrapper slice.
    for batch, tile_b in ((2048, 1024), (384, 1024), (2560, 1024)):
        kx = jax.random.fold_in(k_x, batch)
        x = jax.random.normal(kx, (batch, input_size), dtype=jnp.float32)

        out = jax.block_until_ready(
            salary_predictor_forward(x, params, tile_b=tile_b))
        ref = reference_forward(x, params)

        assert out.shape == (batch, 1), out.shape
        assert jnp.allclose(out, ref, atol=1e-2, rtol=1e-2), \
            f"mismatch vs reference at batch={batch}"

    print("KERNEL_OK")
</pallas_src>

<mosaic_0001>
module attributes {stable_mosaic.version = 11 : i64} {
  func.func @salary_predictor_kernel(%arg0: i32, %arg1: memref<1024x32xf32, #tpu.memory_space<vmem>>, %arg2: memref<32x192xbf16, #tpu.memory_space<vmem>>, %arg3: memref<1x192xf32, #tpu.memory_space<vmem>>, %arg4: memref<128x64xbf16, #tpu.memory_space<vmem>>, %arg5: memref<1x64xf32, #tpu.memory_space<vmem>>, %arg6: memref<64x64xbf16, #tpu.memory_space<vmem>>, %arg7: memref<1x64xf32, #tpu.memory_space<vmem>>, %arg8: memref<32x16xbf16, #tpu.memory_space<vmem>>, %arg9: memref<1x16xf32, #tpu.memory_space<vmem>>, %arg10: memref<1x16xbf16, #tpu.memory_space<vmem>>, %arg11: memref<1x1xf32, #tpu.memory_space<vmem>>, %arg12: memref<1x1x1024xf32, #tpu.memory_space<vmem>>) attributes {dimension_semantics = [#tpu.dimension_semantics<parallel>], iteration_bounds = array<i64: 2>, scalar_prefetch = 0 : i64, scratch_operands = 0 : i64, tpu.core_type = #tpu.core_type<tc>, window_params = [{transform_indices = @transform_0, window_bounds = array<i64: 1024, 32>}, {pipeline_mode = #tpu.pipeline_mode<synchronous>, transform_indices = @transform_1, window_bounds = array<i64: 32, 192>}, {pipeline_mode = #tpu.pipeline_mode<synchronous>, transform_indices = @transform_2, window_bounds = array<i64: 1, 192>}, {pipeline_mode = #tpu.pipeline_mode<synchronous>, transform_indices = @transform_3, window_bounds = array<i64: 128, 64>}, {pipeline_mode = #tpu.pipeline_mode<synchronous>, transform_indices = @transform_4, window_bounds = array<i64: 1, 64>}, {pipeline_mode = #tpu.pipeline_mode<synchronous>, transform_indices = @transform_5, window_bounds = array<i64: 64, 64>}, {pipeline_mode = #tpu.pipeline_mode<synchronous>, transform_indices = @transform_6, window_bounds = array<i64: 1, 64>}, {pipeline_mode = #tpu.pipeline_mode<synchronous>, transform_indices = @transform_7, window_bounds = array<i64: 32, 16>}, {pipeline_mode = #tpu.pipeline_mode<synchronous>, transform_indices = @transform_8, window_bounds = array<i64: 1, 16>}, {pipeline_mode = #tpu.pipeline_mode<synchronous>, transform_indices = @transform_9, window_bounds = array<i64: 1, 16>}, {pipeline_mode = #tpu.pipeline_mode<synchronous>, transform_indices = @transform_10, window_bounds = array<i64: 1, 1>}, {transform_indices = @transform_11, window_bounds = array<i64: 1, 1, 1024>}]} {
    %c0 = arith.constant 0 : index
    %c0_0 = arith.constant 0 : index
    %0 = vector.load %arg1[%c0, %c0_0] : memref<1024x32xf32, #tpu.memory_space<vmem>>, vector<1024x32xf32>
    %1 = arith.truncf %0 : vector<1024x32xf32> to vector<1024x32xbf16>
    %c0_1 = arith.constant 0 : index
    %c0_2 = arith.constant 0 : index
    %2 = vector.load %arg2[%c0_1, %c0_2] : memref<32x192xbf16, #tpu.memory_space<vmem>>, vector<32x192xbf16>
    %cst = arith.constant dense<0.000000e+00> : vector<1024x192xf32>
    %3 = tpu.matmul %1, %2, %cst {dimension_numbers = #tpu.dot_dimension_numbers<[1], [0], [0], [1], [0, 0, 1, 1], [], []>} : vector<1024x32xbf16>, vector<32x192xbf16>, vector<1024x192xf32> -> vector<1024x192xf32>
    %c0_3 = arith.constant 0 : index
    %c0_4 = arith.constant 0 : index
    %4 = vector.load %arg3[%c0_3, %c0_4] : memref<1x192xf32, #tpu.memory_space<vmem>>, vector<1x192xf32>
    %5 = vector.broadcast %4 : vector<1x192xf32> to vector<1024x192xf32>
    %6 = arith.addf %3, %5 : vector<1024x192xf32>
    %7 = vector.extract_strided_slice %6 {offsets = [0, 0], sizes = [1024, 128], strides = [1, 1]} : vector<1024x192xf32> to vector<1024x128xf32>
    %cst_5 = arith.constant 0.000000e+00 : f32
    %8 = vector.broadcast %cst_5 : f32 to vector<1024x128xf32>
    %9 = arith.maximumf %7, %8 : vector<1024x128xf32>
    %10 = vector.extract_strided_slice %6 {offsets = [0, 128], sizes = [1024, 64], strides = [1, 1]} : vector<1024x192xf32> to vector<1024x64xf32>
    %11 = arith.truncf %9 : vector<1024x128xf32> to vector<1024x128xbf16>
    %c0_6 = arith.constant 0 : index
    %c0_7 = arith.constant 0 : index
    %12 = vector.load %arg4[%c0_6, %c0_7] : memref<128x64xbf16, #tpu.memory_space<vmem>>, vector<128x64xbf16>
    %cst_8 = arith.constant dense<0.000000e+00> : vector<1024x64xf32>
    %13 = tpu.matmul %11, %12, %cst_8 {dimension_numbers = #tpu.dot_dimension_numbers<[1], [0], [0], [1], [0, 0, 1, 1], [], []>} : vector<1024x128xbf16>, vector<128x64xbf16>, vector<1024x64xf32> -> vector<1024x64xf32>
    %c0_9 = arith.constant 0 : index
    %c0_10 = arith.constant 0 : index
    %14 = vector.load %arg5[%c0_9, %c0_10] : memref<1x64xf32, #tpu.memory_space<vmem>>, vector<1x64xf32>
    %15 = vector.broadcast %14 : vector<1x64xf32> to vector<1024x64xf32>
    %16 = arith.addf %13, %15 : vector<1024x64xf32>
    %cst_11 = arith.constant 0.000000e+00 : f32
    %17 = vector.broadcast %cst_11 : f32 to vector<1024x64xf32>
    %18 = arith.maximumf %16, %17 : vector<1024x64xf32>
    %19 = arith.addf %18, %10 : vector<1024x64xf32>
    %20 = arith.truncf %19 : vector<1024x64xf32> to vector<1024x64xbf16>
    %c0_12 = arith.constant 0 : index
    %c0_13 = arith.constant 0 : index
    %21 = vector.load %arg6[%c0_12, %c0_13] : memref<64x64xbf16, #tpu.memory_space<vmem>>, vector<64x64xbf16>
    %cst_14 = arith.constant dense<0.000000e+00> : vector<1024x64xf32>
    %22 = tpu.matmul %20, %21, %cst_14 {dimension_numbers = #tpu.dot_dimension_numbers<[1], [0], [0], [1], [0, 0, 1, 1], [], []>} : vector<1024x64xbf16>, vector<64x64xbf16>, vector<1024x64xf32> -> vector<1024x64xf32>
    %c0_15 = arith.constant 0 : index
    %c0_16 = arith.constant 0 : index
    %23 = vector.load %arg7[%c0_15, %c0_16] : memref<1x64xf32, #tpu.memory_space<vmem>>, vector<1x64xf32>
    %24 = vector.broadcast %23 : vector<1x64xf32> to vector<1024x64xf32>
    %25 = arith.addf %22, %24 : vector<1024x64xf32>
    %26 = vector.extract_strided_slice %25 {offsets = [0, 0], sizes = [1024, 32], strides = [1, 1]} : vector<1024x64xf32> to vector<1024x32xf32>
    %cst_17 = arith.constant 0.000000e+00 : f32
    %27 = vector.broadcast %cst_17 : f32 to vector<1024x32xf32>
    %28 = arith.maximumf %26, %27 : vector<1024x32xf32>
    %29 = vector.extract_strided_slice %25 {offsets = [0, 32], sizes = [1024, 32], strides = [1, 1]} : vector<1024x64xf32> to vector<1024x32xf32>
    %30 = arith.addf %28, %29 : vector<1024x32xf32>
    %31 = arith.truncf %30 : vector<1024x32xf32> to vector<1024x32xbf16>
    %c0_18 = arith.constant 0 : index
    %c0_19 = arith.constant 0 : index
    %32 = vector.load %arg8[%c0_18, %c0_19] : memref<32x16xbf16, #tpu.memory_space<vmem>>, vector<32x16xbf16>
    %cst_20 = arith.constant dense<0.000000e+00> : vector<1024x16xf32>
    %33 = tpu.matmul %31, %32, %cst_20 {dimension_numbers = #tpu.dot_dimension_numbers<[1], [0], [0], [1], [0, 0, 1, 1], [], []>} : vector<1024x32xbf16>, vector<32x16xbf16>, vector<1024x16xf32> -> vector<1024x16xf32>
    %c0_21 = arith.constant 0 : index
    %c0_22 = arith.constant 0 : index
    %34 = vector.load %arg9[%c0_21, %c0_22] : memref<1x16xf32, #tpu.memory_space<vmem>>, vector<1x16xf32>
    %35 = vector.broadcast %34 : vector<1x16xf32> to vector<1024x16xf32>
    %36 = arith.addf %33, %35 : vector<1024x16xf32>
    %cst_23 = arith.constant 0.000000e+00 : f32
    %37 = vector.broadcast %cst_23 : f32 to vector<1024x16xf32>
    %38 = arith.maximumf %36, %37 : vector<1024x16xf32>
    %c0_24 = arith.constant 0 : index
    %c0_25 = arith.constant 0 : index
    %39 = vector.load %arg10[%c0_24, %c0_25] : memref<1x16xbf16, #tpu.memory_space<vmem>>, vector<1x16xbf16>
    %40 = arith.truncf %38 : vector<1024x16xf32> to vector<1024x16xbf16>
    %cst_26 = arith.constant dense<0.000000e+00> : vector<1x1024xf32>
    %41 = tpu.matmul %39, %40, %cst_26 {dimension_numbers = #tpu.dot_dimension_numbers<[1], [1], [0], [0], [0, 0, 1, 0], [], []>} : vector<1x16xbf16>, vector<1024x16xbf16>, vector<1x1024xf32> -> vector<1x1024xf32>
    %c0_27 = arith.constant 0 : index
    %c0_28 = arith.constant 0 : index
    %42 = vector.load %arg11[%c0_27, %c0_28] : memref<1x1xf32, #tpu.memory_space<vmem>>, vector<1x1xf32>
    %43 = vector.broadcast %42 : vector<1x1xf32> to vector<1x1024xf32>
    %44 = arith.addf %41, %43 : vector<1x1024xf32>
    %45 = vector.shape_cast %44 : vector<1x1024xf32> to vector<1x1x1024xf32>
    %c0_29 = arith.constant 0 : index
    %c0_30 = arith.constant 0 : index
    %c0_31 = arith.constant 0 : index
    %46 = vector.load %arg12[%c0_29, %c0_30, %c0_31] : memref<1x1x1024xf32, #tpu.memory_space<vmem>>, vector<1x1x1024xf32>
    tpu.vector_store %arg12[%c0_29, %c0_30, %c0_31], %45 {strides = array<i32>} : memref<1x1x1024xf32, #tpu.memory_space<vmem>>, vector<1x1x1024xf32>,
    return
  }
  func.func @transform_0(%arg0: i32) -> (i32, i32) {
    %c0_i32 = arith.constant 0 : i32
    %c0_i32_0 = arith.constant 0 : i32
    return %arg0, %c0_i32 : i32, i32
  }
  func.func @transform_1(%arg0: i32) -> (i32, i32) {
    %c0_i32 = arith.constant 0 : i32
    %c0_i32_0 = arith.constant 0 : i32
    %c0_i32_1 = arith.constant 0 : i32
    return %c0_i32, %c0_i32_0 : i32, i32
  }
  func.func @transform_2(%arg0: i32) -> (i32, i32) {
    %c0_i32 = arith.constant 0 : i32
    %c0_i32_0 = arith.constant 0 : i32
    %c0_i32_1 = arith.constant 0 : i32
    return %c0_i32, %c0_i32_0 : i32, i32
  }
  func.func @transform_3(%arg0: i32) -> (i32, i32) {
    %c0_i32 = arith.constant 0 : i32
    %c0_i32_0 = arith.constant 0 : i32
    %c0_i32_1 = arith.constant 0 : i32
    return %c0_i32, %c0_i32_0 : i32, i32
  }
  func.func @transform_4(%arg0: i32) -> (i32, i32) {
    %c0_i32 = arith.constant 0 : i32
    %c0_i32_0 = arith.constant 0 : i32
    %c0_i32_1 = arith.constant 0 : i32
    return %c0_i32, %c0_i32_0 : i32, i32
  }
  func.func @transform_5(%arg0: i32) -> (i32, i32) {
    %c0_i32 = arith.constant 0 : i32
    %c0_i32_0 = arith.constant 0 : i32
    %c0_i32_1 = arith.constant 0 : i32
    return %c0_i32, %c0_i32_0 : i32, i32
  }
  func.func @transform_6(%arg0: i32) -> (i32, i32) {
    %c0_i32 = arith.constant 0 : i32
    %c0_i32_0 = arith.constant 0 : i32
    %c0_i32_1 = arith.constant 0 : i32
    return %c0_i32, %c0_i32_0 : i32, i32
  }
  func.func @transform_7(%arg0: i32) -> (i32, i32) {
    %c0_i32 = arith.constant 0 : i32
    %c0_i32_0 = arith.constant 0 : i32
    %c0_i32_1 = arith.constant 0 : i32
    return %c0_i32, %c0_i32_0 : i32, i32
  }
  func.func @transform_8(%arg0: i32) -> (i32, i32) {
    %c0_i32 = arith.constant 0 : i32
    %c0_i32_0 = arith.constant 0 : i32
    %c0_i32_1 = arith.constant 0 : i32
    return %c0_i32, %c0_i32_0 : i32, i32
  }
  func.func @transform_9(%arg0: i32) -> (i32, i32) {
    %c0_i32 = arith.constant 0 : i32
    %c0_i32_0 = arith.constant 0 : i32
    %c0_i32_1 = arith.constant 0 : i32
    return %c0_i32, %c0_i32_0 : i32, i32
  }
  func.func @transform_10(%arg0: i32) -> (i32, i32) {
    %c0_i32 = arith.constant 0 : i32
    %c0_i32_0 = arith.constant 0 : i32
    %c0_i32_1 = arith.constant 0 : i32
    return %c0_i32, %c0_i32_0 : i32, i32
  }
  func.func @transform_11(%arg0: i32) -> (i32, i32, i32) {
    %c0_i32 = arith.constant 0 : i32
    %c0_i32_0 = arith.constant 0 : i32
    %c0_i32_1 = arith.constant 0 : i32
    return %arg0, %c0_i32, %c0_i32_0 : i32, i32, i32
  }
}

</mosaic_0001>

<bundles_post_ra>
// kernel: salary_predictor_forward.1
= control target key start
LH: loop header
LB: loop body
LE: loop exit
PB: predicated region body
PF: predicated region fallthrough
CT: control target
= control target key end

     0   :  { %s9849_s0 = inlined_call_operand.vmem [shape: f32[2048,32], index: 0, kind: input, shape index: {}]   ;;  %s9850_s1 = inlined_call_operand.vmem [shape: bf16[32,192], index: 1, kind: input, shape index: {}]   ;;  %s9851_s2 = inlined_call_operand.vmem [shape: f32[1,192], index: 2, kind: input, shape index: {}]   ;;  %s9852_s3 = inlined_call_operand.vmem [shape: bf16[128,64], index: 3, kind: input, shape index: {}]   ;;  %s9853_s4 = inlined_call_operand.vmem [shape: f32[1,64], index: 4, kind: input, shape index: {}]   ;;  %s9854_s5 = inlined_call_operand.vmem [shape: bf16[64,64], index: 5, kind: input, shape index: {}]   ;;  %s9855_s6 = inlined_call_operand.vmem [shape: f32[1,64], index: 6, kind: input, shape index: {}]   ;;  %s9856_s7 = inlined_call_operand.vmem [shape: bf16[32,16], index: 7, kind: input, shape index: {}]   ;;  %s9857_s8 = inlined_call_operand.vmem [shape: f32[1,16], index: 8, kind: input, shape index: {}]   ;;  %s9858_s9 = inlined_call_operand.vmem [shape: bf16[1,16], index: 9, kind: input, shape index: {}]   ;;  %s9859_s10 = inlined_call_operand.<no memory space> [shape: f32[1,1], index: 10, kind: input, shape index: {}]   ;;  %s9860_s11 = inlined_call_operand.hbm [shape: f32[2,1,1024], index: 11, kind: output, shape index: {}]  }
   0x1   :  { %v16_v0 = vstv %s9859_s10 }
   0x2   :  { %17 = vst [vmem:[#allocation2] sm:$0x1] %v16_v0 }
   0x3   :  { %18 = vsyncpa [#allocation4], 0 }
   0x4   :  { %20 = vsyncpa [#allocation4 + $0x1], 0  ;;  %s6828_s19 = smov 0   ;;  %s6830_s20 = smov 0  }
   0x5   :  { %s6832_s21 = smov 0   ;;  %s6834_s22 = smov 0  }
   0x6 LB: > { %s5676_s10 = sadd.s32 4294967295, %s6759_s22   ;;  %s5677_s23 = sadd.s32 4294967294, %s6759_s22   ;;  %s6759_s22 = sphi %s6834_s22, %s10239_s22   ;;  %s6755_s21 = sphi %s6832_s21, %s10238_s21   ;;  %s6751_s20 = sphi %s6830_s20, %s10237_s20   ;;  %s6747_s19 = sphi %s6828_s19, %s10236_s19  }
   0x7   : > { %s6851_s24 = sadd.s32 1, %s6759_s22   ;;  %s269_s25 = sadd.s32 1, %s6755_s21 }
   0x8   : > { %s266_s26 = ssub.s32 %s6759_s22, %s6851_s24  ;;  %p279_p0 = scmp.ne.s32.totalorder %s6755_s21, %s6751_s20 }
   0x9   : > { %p267_p1 = scmp.eq.s32.totalorder %s266_s26, 0  ;;  %p280_p2 = scmp.eq.s32.totalorder %s5676_s10, 1 }
   0xa   : > { %p285_p3 = scmp.ne.s32.totalorder %s6751_s20, %s6747_s19  ;;  %p286_p4 = scmp.eq.s32.totalorder %s5677_s23, 1 }
   0xb   : > { %s6861_s27 = scalar_select %p267_p1, %s6755_s21, %s269_s25  }
   0xc   : > { %p6863_p5 = por %p280_p2, %p279_p0  ;;  %p6867_p6 = por %p286_p4, %p285_p3 }
   0xd   : > { %p5680_p7 = scmp.ge.s32.totalorder %s6759_s22, 1  ;;  %p343_p8 = scmp.lt.s32.totalorder %s6759_s22, 3 }
   0xf   : > { %p344_p9 = pnand %p5680_p7, %p343_p8 }
  0x11   : > { %347 = sbr.rel (%p344_p9) target bundleno = 1854 (0x73e), region = 64 }
  0x18   : > { %v6672_v1 = vld [vmem:[%s9850_s1 + $0x4] ss:$8 sps:$4 sm:$0xff]   ;;  %s6876_s13 = sshll.u32 %s5676_s10, 7  ;;  %v6674_v2 = vld [vmem:[%s9850_s1] ss:$8 sps:$4 sm:$0xff]   ;;  %v9862_v3 = vmov 0  }
  0x19   : > { %843 = vmatprep.mubr.bf16.mxu0 %v9862_v3  ;;  %p384_p10 = scmp.lt.s32.totalorder %s6876_s13, 255  ;;  %6671 = vset.pattern.permute.xlu0 %v9862_v3  ;;  %v6675_v4 = vld [vmem:[%s9850_s1 + $0x14] ss:$8 sps:$4 sm:$0xff]   ;;  %v6677_v5 = vld [vmem:[%s9850_s1 + $0x10] ss:$8 sps:$4 sm:$0xff]   ;;  %vm618_vm0 = vcmask 261120   ;;  %s9807_s15 = scalar_lea.hbm %s9860_s11, %s6876_s13 }
  0x1a   : > { %811 = vmatprep.subr.bf16.mxu0 %v6672_v1  ;;  %v6678_v33 = vld [vmem:[%s9852_s3] sm:$0xff]   ;;  %v6679_v37 = vld [vmem:[%s9852_s3 + $0x8] sm:$0xff]   ;;  %v6680_v38 = vld [vmem:[%s9852_s3 + $0x10] sm:$0xff]   ;;  %vm2651_vm1 = vcmask 523264   ;;  %vm5184_vm2 = vcmask 130048   ;;  %s6764_s18 = smov [#allocation3]  }
  0x1b   : > { %812 = vmatpush1.bf16.msra.mxu0 %v6674_v2  ;;  %s385_s23 = scalar_select %p384_p10, %s6876_s13, 255  ;;  %6185 = vmatprep.subr.bf16.mxu1 %v6678_v33  ;;  %v6681_v42 = vld [vmem:[%s9852_s3 + $0x18] sm:$0xff]   ;;  %v6682_v45 = vld [vmem:[%s9852_s3 + $0x20] sm:$0xff]   ;;  %v6683_v47 = vld [vmem:[%s9852_s3 + $0x28] sm:$0xff]  }
  0x1c   : > { %813 = vmatprep.subr.bf16.mxu0 %v6675_v4  ;;  %6186 = vmatpush3.bf16.msra.mxu1 %v6678_v33  ;;  %v6684_v50 = vld [vmem:[%s9852_s3 + $0x30] sm:$0xff]   ;;  %v6685_v52 = vld [vmem:[%s9852_s3 + $0x38] sm:$0xff]   ;;  %s6701_s10 = sshll.u32 %s6764_s18, 4  ;;  %s6702_s10 = int_to_ptr.vmem [resolvable:$false] %s6701_s10 }
  0x1d   : > { %s5683_s25 = sshll.u32 %s385_s23, 3  ;;  %6187 = vmatprep.subr.bf16.mxu1 %v6679_v37  ;;  %s6762_s23 = smov 96  }
  0x1e   : > { %s6894_s12 = scalar_lea.vmem %s9849_s0, %s5683_s25 }
  0x1f   : > { %814 = vmatpush1.bf16.msra.mxu0 %v6677_v5  ;;  %v390_v6 = vld [vmem:[%s6894_s12] sm:$0xff]  ;;  %v391_v7 = vld [vmem:[%s6894_s12 + $0x8] sm:$0xff]  ;;  %v392_v9 = vld [vmem:[%s6894_s12 + $0x10] sm:$0xff] }
  0x20   : > { %v518_v8 = vpack.c.bf16 %v391_v7, %v390_v6  ;;  %v393_v10 = vld [vmem:[%s6894_s12 + $0x18] sm:$0xff]  ;;  %v394_v12 = vld [vmem:[%s6894_s12 + $0x20] sm:$0xff]  ;;  %v395_v13 = vld [vmem:[%s6894_s12 + $0x28] sm:$0xff]  ;;  %6188 = vmatpush3.bf16.msra.mxu1 %v6679_v37 }
  0x21   : > { %v519_v11 = vpack.c.bf16 %v393_v10, %v392_v9  ;;  %v520_v14 = vpack.c.bf16 %v395_v13, %v394_v12  ;;  %v396_v15 = vld [vmem:[%s6894_s12 + $0x30] sm:$0xff]  ;;  %v397_v16 = vld [vmem:[%s6894_s12 + $0x38] sm:$0xff]  ;;  %v398_v18 = vld [vmem:[%s6894_s12 + $0x40] sm:$0xff]  ;;  %6189 = vmatprep.subr.bf16.mxu1 %v6680_v38 }
  0x22   : > { %5688 = vmatmul.mubr.msk.bf16.vlgmr.msra.gmra.mrb[0].mxu0 %vm618_vm0, %v518_v8  ;;  %v521_v17 = vpack.c.bf16 %v397_v16, %v396_v15  ;;  %v399_v19 = vld [vmem:[%s6894_s12 + $0x48] sm:$0xff]  ;;  %v400_v21 = vld [vmem:[%s6894_s12 + $0x50] sm:$0xff]  ;;  %v401_v22 = vld [vmem:[%s6894_s12 + $0x58] sm:$0xff] }
  0x23   : > { %853 = vmatprep.mubr.bf16.mxu0 %v9862_v3  ;;  %v522_v20 = vpack.c.bf16 %v399_v19, %v398_v18  ;;  %v523_v23 = vpack.c.bf16 %v401_v22, %v400_v21  ;;  %v402_v24 = vld [vmem:[%s6894_s12 + $0x60] sm:$0xff]  ;;  %v403_v25 = vld [vmem:[%s6894_s12 + $0x68] sm:$0xff]  ;;  %v404_v27 = vld [vmem:[%s6894_s12 + $0x70] sm:$0xff] }
  0x24   : > { %v524_v26 = vpack.c.bf16 %v403_v25, %v402_v24  ;;  %v405_v28 = vld [vmem:[%s6894_s12 + $0x78] sm:$0xff]  ;;  %v406_v30 = vld [vmem:[%s6894_s12 + $0x80] sm:$0xff]  ;;  %v407_v31 = vld [vmem:[%s6894_s12 + $0x88] sm:$0xff]  ;;  %6190 = vmatpush3.bf16.msra.mxu1 %v6680_v38 }
  0x25   : > { %v525_v29 = vpack.c.bf16 %v405_v28, %v404_v27  ;;  %v526_v32 = vpack.c.bf16 %v407_v31, %v406_v30  ;;  %v408_v34 = vld [vmem:[%s6894_s12 + $0x90] sm:$0xff]  ;;  %v409_v35 = vld [vmem:[%s6894_s12 + $0x98] sm:$0xff]  ;;  %v410_v39 = vld [vmem:[%s6894_s12 + $0xa0] sm:$0xff]  ;;  %6191 = vmatprep.subr.bf16.mxu1 %v6681_v42 }
  0x26   : > { %v527_v36 = vpack.c.bf16 %v409_v35, %v408_v34  ;;  %v411_v40 = vld [vmem:[%s6894_s12 + $0xa8] sm:$0xff]  ;;  %v412_v43 = vld [vmem:[%s6894_s12 + $0xb0] sm:$0xff]  ;;  %v413_v44 = vld [vmem:[%s6894_s12 + $0xb8] sm:$0xff] }
  0x27   : > { %v528_v41 = vpack.c.bf16 %v411_v40, %v410_v39  ;;  %v529_v46 = vpack.c.bf16 %v413_v44, %v412_v43  ;;  %v414_v48 = vld [vmem:[%s6894_s12 + $0xc0] sm:$0xff]  ;;  %v415_v49 = vld [vmem:[%s6894_s12 + $0xc8] sm:$0xff]  ;;  %v416_v53 = vld [vmem:[%s6894_s12 + $0xd0] sm:$0xff] }
  0x28   : > { %6192 = vmatpush3.bf16.msra.mxu1 %v6681_v42  ;;  %v530_v51 = vpack.c.bf16 %v415_v49, %v414_v48  ;;  %v417_v54 = vld [vmem:[%s6894_s12 + $0xd8] sm:$0xff]  ;;  %v418_v56 = vld [vmem:[%s6894_s12 + $0xe0] sm:$0xff]  ;;  %v419_v57 = vld [vmem:[%s6894_s12 + $0xe8] sm:$0xff] }
  0x29   : > { %6193 = vmatprep.subr.bf16.mxu1 %v6682_v45  ;;  %v531_v55 = vpack.c.bf16 %v417_v54, %v416_v53  ;;  %v532_v58 = vpack.c.bf16 %v419_v57, %v418_v56  ;;  %v420_v59 = vld [vmem:[%s6894_s12 + $0xf0] sm:$0xff]  ;;  %v421_v60 = vld [vmem:[%s6894_s12 + $0xf8] sm:$0xff]  ;;  %v422_v62 = vld [vmem:[%s6894_s12 + $0x100] sm:$0xff] }
  0x2a   : > { %5689 = vmatmul.mubr.msk.bf16.gmra.mrb[4].mxu0 %vm618_vm0, %v519_v11  ;;  %v533_v61 = vpack.c.bf16 %v421_v60, %v420_v59  ;;  %v423_v63 = vld [vmem:[%s6894_s12 + $0x108] sm:$0xff]  ;;  %v424_v1 = vld [vmem:[%s6894_s12 + $0x110] sm:$0xff]  ;;  %v425_v2 = vld [vmem:[%s6894_s12 + $0x118] sm:$0xff] }
  0x2b   : > { %863 = vmatprep.mubr.bf16.mxu0 %v9862_v3  ;;  %v534_v0 = vpack.c.bf16 %v423_v63, %v422_v62  ;;  %v535_v4 = vpack.c.bf16 %v425_v2, %v424_v1  ;;  %v426_v5 = vld [vmem:[%s6894_s12 + $0x120] sm:$0xff]  ;;  %v427_v6 = vld [vmem:[%s6894_s12 + $0x128] sm:$0xff]  ;;  %v428_v8 = vld [vmem:[%s6894_s12 + $0x130] sm:$0xff] }
  0x2c   : > { %6194 = vmatpush3.bf16.msra.mxu1 %v6682_v45  ;;  %v536_v7 = vpack.c.bf16 %v427_v6, %v426_v5  ;;  %v429_v9 = vld [vmem:[%s6894_s12 + $0x138] sm:$0xff]  ;;  %v430_v11 = vld [vmem:[%s6894_s12 + $0x140] sm:$0xff]  ;;  %v431_v12 = vld [vmem:[%s6894_s12 + $0x148] sm:$0xff] }
  0x2d   : > { %6195 = vmatprep.subr.bf16.mxu1 %v6683_v47  ;;  %v537_v10 = vpack.c.bf16 %v429_v9, %v428_v8  ;;  %v538_v13 = vpack.c.bf16 %v431_v12, %v430_v11  ;;  %v433_v15 = vld [vmem:[%s6894_s12 + $0x158] sm:$0xff]  ;;  %v435_v18 = vld [vmem:[%s6894_s12 + $0x168] sm:$0xff]  ;;  %v442_v31 = vld [vmem:[%s6894_s12 + $0x1a0] sm:$0xff] }
  0x2e   : > { %v437_v21 = vld [vmem:[%s6894_s12 + $0x178] sm:$0xff]  ;;  %v439_v24 = vld [vmem:[%s6894_s12 + $0x188] sm:$0xff]  ;;  %v7032_v35 = vld [vmem:[%s9851_s2] sm:$0x3] }
  0x2f   : > { %v441_v27 = vld [vmem:[%s6894_s12 + $0x198] sm:$0xff]  ;;  %v444_v37 = vld [vmem:[%s6894_s12 + $0x1b0] sm:$0xff]  ;;  %v446_v48 = vld [vmem:[%s6894_s12 + $0x1c0] sm:$0xff] }
  0x30   : > { %6196 = vmatpush3.bf16.msra.mxu1 %v6683_v47  ;;  %v445_v38 = vld [vmem:[%s6894_s12 + $0x1b8] sm:$0xff]  ;;  %v447_v49 = vld [vmem:[%s6894_s12 + $0x1c8] sm:$0xff]  ;;  %v448_v60 = vld [vmem:[%s6894_s12 + $0x1d0] sm:$0xff] }
  0x31   : > { %6197 = vmatprep.subr.bf16.mxu1 %v6684_v50  ;;  %v546_v54 = vpack.c.bf16 %v447_v49, %v446_v48  ;;  %v450_v9 = vld [vmem:[%s6894_s12 + $0x1e0] sm:$0xff] }
  0x32   : > { %5690 = vmatmul.mubr.msk.bf16.gmra.mrb[8].mxu0 %vm618_vm0, %v520_v14  ;;  %v432_v14 = vld [vmem:[%s6894_s12 + $0x150] sm:$0xff] }
  0x33   : > { %873 = vmatprep.mubr.bf16.mxu0 %v9862_v3  ;;  %v539_v16 = vpack.c.bf16 %v433_v15, %v432_v14 }
  0x34   : > { %6198 = vmatpush3.bf16.msra.mxu1 %v6684_v50 }
  0x35   : > { %6199 = vmatprep.subr.bf16.mxu1 %v6685_v52 }
  0x38   : > { %6200 = vmatpush3.bf16.msra.mxu1 %v6685_v52 }
  0x3a   : > { %5691 = vmatmul.mubr.msk.bf16.gmra.mrb[12].mxu0 %vm618_vm0, %v521_v17  ;;  %v434_v17 = vld [vmem:[%s6894_s12 + $0x160] sm:$0xff] }
  0x3b   : > { %883 = vmatprep.mubr.bf16.mxu0 %v9862_v3  ;;  %v540_v19 = vpack.c.bf16 %v435_v18, %v434_v17 }
  0x42   : > { %5692 = vmatmul.mubr.msk.bf16.gmra.mrb[16].mxu0 %vm618_vm0, %v522_v20  ;;  %v436_v20 = vld [vmem:[%s6894_s12 + $0x170] sm:$0xff] }
  0x43   : > { %893 = vmatprep.mubr.bf16.mxu0 %v9862_v3  ;;  %v541_v22 = vpack.c.bf16 %v437_v21, %v436_v20  ;;  %v452_v21 = vld [vmem:[%s6894_s12 + $0x1f0] sm:$0xff] }
  0x4a   : > { %5693 = vmatmul.mubr.msk.bf16.gmra.mrb[20].mxu0 %vm618_vm0, %v523_v23  ;;  %v438_v23 = vld [vmem:[%s6894_s12 + $0x180] sm:$0xff] }
  0x4b   : > { %903 = vmatprep.mubr.bf16.mxu0 %v9862_v3  ;;  %v542_v25 = vpack.c.bf16 %v439_v24, %v438_v23 }
  0x52   : > { %5694 = vmatmul.mubr.msk.bf16.gmra.mrb[24].mxu0 %vm618_vm0, %v524_v26  ;;  %v440_v26 = vld [vmem:[%s6894_s12 + $0x190] sm:$0xff] }
  0x53   : > { %913 = vmatprep.mubr.bf16.mxu0 %v9862_v3  ;;  %v543_v28 = vpack.c.bf16 %v441_v27, %v440_v26 }
  0x5a   : > { %5695 = vmatmul.mubr.msk.bf16.gmra.mrb[28].mxu0 %vm618_vm0, %v525_v29  ;;  %v588_v29 = vlaneseq }
  0x5b   : > { %923 = vmatprep.mubr.bf16.mxu0 %v9862_v3 }
  0x5c   : > { %v7023_v30 = vshrl.u32 %v588_v29, 7 }
  0x5e   : > { %9936 = vst [vmem:[#allocation6_spill] sm:$0xff] %v7023_v30  ;;  %v9861_v34 = vsub.s32 0, %v7023_v30 }
  0x62   : > { %5696 = vmatmul.mubr.msk.bf16.gmra.mrb[32].mxu0 %vm618_vm0, %v526_v32  ;;  %v443_v32 = vld [vmem:[%s6894_s12 + $0x1a8] sm:$0xff] }
  0x63   : > { %933 = vmatprep.mubr.bf16.mxu0 %v9862_v3  ;;  %v544_v33 = vpack.c.bf16 %v443_v32, %v442_v31 }
  0x6a   : > { %5697 = vmatmul.mubr.msk.bf16.gmra.mrb[36].mxu0 %vm618_vm0, %v527_v36  ;;  %v7038_v36 = vrot.slane %v7032_v35, %v9861_v34 }
  0x6b   : > { %943 = vmatprep.mubr.bf16.mxu0 %v9862_v3 }
  0x72   : > { %5698 = vmatmul.mubr.msk.bf16.gmra.mrb[40].mxu0 %vm618_vm0, %v528_v41  ;;  %v545_v41 = vpack.c.bf16 %v445_v38, %v444_v37  ;;  %v454_v37 = vld [vmem:[%s6894_s12 + $0x200] sm:$0xff]  ;;  %v455_v38 = vld [vmem:[%s6894_s12 + $0x208] sm:$0xff] }
  0x73   : > { %953 = vmatprep.mubr.bf16.mxu0 %v9862_v3 }
  0x7a   : > { %5699 = vmatmul.mubr.msk.bf16.gmra.mrb[44].mxu0 %vm618_vm0, %v529_v46 }
  0x7b   : > { %963 = vmatprep.mubr.bf16.mxu0 %v9862_v3 }
  0x82   : > { %5700 = vmatmul.mubr.msk.bf16.gmra.mrb[48].mxu0 %vm618_vm0, %v530_v51 }
  0x83   : > { %973 = vmatprep.mubr.bf16.mxu0 %v9862_v3 }
  0x8a   : > { %5701 = vmatmul.mubr.msk.bf16.gmra.mrb[52].mxu0 %vm618_vm0, %v531_v55 }
  0x8b   : > { %983 = vmatprep.mubr.bf16.mxu0 %v9862_v3 }
  0x92   : > { %5702 = vmatmul.mubr.msk.bf16.gmra.mrb[56].mxu0 %vm618_vm0, %v532_v58 }
  0x93   : > { %993 = vmatprep.mubr.bf16.mxu0 %v9862_v3 }
  0x9a   : > { %5703 = vmatmul.mubr.msk.bf16.gmra.mrb[60].mxu0 %vm618_vm0, %v533_v61  ;;  %v449_v61 = vld [vmem:[%s6894_s12 + $0x1d8] sm:$0xff] }
  0x9b   : > { %1003 = vmatprep.mubr.bf16.mxu0 %v9862_v3  ;;  %v547_v2 = vpack.c.bf16 %v449_v61, %v448_v60 }
  0xa2   : > { %5704 = vmatmul.mubr.msk.bf16.gmra.mrb[64].mxu0 %vm618_vm0, %v534_v0 }
  0xa3   : > { %1013 = vmatprep.mubr.bf16.mxu0 %v9862_v3 }
  0xaa   : > { %5705 = vmatmul.mubr.msk.bf16.gmra.mrb[68].mxu0 %vm618_vm0, %v535_v4 }
  0xab   : > { %1023 = vmatprep.mubr.bf16.mxu0 %v9862_v3 }
  0xb2   : > { %5706 = vmatmul.mubr.msk.bf16.gmra.mrb[72].mxu0 %vm618_vm0, %v536_v7 }
  0xb3   : > { %1033 = vmatprep.mubr.bf16.mxu0 %v9862_v3 }
  0xba   : > { %5707 = vmatmul.mubr.msk.bf16.gmra.mrb[76].mxu0 %vm618_vm0, %v537_v10  ;;  %v451_v10 = vld [vmem:[%s6894_s12 + $0x1e8] sm:$0xff] }
  0xbb   : > { %1043 = vmatprep.mubr.bf16.mxu0 %v9862_v3  ;;  %v548_v15 = vpack.c.bf16 %v451_v10, %v450_v9 }
  0xc2   : > { %5708 = vmatmul.mubr.msk.bf16.gmra.mrb[80].mxu0 %vm618_vm0, %v538_v13 }
  0xc3   : > { %1053 = vmatprep.mubr.bf16.mxu0 %v9862_v3 }
  0xca   : > { %5709 = vmatmul.mubr.msk.bf16.gmra.mrb[84].mxu0 %vm618_vm0, %v539_v16 }
  0xcb   : > { %1063 = vmatprep.mubr.bf16.mxu0 %v9862_v3 }
  0xd2   : > { %5710 = vmatmul.mubr.msk.bf16.gmra.mrb[88].mxu0 %vm618_vm0, %v540_v19 }
  0xd3   : > { %1073 = vmatprep.mubr.bf16.mxu0 %v9862_v3 }
  0xda   : > { %5711 = vmatmul.mubr.msk.bf16.gmra.mrb[92].mxu0 %vm618_vm0, %v541_v22  ;;  %v453_v22 = vld [vmem:[%s6894_s12 + $0x1f8] sm:$0xff] }
  0xdb   : > { %1083 = vmatprep.mubr.bf16.mxu0 %v9862_v3  ;;  %v549_v27 = vpack.c.bf16 %v453_v22, %v452_v21 }
  0xe2   : > { %5712 = vmatmul.mubr.msk.bf16.gmra.mrb[96].mxu0 %vm618_vm0, %v542_v25 }
  0xe3   : > { %1093 = vmatprep.mubr.bf16.mxu0 %v9862_v3 }
  0xea   : > { %5713 = vmatmul.mubr.msk.bf16.gmra.mrb[100].mxu0 %vm618_vm0, %v543_v28 }
  0xeb   : > { %1103 = vmatprep.mubr.bf16.mxu0 %v9862_v3 }
  0xf2   : > { %5714 = vmatmul.mubr.msk.bf16.gmra.mrb[104].mxu0 %vm618_vm0, %v544_v33 }
  0xf3   : > { %1113 = vmatprep.mubr.bf16.mxu0 %v9862_v3 }
  0xf5   : > { %v845_v39 = vpop.f32.mrb[0].mxu0 }
  0xf6   : > { %v7043_v40 = vpop.f32.mrb[1].mxu0  ;;  %v846_v42 = vadd.f32 %v845_v39, %v7038_v36 }
  0xf7   : > { %v849_v43 = vpop.f32.mrb[2].mxu0 }
  0xf8   : > { %v7046_v44 = vpop.f32.mrb[3].mxu0  ;;  %v850_v45 = vadd.f32 %v849_v43, %v7038_v36  ;;  %v1484_v46 = vmax.f32 %v846_v42, 0.0 }
  0xfa   : > { %5715 = vmatmul.mubr.msk.bf16.gmra.mrb[108].mxu0 %vm618_vm0, %v545_v41  ;;  %v1485_v47 = vmax.f32 %v850_v45, 0.0  ;;  %v550_v45 = vpack.c.bf16 %v455_v38, %v454_v37  ;;  %v463_v37 = vld [vmem:[%s6894_s12 + $0x248] sm:$0xff] }
  0xfb   : > { %1123 = vmatprep.mubr.bf16.mxu0 %v9862_v3 }
  0xfc   : > { %v1612_v50 = vpack.c.bf16 %v1485_v47, %v1484_v46 }
  0xfd   : > { %v855_v51 = vpop.f32.mrb[4].mxu0 }
  0xfe   : > { %v856_v52 = vadd.f32 %v855_v51, %v7038_v36  ;;  %v7054_v53 = vpop.f32.mrb[5].mxu0  ;;  %6201 = vmatprep.mubr.bf16.mxu1 %v1612_v50  ;;  %v456_v51 = vld [vmem:[%s6894_s12 + $0x210] sm:$0xff] }
  0xff   : > { %v859_v55 = vpop.f32.mrb[6].mxu0 }
 0x100   : > { %v860_v56 = vadd.f32 %v859_v55, %v7038_v36  ;;  %v7057_v57 = vpop.f32.mrb[7].mxu0  ;;  %v1486_v58 = vmax.f32 %v856_v52, 0.0  ;;  %v457_v52 = vld [vmem:[%s6894_s12 + $0x218] sm:$0xff] }
 0x102   : > { %v1487_v59 = vmax.f32 %v860_v56, 0.0  ;;  %5716 = vmatmul.mubr.msk.bf16.gmra.mrb[112].mxu0 %vm618_vm0, %v546_v54 }
 0x103   : > { %1133 = vmatprep.mubr.bf16.mxu0 %v9862_v3 }
 0x104   : > { %v1613_v62 = vpack.c.bf16 %v1487_v59, %v1486_v58  ;;  %v551_v59 = vpack.c.bf16 %v457_v52, %v456_v51  ;;  %v464_v52 = vld [vmem:[%s6894_s12 + $0x250] sm:$0xff] }
 0x105   : > { %v865_v63 = vpop.f32.mrb[8].mxu0 }
 0x106   : > { %v866_v0 = vadd.f32 %v865_v63, %v7038_v36  ;;  %v7064_v1 = vpop.f32.mrb[9].mxu0  ;;  %6202 = vmatmul.mubr.bf16.vlgmr.msra.gmra.mrb[0].mxu1 %v1613_v62 }
 0x107   : > { %v869_v4 = vpop.f32.mrb[10].mxu0 }
 0x108   : > { %v870_v5 = vadd.f32 %v869_v4, %v7038_v36  ;;  %v7067_v6 = vpop.f32.mrb[11].mxu0  ;;  %v1488_v7 = vmax.f32 %v866_v0, 0.0  ;;  %v459_v4 = vld [vmem:[%s6894_s12 + $0x228] sm:$0xff] }
 0x10a   : > { %v1489_v8 = vmax.f32 %v870_v5, 0.0  ;;  %5717 = vmatmul.mubr.msk.bf16.gmra.mrb[116].mxu0 %vm618_vm0, %v547_v2  ;;  %v458_v2 = vld [vmem:[%s6894_s12 + $0x220] sm:$0xff] }
 0x10b   : > { %1143 = vmatprep.mubr.bf16.mxu0 %v9862_v3  ;;  %v552_v10 = vpack.c.bf16 %v459_v4, %v458_v2 }
 0x10c   : > { %v1614_v11 = vpack.c.bf16 %v1489_v8, %v1488_v7 }
 0x10d   : > { %v875_v12 = vpop.f32.mrb[12].mxu0 }
 0x10e   : > { %v876_v13 = vadd.f32 %v875_v12, %v7038_v36  ;;  %v7074_v14 = vpop.f32.mrb[13].mxu0  ;;  %6205 = vmatprep.mubr.bf16.mxu1 %v1614_v11 }
 0x10f   : > { %v879_v16 = vpop.f32.mrb[14].mxu0 }
 0x110   : > { %v880_v17 = vadd.f32 %v879_v16, %v7038_v36  ;;  %v7077_v18 = vpop.f32.mrb[15].mxu0  ;;  %v1490_v19 = vmax.f32 %v876_v13, 0.0 }
 0x112   : > { %v1491_v20 = vmax.f32 %v880_v17, 0.0  ;;  %5718 = vmatmul.mubr.msk.bf16.gmra.mrb[120].mxu0 %vm618_vm0, %v548_v15  ;;  %v460_v17 = vld [vmem:[%s6894_s12 + $0x230] sm:$0xff] }
 0x113   : > { %1153 = vmatprep.mubr.bf16.mxu0 %v9862_v3 }
 0x114   : > { %v1615_v23 = vpack.c.bf16 %v1491_v20, %v1490_v19  ;;  %v461_v19 = vld [vmem:[%s6894_s12 + $0x238] sm:$0xff] }
 0x115   : > { %v885_v24 = vpop.f32.mrb[16].mxu0 }
 0x116   : > { %v886_v25 = vadd.f32 %v885_v24, %v7038_v36  ;;  %v7084_v26 = vpop.f32.mrb[17].mxu0  ;;  %6206 = vmatmul.mubr.bf16.gmra.mrb[4].mxu1 %v1615_v23  ;;  %v553_v24 = vpack.c.bf16 %v461_v19, %v460_v17 }
 0x117   : > { %v889_v28 = vpop.f32.mrb[18].mxu0 }
 0x118   : > { %v890_v29 = vadd.f32 %v889_v28, %v7038_v36  ;;  %v7087_v31 = vpop.f32.mrb[19].mxu0  ;;  %v1492_v32 = vmax.f32 %v886_v25, 0.0 }
 0x11a   : > { %v1493_v33 = vmax.f32 %v890_v29, 0.0  ;;  %5719 = vmatmul.mubr.msk.bf16.gmra.mrb[124].mxu0 %vm618_vm0, %v549_v27 }
 0x11b   : > { %1163 = vmatprep.mubr.bf16.mxu0 %v9862_v3 }
 0x11c   : > { %v1616_v39 = vpack.c.bf16 %v1493_v33, %v1492_v32  ;;  %v462_v33 = vld [vmem:[%s6894_s12 + $0x240] sm:$0xff] }
 0x11d   : > { %v895_v41 = vpop.f32.mrb[20].mxu0 }
 0x11e   : > { %v896_v42 = vadd.f32 %v895_v41, %v7038_v36  ;;  %v7094_v43 = vpop.f32.mrb[21].mxu0  ;;  %6209 = vmatprep.mubr.bf16.mxu1 %v1616_v39 }
 0x11f   : > { %v899_v46 = vpop.f32.mrb[22].mxu0 }
 0x120   : > { %v900_v47 = vadd.f32 %v899_v46, %v7038_v36  ;;  %v7097_v48 = vpop.f32.mrb[23].mxu0  ;;  %v1494_v49 = vmax.f32 %v896_v42, 0.0 }
 0x122   : > { %v1495_v50 = vmax.f32 %v900_v47, 0.0  ;;  %5720 = vmatmul.mubr.msk.bf16.gmra.mrb[128].mxu0 %vm618_vm0, %v550_v45  ;;  %v554_v45 = vpack.c.bf16 %v463_v37, %v462_v33 }
 0x123   : > { %1173 = vmatprep.mubr.bf16.mxu0 %v9862_v3 }
 0x124   : > { %v1617_v54 = vpack.c.bf16 %v1495_v50, %v1494_v49 }
 0x125   : > { %v905_v55 = vpop.f32.mrb[24].mxu0 }
 0x126   : > { %v906_v56 = vadd.f32 %v905_v55, %v7038_v36  ;;  %v7104_v58 = vpop.f32.mrb[25].mxu0  ;;  %6210 = vmatmul.mubr.bf16.gmra.mrb[8].mxu1 %v1617_v54  ;;  %v465_v54 = vld [vmem:[%s6894_s12 + $0x258] sm:$0xff] }
 0x127   : > { %v909_v60 = vpop.f32.mrb[26].mxu0 }
 0x128   : > { %v910_v61 = vadd.f32 %v909_v60, %v7038_v36  ;;  %v7107_v62 = vpop.f32.mrb[27].mxu0  ;;  %v1496_v63 = vmax.f32 %v906_v56, 0.0 }
 0x12a   : > { %v1497_v0 = vmax.f32 %v910_v61, 0.0  ;;  %5721 = vmatmul.mubr.msk.bf16.gmra.mrb[132].mxu0 %vm618_vm0, %v551_v59  ;;  %v555_v61 = vpack.c.bf16 %v465_v54, %v464_v52 }
 0x12b   : > { %1183 = vmatprep.mubr.bf16.mxu0 %v9862_v3 }
 0x12c   : > { %v1618_v5 = vpack.c.bf16 %v1497_v0, %v1496_v63 }
 0x12d   : > { %v915_v7 = vpop.f32.mrb[28].mxu0 }
 0x12e   : > { %v916_v8 = vadd.f32 %v915_v7, %v7038_v36  ;;  %v7114_v9 = vpop.f32.mrb[29].mxu0  ;;  %6213 = vmatprep.mubr.bf16.mxu1 %v1618_v5  ;;  %v466_v7 = vld [vmem:[%s6894_s12 + $0x260] sm:$0xff] }
 0x12f   : > { %v919_v11 = vpop.f32.mrb[30].mxu0 }
 0x130   : > { %v920_v12 = vadd.f32 %v919_v11, %v7038_v36  ;;  %v7117_v13 = vpop.f32.mrb[31].mxu0  ;;  %v1498_v15 = vmax.f32 %v916_v8, 0.0  ;;  %v467_v8 = vld [vmem:[%s6894_s12 + $0x268] sm:$0xff] }
 0x132   : > { %v1499_v16 = vmax.f32 %v920_v12, 0.0  ;;  %5722 = vmatmul.mubr.msk.bf16.gmra.mrb[136].mxu0 %vm618_vm0, %v552_v10 }
 0x133   : > { %1193 = vmatprep.mubr.bf16.mxu0 %v9862_v3 }
 0x134   : > { %v1619_v20 = vpack.c.bf16 %v1499_v16, %v1498_v15  ;;  %v556_v16 = vpack.c.bf16 %v467_v8, %v466_v7  ;;  %v473_v7 = vld [vmem:[%s6894_s12 + $0x298] sm:$0xff] }
 0x135   : > { %v925_v21 = vpop.f32.mrb[32].mxu0 }
 0x136   : > { %v926_v22 = vadd.f32 %v925_v21, %v7038_v36  ;;  %v7124_v23 = vpop.f32.mrb[33].mxu0  ;;  %6214 = vmatmul.mubr.bf16.gmra.mrb[12].mxu1 %v1619_v20 }
 0x137   : > { %v929_v25 = vpop.f32.mrb[34].mxu0 }
 0x138   : > { %v930_v27 = vadd.f32 %v929_v25, %v7038_v36  ;;  %v7127_v28 = vpop.f32.mrb[35].mxu0  ;;  %v1500_v29 = vmax.f32 %v926_v22, 0.0  ;;  %v469_v25 = vld [vmem:[%s6894_s12 + $0x278] sm:$0xff] }
 0x13a   : > { %v1501_v32 = vmax.f32 %v930_v27, 0.0  ;;  %5723 = vmatmul.mubr.msk.bf16.gmra.mrb[140].mxu0 %vm618_vm0, %v553_v24  ;;  %v468_v24 = vld [vmem:[%s6894_s12 + $0x270] sm:$0xff] }
 0x13b   : > { %1203 = vmatprep.mubr.bf16.mxu0 %v9862_v3  ;;  %v557_v37 = vpack.c.bf16 %v469_v25, %v468_v24  ;;  %v474_v25 = vld [vmem:[%s6894_s12 + $0x2a0] sm:$0xff] }
 0x13c   : > { %v1620_v38 = vpack.c.bf16 %v1501_v32, %v1500_v29 }
 0x13d   : > { %v935_v39 = vpop.f32.mrb[36].mxu0 }
 0x13e   : > { %v936_v41 = vadd.f32 %v935_v39, %v7038_v36  ;;  %v7134_v42 = vpop.f32.mrb[37].mxu0  ;;  %6217 = vmatprep.mubr.bf16.mxu1 %v1620_v38 }
 0x13f   : > { %v939_v46 = vpop.f32.mrb[38].mxu0 }
 0x140   : > { %v940_v47 = vadd.f32 %v939_v46, %v7038_v36  ;;  %v7137_v49 = vpop.f32.mrb[39].mxu0  ;;  %v1502_v50 = vmax.f32 %v936_v41, 0.0 }
 0x142   : > { %v1503_v51 = vmax.f32 %v940_v47, 0.0  ;;  %5724 = vmatmul.mubr.msk.bf16.gmra.mrb[144].mxu0 %vm618_vm0, %v554_v45  ;;  %v470_v47 = vld [vmem:[%s6894_s12 + $0x280] sm:$0xff] }
 0x143   : > { %1213 = vmatprep.mubr.bf16.mxu0 %v9862_v3 }
 0x144   : > { %v1621_v55 = vpack.c.bf16 %v1503_v51, %v1502_v50  ;;  %v471_v50 = vld [vmem:[%s6894_s12 + $0x288] sm:$0xff] }
 0x145   : > { %v945_v56 = vpop.f32.mrb[40].mxu0 }
 0x146   : > { %v946_v59 = vadd.f32 %v945_v56, %v7038_v36  ;;  %v7144_v60 = vpop.f32.mrb[41].mxu0  ;;  %6218 = vmatmul.mubr.bf16.gmra.mrb[16].mxu1 %v1621_v55  ;;  %v558_v56 = vpack.c.bf16 %v471_v50, %v470_v47 }
 0x147   : > { %v949_v63 = vpop.f32.mrb[42].mxu0 }
 0x148   : > { %v950_v0 = vadd.f32 %v949_v63, %v7038_v36  ;;  %v7147_v2 = vpop.f32.mrb[43].mxu0  ;;  %v1504_v4 = vmax.f32 %v946_v59, 0.0 }
 0x14a   : > { %v1505_v5 = vmax.f32 %v950_v0, 0.0  ;;  %5725 = vmatmul.mubr.msk.bf16.gmra.mrb[148].mxu0 %vm618_vm0, %v555_v61 }
 0x14b   : > { %1223 = vmatprep.mubr.bf16.mxu0 %v9862_v3 }
 0x14c   : > { %v1622_v10 = vpack.c.bf16 %v1505_v5, %v1504_v4  ;;  %v472_v5 = vld [vmem:[%s6894_s12 + $0x290] sm:$0xff] }
 0x14d   : > { %v955_v11 = vpop.f32.mrb[44].mxu0 }
 0x14e   : > { %v956_v12 = vadd.f32 %v955_v11, %v7038_v36  ;;  %v7154_v15 = vpop.f32.mrb[45].mxu0  ;;  %6221 = vmatprep.mubr.bf16.mxu1 %v1622_v10 }
 0x14f   : > { %v959_v17 = vpop.f32.mrb[46].mxu0 }
 0x150   : > { %v960_v19 = vadd.f32 %v959_v17, %v7038_v36  ;;  %v7157_v20 = vpop.f32.mrb[47].mxu0  ;;  %v1506_v21 = vmax.f32 %v956_v12, 0.0 }
 0x152   : > { %v1507_v22 = vmax.f32 %v960_v19, 0.0  ;;  %5726 = vmatmul.mubr.msk.bf16.gmra.mrb[152].mxu0 %vm618_vm0, %v556_v16  ;;  %v559_v16 = vpack.c.bf16 %v473_v7, %v472_v5 }
 0x153   : > { %1233 = vmatprep.mubr.bf16.mxu0 %v9862_v3 }
 0x154   : > { %v1623_v27 = vpack.c.bf16 %v1507_v22, %v1506_v21 }
 0x155   : > { %v965_v29 = vpop.f32.mrb[48].mxu0 }
 0x156   : > { %v966_v32 = vadd.f32 %v965_v29, %v7038_v36  ;;  %v7164_v33 = vpop.f32.mrb[49].mxu0  ;;  %6222 = vmatmul.mubr.bf16.gmra.mrb[20].mxu1 %v1623_v27  ;;  %v475_v27 = vld [vmem:[%s6894_s12 + $0x2a8] sm:$0xff] }
 0x157   : > { %v969_v38 = vpop.f32.mrb[50].mxu0 }
 0x158   : > { %v970_v39 = vadd.f32 %v969_v38, %v7038_v36  ;;  %v7167_v41 = vpop.f32.mrb[51].mxu0  ;;  %v1508_v45 = vmax.f32 %v966_v32, 0.0 }
 0x15a   : > { %v1509_v46 = vmax.f32 %v970_v39, 0.0  ;;  %5727 = vmatmul.mubr.msk.bf16.gmra.mrb[156].mxu0 %vm618_vm0, %v557_v37  ;;  %v560_v39 = vpack.c.bf16 %v475_v27, %v474_v25 }
 0x15b   : > { %1243 = vmatprep.mubr.bf16.mxu0 %v9862_v3 }
 0x15c   : > { %v1624_v51 = vpack.c.bf16 %v1509_v46, %v1508_v45 }
 0x15d   : > { %v975_v52 = vpop.f32.mrb[52].mxu0 }
 0x15e   : > { %v976_v54 = vadd.f32 %v975_v52, %v7038_v36  ;;  %v7174_v55 = vpop.f32.mrb[53].mxu0  ;;  %6225 = vmatprep.mubr.bf16.mxu1 %v1624_v51  ;;  %v476_v52 = vld [vmem:[%s6894_s12 + $0x2b0] sm:$0xff] }
 0x15f   : > { %v979_v59 = vpop.f32.mrb[54].mxu0 }
 0x160   : > { %v980_v61 = vadd.f32 %v979_v59, %v7038_v36  ;;  %v7177_v63 = vpop.f32.mrb[55].mxu0  ;;  %v1510_v0 = vmax.f32 %v976_v54, 0.0  ;;  %v477_v54 = vld [vmem:[%s6894_s12 + $0x2b8] sm:$0xff] }
 0x162   : > { %v1511_v4 = vmax.f32 %v980_v61, 0.0  ;;  %5728 = vmatmul.mubr.msk.bf16.gmra.mrb[160].mxu0 %vm618_vm0, %v558_v56 }
 0x163   : > { %1253 = vmatprep.mubr.bf16.mxu0 %v9862_v3 }
 0x164   : > { %v1625_v8 = vpack.c.bf16 %v1511_v4, %v1510_v0  ;;  %v561_v4 = vpack.c.bf16 %v477_v54, %v476_v52 }
 0x165   : > { %v985_v10 = vpop.f32.mrb[56].mxu0 }
 0x166   : > { %v986_v11 = vadd.f32 %v985_v10, %v7038_v36  ;;  %v7184_v12 = vpop.f32.mrb[57].mxu0  ;;  %6226 = vmatmul.mubr.bf16.gmra.mrb[24].mxu1 %v1625_v8 }
 0x167   : > { %v989_v17 = vpop.f32.mrb[58].mxu0 }
 0x168   : > { %v990_v19 = vadd.f32 %v989_v17, %v7038_v36  ;;  %v7187_v21 = vpop.f32.mrb[59].mxu0  ;;  %v1512_v22 = vmax.f32 %v986_v11, 0.0  ;;  %v479_v17 = vld [vmem:[%s6894_s12 + $0x2c8] sm:$0xff] }
 0x16a   : > { %v1513_v24 = vmax.f32 %v990_v19, 0.0  ;;  %5729 = vmatmul.mubr.msk.bf16.gmra.mrb[164].mxu0 %vm618_vm0, %v559_v16  ;;  %v478_v16 = vld [vmem:[%s6894_s12 + $0x2c0] sm:$0xff] }
 0x16b   : > { %1263 = vmatprep.mubr.bf16.mxu0 %v9862_v3  ;;  %v562_v27 = vpack.c.bf16 %v479_v17, %v478_v16  ;;  %v483_v16 = vld [vmem:[%s6894_s12 + $0x2e8] sm:$0xff] }
 0x16c   : > { %v1626_v29 = vpack.c.bf16 %v1513_v24, %v1512_v22 }
 0x16d   : > { %v995_v32 = vpop.f32.mrb[60].mxu0 }
 0x16e   : > { %v996_v37 = vadd.f32 %v995_v32, %v7038_v36  ;;  %v7194_v38 = vpop.f32.mrb[61].mxu0  ;;  %6229 = vmatprep.mubr.bf16.mxu1 %v1626_v29 }
 0x16f   : > { %v999_v45 = vpop.f32.mrb[62].mxu0 }
 0x170   : > { %v1000_v46 = vadd.f32 %v999_v45, %v7038_v36  ;;  %v7197_v47 = vpop.f32.mrb[63].mxu0  ;;  %v1514_v50 = vmax.f32 %v996_v37, 0.0 }
 0x172   : > { %v1515_v51 = vmax.f32 %v1000_v46, 0.0  ;;  %5730 = vmatmul.mubr.msk.bf16.gmra.mrb[168].mxu0 %vm618_vm0, %v560_v39  ;;  %v480_v46 = vld [vmem:[%s6894_s12 + $0x2d0] sm:$0xff] }
 0x173   : > { %1273 = vmatprep.mubr.bf16.mxu0 %v9862_v3 }
 0x174   : > { %v1627_v56 = vpack.c.bf16 %v1515_v51, %v1514_v50  ;;  %v481_v50 = vld [vmem:[%s6894_s12 + $0x2d8] sm:$0xff] }
 0x175   : > { %v1005_v59 = vpop.f32.mrb[64].mxu0 }
 0x176   : > { %v1006_v61 = vadd.f32 %v1005_v59, %v7038_v36  ;;  %v7204_v0 = vpop.f32.mrb[65].mxu0  ;;  %6230 = vmatmul.mubr.bf16.gmra.mrb[28].mxu1 %v1627_v56  ;;  %v563_v59 = vpack.c.bf16 %v481_v50, %v480_v46  ;;  %v484_v50 = vld [vmem:[%s6894_s12 + $0x2f0] sm:$0xff] }
 0x177   : > { %v1009_v5 = vpop.f32.mrb[66].mxu0 }
 0x178   : > { %v1010_v7 = vadd.f32 %v1009_v5, %v7038_v36  ;;  %v7207_v8 = vpop.f32.mrb[67].mxu0  ;;  %v1516_v10 = vmax.f32 %v1006_v61, 0.0 }
 0x17a   : > { %v1517_v11 = vmax.f32 %v1010_v7, 0.0  ;;  %5731 = vmatmul.mubr.msk.bf16.gmra.mrb[172].mxu0 %vm618_vm0, %v561_v4 }
 0x17b   : > { %1283 = vmatprep.mubr.bf16.mxu0 %v9862_v3 }
 0x17c   : > { %v1628_v19 = vpack.c.bf16 %v1517_v11, %v1516_v10  ;;  %v482_v11 = vld [vmem:[%s6894_s12 + $0x2e0] sm:$0xff] }
 0x17d   : > { %v1015_v22 = vpop.f32.mrb[68].mxu0 }
 0x17e   : > { %v1016_v24 = vadd.f32 %v1015_v22, %v7038_v36  ;;  %v7214_v25 = vpop.f32.mrb[69].mxu0  ;;  %6233 = vmatprep.mubr.bf16.mxu1 %v1628_v19 }
 0x17f   : > { %v1019_v29 = vpop.f32.mrb[70].mxu0 }
 0x180   : > { %v1020_v32 = vadd.f32 %v1019_v29, %v7038_v36  ;;  %v7217_v37 = vpop.f32.mrb[71].mxu0  ;;  %v1518_v39 = vmax.f32 %v1016_v24, 0.0 }
 0x182   : > { %v1519_v45 = vmax.f32 %v1020_v32, 0.0  ;;  %5732 = vmatmul.mubr.msk.bf16.gmra.mrb[176].mxu0 %vm618_vm0, %v562_v27  ;;  %v564_v27 = vpack.c.bf16 %v483_v16, %v482_v11 }
 0x183   : > { %1293 = vmatprep.mubr.bf16.mxu0 %v9862_v3 }
 0x184   : > { %v1629_v51 = vpack.c.bf16 %v1519_v45, %v1518_v39 }
 0x185   : > { %v1025_v52 = vpop.f32.mrb[72].mxu0 }
 0x186   : > { %v1026_v54 = vadd.f32 %v1025_v52, %v7038_v36  ;;  %v7224_v56 = vpop.f32.mrb[73].mxu0  ;;  %6234 = vmatmul.mubr.bf16.gmra.mrb[32].mxu1 %v1629_v51  ;;  %v485_v51 = vld [vmem:[%s6894_s12 + $0x2f8] sm:$0xff] }
 0x187   : > { %v1029_v61 = vpop.f32.mrb[74].mxu0 }
 0x188   : > { %v1030_v4 = vadd.f32 %v1029_v61, %v7038_v36  ;;  %v7227_v5 = vpop.f32.mrb[75].mxu0  ;;  %v1520_v7 = vmax.f32 %v1026_v54, 0.0 }
 0x18a   : > { %v1521_v10 = vmax.f32 %v1030_v4, 0.0  ;;  %5733 = vmatmul.mubr.msk.bf16.gmra.mrb[180].mxu0 %vm618_vm0, %v563_v59  ;;  %v565_v4 = vpack.c.bf16 %v485_v51, %v484_v50 }
 0x18b   : > { %1303 = vmatprep.mubr.bf16.mxu0 %v9862_v3 }
 0x18c   : > { %v1630_v17 = vpack.c.bf16 %v1521_v10, %v1520_v7 }
 0x18d   : > { %v1035_v19 = vpop.f32.mrb[76].mxu0 }
 0x18e   : > { %v1036_v22 = vadd.f32 %v1035_v19, %v7038_v36  ;;  %v7234_v24 = vpop.f32.mrb[77].mxu0  ;;  %6237 = vmatprep.mubr.bf16.mxu1 %v1630_v17  ;;  %v486_v19 = vld [vmem:[%s6894_s12 + $0x300] sm:$0xff] }
 0x18f   : > { %v1039_v29 = vpop.f32.mrb[78].mxu0 }
 0x190   : > { %v1040_v32 = vadd.f32 %v1039_v29, %v7038_v36  ;;  %v7237_v39 = vpop.f32.mrb[79].mxu0  ;;  %v1522_v45 = vmax.f32 %v1036_v22, 0.0  ;;  %v487_v22 = vld [vmem:[%s6894_s12 + $0x308] sm:$0xff] }
 0x192   : > { %v1523_v46 = vmax.f32 %v1040_v32, 0.0  ;;  %5734 = vmatmul.mubr.msk.bf16.gmra.mrb[184].mxu0 %vm618_vm0, %v564_v27 }
 0x193   : > { %1313 = vmatprep.mubr.bf16.mxu0 %v9862_v3 }
 0x194   : > { %v1631_v52 = vpack.c.bf16 %v1523_v46, %v1522_v45  ;;  %v566_v46 = vpack.c.bf16 %v487_v22, %v486_v19 }
 0x195   : > { %v1045_v54 = vpop.f32.mrb[80].mxu0 }
 0x196   : > { %v1046_v59 = vadd.f32 %v1045_v54, %v7038_v36  ;;  %v7244_v61 = vpop.f32.mrb[81].mxu0  ;;  %6238 = vmatmul.mubr.bf16.gmra.mrb[36].mxu1 %v1631_v52 }
 0x197   : > { %9937 = vst [vmem:[#allocation7_spill] sm:$0xff] %v7244_v61  ;;  %v1049_v7 = vpop.f32.mrb[82].mxu0 }
 0x198   : > { %v1050_v10 = vadd.f32 %v1049_v7, %v7038_v36  ;;  %v7247_v11 = vpop.f32.mrb[83].mxu0  ;;  %v1524_v16 = vmax.f32 %v1046_v59, 0.0  ;;  %v489_v7 = vld [vmem:[%s6894_s12 + $0x318] sm:$0xff] }
 0x199   : > { %9938 = vst [vmem:[#allocation8_spill] sm:$0xff] %v7247_v11 }
 0x19a   : > { %v1525_v17 = vmax.f32 %v1050_v10, 0.0  ;;  %5735 = vmatmul.mubr.msk.bf16.gmra.mrb[188].mxu0 %vm618_vm0, %v565_v4  ;;  %v488_v4 = vld [vmem:[%s6894_s12 + $0x310] sm:$0xff] }
 0x19b   : > { %1323 = vmatprep.mubr.bf16.mxu0 %v9862_v3  ;;  %v567_v22 = vpack.c.bf16 %v489_v7, %v488_v4 }
 0x19c   : > { %v1632_v27 = vpack.c.bf16 %v1525_v17, %v1524_v16 }
 0x19d   : > { %v1055_v29 = vpop.f32.mrb[84].mxu0 }
 0x19e   : > { %v1056_v32 = vadd.f32 %v1055_v29, %v7038_v36  ;;  %v7254_v45 = vpop.f32.mrb[85].mxu0  ;;  %6241 = vmatprep.mubr.bf16.mxu1 %v1632_v27 }
 0x19f   : > { %v1059_v50 = vpop.f32.mrb[86].mxu0 }
 0x1a0   : > { %v1060_v51 = vadd.f32 %v1059_v50, %v7038_v36  ;;  %v7257_v52 = vpop.f32.mrb[87].mxu0  ;;  %v1526_v54 = vmax.f32 %v1056_v32, 0.0 }
 0x1a1   : > { %9939 = vst [vmem:[#allocation9_spill] sm:$0xff] %v7257_v52 }
 0x1a2   : > { %v1527_v59 = vmax.f32 %v1060_v51, 0.0  ;;  %5736 = vmatmul.mubr.msk.bf16.gmra.mrb[192].mxu0 %vm618_vm0, %v566_v46  ;;  %v490_v51 = vld [vmem:[%s6894_s12 + $0x320] sm:$0xff] }
 0x1a3   : > { %1333 = vmatprep.mubr.bf16.mxu0 %v9862_v3 }
 0x1a4   : > { %v1633_v10 = vpack.c.bf16 %v1527_v59, %v1526_v54  ;;  %v491_v54 = vld [vmem:[%s6894_s12 + $0x328] sm:$0xff] }
 0x1a5   : > { %v1065_v16 = vpop.f32.mrb[88].mxu0  ;;  %v568_v7 = vpack.c.bf16 %v491_v54, %v490_v51 }
 0x1a6   : > { %v1066_v17 = vadd.f32 %v1065_v16, %v7038_v36  ;;  %v7264_v19 = vpop.f32.mrb[89].mxu0  ;;  %6242 = vmatmul.mubr.bf16.gmra.mrb[40].mxu1 %v1633_v10 }
 0x1a7   : > { %9940 = vst [vmem:[#allocation10_spill] sm:$0xff] %v7264_v19  ;;  %v1069_v27 = vpop.f32.mrb[90].mxu0 }
 0x1a8   : > { %v1070_v29 = vadd.f32 %v1069_v27, %v7038_v36  ;;  %v7267_v32 = vpop.f32.mrb[91].mxu0  ;;  %v1528_v46 = vmax.f32 %v1066_v17, 0.0 }
 0x1a9   : > { %9941 = vst [vmem:[#allocation11_spill] sm:$0xff] %v7267_v32 }
 0x1aa   : > { %v1529_v50 = vmax.f32 %v1070_v29, 0.0  ;;  %5737 = vmatmul.mubr.msk.bf16.gmra.mrb[196].mxu0 %vm618_vm0, %v567_v22 }
 0x1ab   : > { %1343 = vmatprep.mubr.bf16.mxu0 %v9862_v3 }
 0x1ac   : > { %v1634_v59 = vpack.c.bf16 %v1529_v50, %v1528_v46  ;;  %v492_v46 = vld [vmem:[%s6894_s12 + $0x330] sm:$0xff]  ;;  %v493_v50 = vld [vmem:[%s6894_s12 + $0x338] sm:$0xff] }
 0x1ad   : > { %v1075_v16 = vpop.f32.mrb[92].mxu0  ;;  %v569_v54 = vpack.c.bf16 %v493_v50, %v492_v46 }
 0x1ae   : > { %v1076_v10 = vadd.f32 %v1075_v16, %v7038_v36  ;;  %v7274_v4 = vpop.f32.mrb[93].mxu0  ;;  %6245 = vmatprep.mubr.bf16.mxu1 %v1634_v59 }
 0x1af   : > { %9942 = vst [vmem:[#allocation12_spill] sm:$0xff] %v7274_v4  ;;  %v1079_v27 = vpop.f32.mrb[94].mxu0 }
 0x1b0   : > { %v1080_v17 = vadd.f32 %v1079_v27, %v7038_v36  ;;  %v7277_v29 = vpop.f32.mrb[95].mxu0  ;;  %v1530_v22 = vmax.f32 %v1076_v10, 0.0 }
 0x1b1   : > { %9943 = vst [vmem:[#allocation13_spill] sm:$0xff] %v7277_v29 }
 0x1b2   : > { %v1531_v34 = vmax.f32 %v1080_v17, 0.0  ;;  %5738 = vmatmul.mubr.msk.bf16.gmra.mrb[200].mxu0 %vm618_vm0, %v568_v7 }
 0x1b3   : > { %1353 = vmatprep.mubr.bf16.mxu0 %v9862_v3 }
 0x1b4   : > { %v1635_v16 = vpack.c.bf16 %v1531_v34, %v1530_v22  ;;  %v494_v34 = vld [vmem:[%s6894_s12 + $0x340] sm:$0xff]  ;;  %v495_v22 = vld [vmem:[%s6894_s12 + $0x348] sm:$0xff] }
 0x1b5   : > { %v1085_v32 = vpop.f32.mrb[96].mxu0  ;;  %v570_v50 = vpack.c.bf16 %v495_v22, %v494_v34 }
 0x1b6   : > { %v1086_v59 = vadd.f32 %v1085_v32, %v7038_v36  ;;  %v7284_v51 = vpop.f32.mrb[97].mxu0  ;;  %6246 = vmatmul.mubr.bf16.gmra.mrb[44].mxu1 %v1635_v16 }
 0x1b7   : > { %9944 = vst [vmem:[#allocation14_spill] sm:$0xff] %v7284_v51  ;;  %v1089_v27 = vpop.f32.mrb[98].mxu0 }
 0x1b8   : > { %v1090_v10 = vadd.f32 %v1089_v27, %v7038_v36  ;;  %v7287_v17 = vpop.f32.mrb[99].mxu0  ;;  %v1532_v7 = vmax.f32 %v1086_v59, 0.0 }
 0x1b9   : > { %9945 = vst [vmem:[#allocation15_spill] sm:$0xff] %v7287_v17 }
 0x1ba   : > { %v1533_v29 = vmax.f32 %v1090_v10, 0.0  ;;  %5739 = vmatmul.mubr.msk.bf16.gmra.mrb[204].mxu0 %vm618_vm0, %v569_v54 }
 0x1bb   : > { %1363 = vmatprep.mubr.bf16.mxu0 %v9862_v3 }
 0x1bc   : > { %v1636_v32 = vpack.c.bf16 %v1533_v29, %v1532_v7  ;;  %v496_v29 = vld [vmem:[%s6894_s12 + $0x350] sm:$0xff]  ;;  %v497_v7 = vld [vmem:[%s6894_s12 + $0x358] sm:$0xff] }
 0x1bd   : > { %v1095_v19 = vpop.f32.mrb[100].mxu0  ;;  %v571_v22 = vpack.c.bf16 %v497_v7, %v496_v29 }
 0x1be   : > { %v1096_v16 = vadd.f32 %v1095_v19, %v7038_v36  ;;  %v7294_v46 = vpop.f32.mrb[101].mxu0  ;;  %6249 = vmatprep.mubr.bf16.mxu1 %v1636_v32 }
 0x1bf   : > { %9946 = vst [vmem:[#allocation16_spill] sm:$0xff] %v7294_v46  ;;  %v1099_v27 = vpop.f32.mrb[102].mxu0 }
 0x1c0   : > { %v1100_v59 = vadd.f32 %v1099_v27, %v7038_v36  ;;  %v7297_v10 = vpop.f32.mrb[103].mxu0  ;;  %v1534_v54 = vmax.f32 %v1096_v16, 0.0 }
 0x1c1   : > { %9947 = vst [vmem:[#allocation17_spill] sm:$0xff] %v7297_v10 }
 0x1c2   : > { %v1535_v17 = vmax.f32 %v1100_v59, 0.0  ;;  %5740 = vmatmul.mubr.msk.bf16.gmra.mrb[208].mxu0 %vm618_vm0, %v570_v50 }
 0x1c3   : > { %1373 = vmatprep.mubr.bf16.mxu0 %v9862_v3 }
 0x1c4   : > { %v1637_v19 = vpack.c.bf16 %v1535_v17, %v1534_v54  ;;  %v498_v17 = vld [vmem:[%s6894_s12 + $0x360] sm:$0xff]  ;;  %v499_v54 = vld [vmem:[%s6894_s12 + $0x368] sm:$0xff] }
 0x1c5   : > { %v1105_v51 = vpop.f32.mrb[104].mxu0  ;;  %v572_v7 = vpack.c.bf16 %v499_v54, %v498_v17 }
 0x1c6   : > { %v1106_v32 = vadd.f32 %v1105_v51, %v7038_v36  ;;  %v7304_v34 = vpop.f32.mrb[105].mxu0  ;;  %6250 = vmatmul.mubr.bf16.gmra.mrb[48].mxu1 %v1637_v19 }
 0x1c7   : > { %9948 = vst [vmem:[#allocation18_spill] sm:$0xff] %v7304_v34  ;;  %v1109_v27 = vpop.f32.mrb[106].mxu0  ;;  %v500_v34 = vld [vmem:[%s6894_s12 + $0x370] sm:$0xff] }
 0x1c8   : > { %v1110_v16 = vadd.f32 %v1109_v27, %v7038_v36  ;;  %v7307_v59 = vpop.f32.mrb[107].mxu0  ;;  %v1536_v50 = vmax.f32 %v1106_v32, 0.0 }
 0x1c9   : > { %9949 = vst [vmem:[#allocation19_spill] sm:$0xff] %v7307_v59 }
 0x1ca   : > { %v1537_v10 = vmax.f32 %v1110_v16, 0.0  ;;  %5741 = vmatmul.mubr.msk.bf16.gmra.mrb[212].mxu0 %vm618_vm0, %v571_v22 }
 0x1cb   : > { %1383 = vmatprep.mubr.bf16.mxu0 %v9862_v3 }
 0x1cc   : > { %v1638_v51 = vpack.c.bf16 %v1537_v10, %v1536_v50  ;;  %v501_v10 = vld [vmem:[%s6894_s12 + $0x378] sm:$0xff] }
 0x1cd   : > { %v1115_v46 = vpop.f32.mrb[108].mxu0  ;;  %v573_v54 = vpack.c.bf16 %v501_v10, %v500_v34 }
 0x1ce   : > { %v1116_v19 = vadd.f32 %v1115_v46, %v7038_v36  ;;  %v7314_v29 = vpop.f32.mrb[109].mxu0  ;;  %6253 = vmatprep.mubr.bf16.mxu1 %v1638_v51  ;;  %v594_v46 = vsub.s32 1, %v7023_v30 }
 0x1cf   : > { %9950 = vst [vmem:[#allocation20_spill] sm:$0xff] %v7314_v29  ;;  %v1119_v27 = vpop.f32.mrb[110].mxu0 }
 0x1d0   : > { %v1120_v32 = vadd.f32 %v1119_v27, %v7038_v36  ;;  %v7317_v16 = vpop.f32.mrb[111].mxu0  ;;  %v1538_v22 = vmax.f32 %v1116_v19, 0.0 }
 0x1d1   : > { %9951 = vst [vmem:[#allocation21_spill] sm:$0xff] %v7317_v16  ;;  %v502_v16 = vld [vmem:[%s6894_s12 + $0x380] sm:$0xff] }
 0x1d2   : > { %v1539_v59 = vmax.f32 %v1120_v32, 0.0  ;;  %5742 = vmatmul.mubr.msk.bf16.gmra.mrb[216].mxu0 %vm618_vm0, %v572_v7  ;;  %v7330_v7 = vld [vmem:[%s9853_s4] ss:$0 sm:$0xff]  ;;  %v7336_v32 = vrot.slane %v7032_v35, %v594_v46 }
 0x1d3   : > { %1393 = vmatprep.mubr.bf16.mxu0 %v9862_v3 }
 0x1d4   : > { %v1639_v50 = vpack.c.bf16 %v1539_v59, %v1538_v22 }
 0x1d5   : > { %v1125_v4 = vpop.f32.mrb[112].mxu0 }
 0x1d6   : > { %v1126_v51 = vadd.f32 %v1125_v4, %v7038_v36  ;;  %v7325_v17 = vpop.f32.mrb[113].mxu0  ;;  %6254 = vmatmul.mubr.bf16.gmra.mrb[52].mxu1 %v1639_v50 }
 0x1d7   : > { %9952 = vst [vmem:[#allocation22_spill] sm:$0xff] %v7325_v17  ;;  %v1129_v19 = vpop.f32.mrb[114].mxu0  ;;  %v9954_v17 = vmov 0  }
 0x1d8   : > { %v1130_v27 = vadd.f32 %v1129_v19, %v7038_v36  ;;  %v7333_v59 = vpop.f32.mrb[115].mxu0  ;;  %v1540_v22 = vmax.f32 %v1126_v51, 0.0  ;;  %v503_v19 = vld [vmem:[%s6894_s12 + $0x388] sm:$0xff] }
 0x1d9   : > { %9953 = vst [vmem:[#allocation23_spill] sm:$0xff] %v7333_v59  ;;  %v6203_v4 = vpop.f32.mrb[0].mxu1  ;;  %v858_v59 = vadd.f32 %v7054_v53, %v7336_v32 }
 0x1da   : > { %v1541_v3 = vmax.f32 %v1130_v27, 0.0  ;;  %v1790_v50 = vadd.f32 %v6203_v4, %v7330_v7  ;;  %5743 = vmatmul.mubr.msk.bf16.gmra.mrb[220].mxu0 %vm618_vm0, %v573_v54  ;;  %v1781_v34 = vpop.f32.mrb[1].mxu1  ;;  %v848_v4 = vadd.f32 %v7043_v40, %v7336_v32  ;;  %v862_v54 = vadd.f32 %v7057_v57, %v7336_v32 }
 0x1db   : > { %v1782_v10 = vadd.f32 %v7330_v7, %v1781_v34  ;;  %v6204_v30 = vpop.f32.mrb[2].mxu1  ;;  %1403 = vmatprep.mubr.bf16.mxu0 %v9954_v17 }
 0x1dc   : > { %v2294_v35 = vmax.f32 %v1790_v50, 0.0  ;;  %v1793_v46 = vadd.f32 %v6204_v30, %v7330_v7  ;;  %v1784_v51 = vpop.f32.mrb[3].mxu1  ;;  %v1640_v27 = vpack.c.bf16 %v1541_v3, %v1540_v22  ;;  %v574_v3 = vpack.c.bf16 %v503_v19, %v502_v16 }
 0x1dd   : > { %v2292_v34 = vmax.f32 %v1782_v10, 0.0  ;;  %v1785_v29 = vadd.f32 %v7330_v7, %v1784_v51  ;;  %v1135_v11 = vpop.f32.mrb[116].mxu0  ;;  %v852_v30 = vadd.f32 %v7046_v44, %v7336_v32  ;;  %v504_v44 = vld [vmem:[%s6894_s12 + $0x390] sm:$0xff] }
 0x1de   : > { %v7352_v52 = vadd.f32 %v2294_v35, %v858_v59  ;;  %v2295_v61 = vmax.f32 %v1793_v46, 0.0  ;;  %v1136_v53 = vadd.f32 %v1135_v11, %v7038_v36  ;;  %v7355_v50 = vpop.f32.mrb[117].mxu0  ;;  %6257 = vmatprep.mubr.bf16.mxu1 %v1640_v27 }
 0x1df   : > { %v7359_v40 = vadd.f32 %v2292_v34, %v848_v4  ;;  %v2293_v57 = vmax.f32 %v1785_v29, 0.0  ;;  %v1139_v22 = vpop.f32.mrb[118].mxu0  ;;  %v505_v29 = vld [vmem:[%s6894_s12 + $0x398] sm:$0xff] }
 0x1e0   : > { %9955 = vst [vmem:[#allocation24_spill] sm:$0xff] %v7352_v52  ;;  %v7361_v10 = vadd.f32 %v2295_v61, %v862_v54  ;;  %v1140_v59 = vadd.f32 %v1139_v22, %v7038_v36  ;;  %v7364_v35 = vpop.f32.mrb[119].mxu0  ;;  %v1542_v51 = vmax.f32 %v1136_v53, 0.0  ;;  %v575_v34 = vpack.c.bf16 %v505_v29, %v504_v44  ;;  %v507_v44 = vld [vmem:[%s6894_s12 + $0x3a8] sm:$0xff] }
 0x1e1   : > { %9956 = vst [vmem:[#allocation25_spill] sm:$0xff] %v7359_v40  ;;  %v7366_v11 = vadd.f32 %v2293_v57, %v852_v30  ;;  %v878_v29 = vadd.f32 %v7074_v14, %v7336_v32 }
 0x1e2   : > { %9957 = vst [vmem:[#allocation26_spill] sm:$0xff] %v7361_v10  ;;  %v1543_v16 = vmax.f32 %v1140_v59, 0.0  ;;  %5744 = vmatmul.mubr.msk.bf16.gmra.mrb[224].mxu0 %vm618_vm0, %v574_v3 }
 0x1e3   : > { %9958 = vst [vmem:[#allocation27_spill] sm:$0xff] %v7366_v11  ;;  %1413 = vmatprep.mubr.bf16.mxu0 %v9954_v17 }
 0x1e4   : > { %v1641_v19 = vpack.c.bf16 %v1543_v16, %v1542_v51 }
 0x1e5   : > { %v1145_v27 = vpop.f32.mrb[120].mxu0 }
 0x1e6   : > { %v1146_v4 = vadd.f32 %v1145_v27, %v7038_v36  ;;  %v7377_v54 = vpop.f32.mrb[121].mxu0  ;;  %6258 = vmatmul.mubr.bf16.gmra.mrb[56].mxu1 %v1641_v19  ;;  %v506_v19 = vld [vmem:[%s6894_s12 + $0x3a0] sm:$0xff] }
 0x1e7   : > { %v1149_v53 = vpop.f32.mrb[122].mxu0 }
 0x1e8   : > { %v1150_v3 = vadd.f32 %v1149_v53, %v7038_v36  ;;  %v7380_v30 = vpop.f32.mrb[123].mxu0  ;;  %v1544_v22 = vmax.f32 %v1146_v4, 0.0 }
 0x1e9   : > { %v6207_v57 = vpop.f32.mrb[4].mxu1 }
 0x1ea   : > { %v1545_v59 = vmax.f32 %v1150_v3, 0.0  ;;  %v1806_v46 = vadd.f32 %v6207_v57, %v7330_v7  ;;  %5745 = vmatmul.mubr.msk.bf16.gmra.mrb[228].mxu0 %vm618_vm0, %v575_v34  ;;  %v1797_v51 = vpop.f32.mrb[5].mxu1  ;;  %v868_v57 = vadd.f32 %v7064_v1, %v7336_v32  ;;  %v882_v34 = vadd.f32 %v7077_v18, %v7336_v32 }
 0x1eb   : > { %v1798_v16 = vadd.f32 %v7330_v7, %v1797_v51  ;;  %v6208_v27 = vpop.f32.mrb[6].mxu1  ;;  %1423 = vmatprep.mubr.bf16.mxu0 %v9954_v17  ;;  %v872_v1 = vadd.f32 %v7067_v6, %v7336_v32  ;;  %v508_v6 = vld [vmem:[%s6894_s12 + $0x3b0] sm:$0xff] }
 0x1ec   : > { %v2298_v53 = vmax.f32 %v1806_v46, 0.0  ;;  %v1809_v61 = vadd.f32 %v6208_v27, %v7330_v7  ;;  %v1800_v4 = vpop.f32.mrb[7].mxu1  ;;  %v1642_v3 = vpack.c.bf16 %v1545_v59, %v1544_v22  ;;  %v576_v22 = vpack.c.bf16 %v507_v44, %v506_v19 }
 0x1ed   : > { %v2296_v51 = vmax.f32 %v1798_v16, 0.0  ;;  %v1801_v52 = vadd.f32 %v7330_v7, %v1800_v4  ;;  %v1155_v10 = vpop.f32.mrb[124].mxu0 }
 0x1ee   : > { %v7396_v40 = vadd.f32 %v2298_v53, %v878_v29  ;;  %v2299_v11 = vmax.f32 %v1809_v61, 0.0  ;;  %v1156_v14 = vadd.f32 %v1155_v10, %v7038_v36  ;;  %v7399_v46 = vpop.f32.mrb[125].mxu0  ;;  %6261 = vmatprep.mubr.bf16.mxu1 %v1642_v3 }
 0x1ef   : > { %v7403_v59 = vadd.f32 %v2296_v51, %v868_v57  ;;  %v2297_v18 = vmax.f32 %v1801_v52, 0.0  ;;  %v1159_v16 = vpop.f32.mrb[126].mxu0  ;;  %v509_v52 = vld [vmem:[%s6894_s12 + $0x3b8] sm:$0xff] }
 0x1f0   : > { %9959 = vst [vmem:[#allocation28_spill] sm:$0xff] %v7396_v40  ;;  %v7405_v27 = vadd.f32 %v2299_v11, %v882_v34  ;;  %v1160_v29 = vadd.f32 %v1159_v16, %v7038_v36  ;;  %v7408_v61 = vpop.f32.mrb[127].mxu0  ;;  %v1546_v53 = vmax.f32 %v1156_v14, 0.0  ;;  %v577_v51 = vpack.c.bf16 %v509_v52, %v508_v6  ;;  %v511_v6 = vld [vmem:[%s6894_s12 + $0x3c8] sm:$0xff] }
 0x1f1   : > { %9960 = vst [vmem:[#allocation29_spill] sm:$0xff] %v7403_v59  ;;  %v7410_v10 = vadd.f32 %v2297_v18, %v872_v1  ;;  %v898_v52 = vadd.f32 %v7094_v43, %v7336_v32 }
 0x1f2   : > { %9961 = vst [vmem:[#allocation30_spill] sm:$0xff] %v7405_v27  ;;  %v1547_v4 = vmax.f32 %v1160_v29, 0.0  ;;  %5746 = vmatmul.mubr.msk.bf16.gmra.mrb[232].mxu0 %vm618_vm0, %v576_v22 }
 0x1f3   : > { %9962 = vst [vmem:[#allocation31_spill] sm:$0xff] %v7410_v10  ;;  %1433 = vmatprep.mubr.bf16.mxu0 %v9954_v17 }
 0x1f4   : > { %v1643_v44 = vpack.c.bf16 %v1547_v4, %v1546_v53 }
 0x1f5   : > { %v1165_v3 = vpop.f32.mrb[128].mxu0 }
 0x1f6   : > { %v1166_v57 = vadd.f32 %v1165_v3, %v7038_v36  ;;  %v7421_v34 = vpop.f32.mrb[129].mxu0  ;;  %6262 = vmatmul.mubr.bf16.gmra.mrb[60].mxu1 %v1643_v44  ;;  %v510_v44 = vld [vmem:[%s6894_s12 + $0x3c0] sm:$0xff] }
 0x1f7   : > { %v1169_v14 = vpop.f32.mrb[130].mxu0 }
 0x1f8   : > { %v1170_v22 = vadd.f32 %v1169_v14, %v7038_v36  ;;  %v7424_v1 = vpop.f32.mrb[131].mxu0  ;;  %v1548_v16 = vmax.f32 %v1166_v57, 0.0 }
 0x1f9   : > { %v6211_v18 = vpop.f32.mrb[8].mxu1 }
 0x1fa   : > { %v1549_v29 = vmax.f32 %v1170_v22, 0.0  ;;  %v1822_v19 = vadd.f32 %v6211_v18, %v7330_v7  ;;  %5747 = vmatmul.mubr.msk.bf16.gmra.mrb[236].mxu0 %vm618_vm0, %v577_v51  ;;  %v1813_v53 = vpop.f32.mrb[9].mxu1  ;;  %v888_v18 = vadd.f32 %v7084_v26, %v7336_v32  ;;  %v902_v51 = vadd.f32 %v7097_v48, %v7336_v32 }
 0x1fb   : > { %v1814_v4 = vadd.f32 %v7330_v7, %v1813_v53  ;;  %v6212_v3 = vpop.f32.mrb[10].mxu1  ;;  %1443 = vmatprep.mubr.bf16.mxu0 %v9954_v17  ;;  %v892_v26 = vadd.f32 %v7087_v31, %v7336_v32  ;;  %v512_v31 = vld [vmem:[%s6894_s12 + $0x3d0] sm:$0xff] }
 0x1fc   : > { %v1644_v14 = vpack.c.bf16 %v1549_v29, %v1548_v16  ;;  %v2302_v11 = vmax.f32 %v1822_v19, 0.0  ;;  %v1825_v57 = vadd.f32 %v6212_v3, %v7330_v7  ;;  %v1816_v22 = vpop.f32.mrb[11].mxu1  ;;  %v578_v19 = vpack.c.bf16 %v511_v6, %v510_v44 }
 0x1fd   : > { %v2300_v53 = vmax.f32 %v1814_v4, 0.0  ;;  %v1817_v40 = vadd.f32 %v7330_v7, %v1816_v22  ;;  %v1175_v27 = vpop.f32.mrb[132].mxu0 }
 0x1fe   : > { %v7440_v59 = vadd.f32 %v2302_v11, %v898_v52  ;;  %v2303_v10 = vmax.f32 %v1825_v57, 0.0  ;;  %v1176_v43 = vadd.f32 %v1175_v27, %v7038_v36  ;;  %v7443_v16 = vpop.f32.mrb[133].mxu0  ;;  %6265 = vmatprep.mubr.bf16.mxu1 %v1644_v14 }
 0x1ff   : > { %v7447_v29 = vadd.f32 %v2300_v53, %v888_v18  ;;  %v2301_v48 = vmax.f32 %v1817_v40, 0.0  ;;  %v1179_v4 = vpop.f32.mrb[134].mxu0  ;;  %v513_v40 = vld [vmem:[%s6894_s12 + $0x3d8] sm:$0xff] }
 0x200   : > { %9963 = vst [vmem:[#allocation32_spill] sm:$0xff] %v7440_v59  ;;  %v7449_v3 = vadd.f32 %v2303_v10, %v902_v51  ;;  %v1180_v11 = vadd.f32 %v1179_v4, %v7038_v36  ;;  %v7452_v52 = vpop.f32.mrb[135].mxu0  ;;  %v1550_v57 = vmax.f32 %v1176_v43, 0.0  ;;  %v579_v53 = vpack.c.bf16 %v513_v40, %v512_v31  ;;  %v515_v31 = vld [vmem:[%s6894_s12 + $0x3e8] sm:$0xff] }
 0x201   : > { %9964 = vst [vmem:[#allocation33_spill] sm:$0xff] %v7447_v29  ;;  %v7454_v27 = vadd.f32 %v2301_v48, %v892_v26  ;;  %v918_v40 = vadd.f32 %v7114_v9, %v7336_v32 }
 0x202   : > { %9965 = vst [vmem:[#allocation34_spill] sm:$0xff] %v7449_v3  ;;  %v1551_v22 = vmax.f32 %v1180_v11, 0.0  ;;  %5748 = vmatmul.mubr.msk.bf16.gmra.mrb[240].mxu0 %vm618_vm0, %v578_v19 }
 0x203   : > { %9966 = vst [vmem:[#allocation35_spill] sm:$0xff] %v7454_v27  ;;  %1453 = vmatprep.mubr.bf16.mxu0 %v9954_v17 }
 0x204   : > { %v1645_v6 = vpack.c.bf16 %v1551_v22, %v1550_v57 }
 0x205   : > { %v1185_v14 = vpop.f32.mrb[136].mxu0 }
 0x206   : > { %v1186_v18 = vadd.f32 %v1185_v14, %v7038_v36  ;;  %v7465_v51 = vpop.f32.mrb[137].mxu0  ;;  %6266 = vmatmul.mubr.bf16.gmra.mrb[64].mxu1 %v1645_v6  ;;  %v514_v6 = vld [vmem:[%s6894_s12 + $0x3e0] sm:$0xff] }
 0x207   : > { %v1189_v43 = vpop.f32.mrb[138].mxu0 }
 0x208   : > { %v1190_v19 = vadd.f32 %v1189_v43, %v7038_v36  ;;  %v7468_v26 = vpop.f32.mrb[139].mxu0  ;;  %v1552_v4 = vmax.f32 %v1186_v18, 0.0 }
 0x209   : > { %v6215_v48 = vpop.f32.mrb[12].mxu1 }
 0x20a   : > { %v1553_v11 = vmax.f32 %v1190_v19, 0.0  ;;  %v1838_v44 = vadd.f32 %v6215_v48, %v7330_v7  ;;  %5749 = vmatmul.mubr.msk.bf16.gmra.mrb[244].mxu0 %vm618_vm0, %v579_v53  ;;  %v1829_v57 = vpop.f32.mrb[13].mxu1  ;;  %v908_v48 = vadd.f32 %v7104_v58, %v7336_v32  ;;  %v922_v53 = vadd.f32 %v7117_v13, %v7336_v32 }
 0x20b   : > { %v1830_v22 = vadd.f32 %v7330_v7, %v1829_v57  ;;  %v6216_v14 = vpop.f32.mrb[14].mxu1  ;;  %1463 = vmatprep.mubr.bf16.mxu0 %v9954_v17  ;;  %v912_v58 = vadd.f32 %v7107_v62, %v7336_v32  ;;  %v516_v62 = vld [vmem:[%s6894_s12 + $0x3f0] sm:$0xff] }
 0x20c   : > { %v1646_v43 = vpack.c.bf16 %v1553_v11, %v1552_v4  ;;  %v2306_v10 = vmax.f32 %v1838_v44, 0.0  ;;  %v1841_v18 = vadd.f32 %v6216_v14, %v7330_v7  ;;  %v1832_v19 = vpop.f32.mrb[15].mxu1  ;;  %v580_v44 = vpack.c.bf16 %v515_v31, %v514_v6 }
 0x20d   : > { %v2304_v57 = vmax.f32 %v1830_v22, 0.0  ;;  %v1833_v59 = vadd.f32 %v7330_v7, %v1832_v19  ;;  %v1195_v3 = vpop.f32.mrb[140].mxu0 }
 0x20e   : > { %v7484_v29 = vadd.f32 %v2306_v10, %v918_v40  ;;  %v2307_v27 = vmax.f32 %v1841_v18, 0.0  ;;  %v1196_v9 = vadd.f32 %v1195_v3, %v7038_v36  ;;  %v7487_v4 = vpop.f32.mrb[141].mxu0  ;;  %6269 = vmatprep.mubr.bf16.mxu1 %v1646_v43 }
 0x20f   : > { %v7491_v11 = vadd.f32 %v2304_v57, %v908_v48  ;;  %v2305_v13 = vmax.f32 %v1833_v59, 0.0  ;;  %v1199_v22 = vpop.f32.mrb[142].mxu0  ;;  %v517_v59 = vld [vmem:[%s6894_s12 + $0x3f8] sm:$0xff] }
 0x210   : > { %9967 = vst [vmem:[#allocation36_spill] sm:$0xff] %v7484_v29  ;;  %v7493_v14 = vadd.f32 %v2307_v27, %v922_v53  ;;  %v1200_v10 = vadd.f32 %v1199_v22, %v7038_v36  ;;  %v7496_v40 = vpop.f32.mrb[143].mxu0  ;;  %v1554_v18 = vmax.f32 %v1196_v9, 0.0  ;;  %v581_v57 = vpack.c.bf16 %v517_v59, %v516_v62 }
 0x211   : > { %v7498_v3 = vadd.f32 %v2305_v13, %v912_v58 }
 0x212   : > { %v1555_v19 = vmax.f32 %v1200_v10, 0.0  ;;  %5750 = vmatmul.mubr.msk.bf16.gmra.mrb[248].mxu0 %vm618_vm0, %v580_v44 }
 0x213   : > { %1473 = vmatprep.mubr.bf16.mxu0 %v9954_v17 }
 0x214   : > { %v1647_v31 = vpack.c.bf16 %v1555_v19, %v1554_v18 }
 0x215   : > { %v1205_v43 = vpop.f32.mrb[144].mxu0 }
 0x216   : > { %v1206_v48 = vadd.f32 %v1205_v43, %v7038_v36  ;;  %v7509_v53 = vpop.f32.mrb[145].mxu0  ;;  %6270 = vmatmul.mubr.bf16.gmra.mrb[68].mxu1 %v1647_v31  ;;  %v938_v31 = vadd.f32 %v7134_v42, %v7336_v32 }
 0x217   : > { %v1209_v9 = vpop.f32.mrb[146].mxu0 }
 0x218   : > { %v1210_v44 = vadd.f32 %v1209_v9, %v7038_v36  ;;  %v7512_v58 = vpop.f32.mrb[147].mxu0  ;;  %v1556_v17 = vmax.f32 %v1206_v48, 0.0  ;;  %v928_v48 = vadd.f32 %v7124_v23, %v7336_v32 }
 0x219   : > { %v6219_v13 = vpop.f32.mrb[16].mxu1 }
 0x21a   : > { %v1557_v22 = vmax.f32 %v1210_v44, 0.0  ;;  %v1854_v10 = vadd.f32 %v6219_v13, %v7330_v7  ;;  %5751 = vmatmul.mubr.msk.bf16.gmra.mrb[252].mxu0 %vm618_vm0, %v581_v57  ;;  %v1845_v18 = vpop.f32.mrb[17].mxu1  ;;  %v942_v57 = vadd.f32 %v7137_v49, %v7336_v32 }
 0x21b   : > { %v1846_v19 = vadd.f32 %v7330_v7, %v1845_v18  ;;  %v6220_v43 = vpop.f32.mrb[18].mxu1 }
 0x21c   : > { %v1648_v62 = vpack.c.bf16 %v1557_v22, %v1556_v17  ;;  %v2310_v59 = vmax.f32 %v1854_v10, 0.0  ;;  %v1857_v9 = vadd.f32 %v6220_v43, %v7330_v7  ;;  %v1848_v6 = vpop.f32.mrb[19].mxu1  ;;  %v932_v22 = vadd.f32 %v7127_v28, %v7336_v32 }
 0x21d   : > { %v2308_v44 = vmax.f32 %v1846_v19, 0.0  ;;  %v1849_v13 = vadd.f32 %v7330_v7, %v1848_v6  ;;  %v1215_v27 = vpop.f32.mrb[148].mxu0 }
 0x21e   : > { %v7525_v18 = vadd.f32 %v2310_v59, %v938_v31  ;;  %v2311_v29 = vmax.f32 %v1857_v9, 0.0  ;;  %v1216_v42 = vadd.f32 %v1215_v27, %v7038_v36  ;;  %v7528_v17 = vpop.f32.mrb[149].mxu0  ;;  %6273 = vmatprep.mubr.bf16.mxu1 %v1648_v62 }
 0x21f   : > { %v7532_v10 = vadd.f32 %v2308_v44, %v928_v48  ;;  %v2309_v23 = vmax.f32 %v1849_v13, 0.0  ;;  %v1219_v19 = vpop.f32.mrb[150].mxu0 }
 0x220   : > { %9968 = vst [vmem:[#allocation37_spill] sm:$0xff] %v7525_v18  ;;  %v7534_v6 = vadd.f32 %v2311_v29, %v942_v57  ;;  %v1220_v43 = vadd.f32 %v1219_v19, %v7038_v36  ;;  %v7537_v49 = vpop.f32.mrb[151].mxu0  ;;  %v1558_v59 = vmax.f32 %v1216_v42, 0.0 }
 0x221   : > { %9969 = vst [vmem:[#allocation38_spill] sm:$0xff] %v7532_v10  ;;  %v7539_v31 = vadd.f32 %v2309_v23, %v932_v22 }
 0x222   : > { %9970 = vst [vmem:[#allocation39_spill] sm:$0xff] %v7534_v6  ;;  %v1559_v62 = vmax.f32 %v1220_v43, 0.0 }
 0x223   : > { %9971 = vst [vmem:[#allocation40_spill] sm:$0xff] %v7539_v31 }
 0x224   : > { %v1649_v9 = vpack.c.bf16 %v1559_v62, %v1558_v59  ;;  %v958_v62 = vadd.f32 %v7154_v15, %v7336_v32 }
 0x225   : > { %v1225_v48 = vpop.f32.mrb[152].mxu0 }
 0x226   : > { %v1226_v44 = vadd.f32 %v1225_v48, %v7038_v36  ;;  %v7546_v29 = vpop.f32.mrb[153].mxu0  ;;  %6274 = vmatmul.mubr.bf16.gmra.mrb[72].mxu1 %v1649_v9 }
 0x227   : > { %v1229_v13 = vpop.f32.mrb[154].mxu0 }
 0x228   : > { %v1230_v57 = vadd.f32 %v1229_v13, %v7038_v36  ;;  %v7549_v22 = vpop.f32.mrb[155].mxu0  ;;  %v1560_v19 = vmax.f32 %v1226_v44, 0.0  ;;  %v948_v13 = vadd.f32 %v7144_v60, %v7336_v32 }
 0x229   : > { %v6223_v23 = vpop.f32.mrb[20].mxu1 }
 0x22a   : > { %v1561_v27 = vmax.f32 %v1230_v57, 0.0  ;;  %v1870_v42 = vadd.f32 %v6223_v23, %v7330_v7  ;;  %v1861_v43 = vpop.f32.mrb[21].mxu1  ;;  %v962_v23 = vadd.f32 %v7157_v20, %v7336_v32 }
 0x22b   : > { %v1862_v28 = vadd.f32 %v7330_v7, %v1861_v43  ;;  %v6224_v59 = vpop.f32.mrb[22].mxu1 }
 0x22c   : > { %v1650_v48 = vpack.c.bf16 %v1561_v27, %v1560_v19  ;;  %v2314_v18 = vmax.f32 %v1870_v42, 0.0  ;;  %v1873_v9 = vadd.f32 %v6224_v59, %v7330_v7  ;;  %v1864_v6 = vpop.f32.mrb[23].mxu1  ;;  %v952_v19 = vadd.f32 %v7147_v2, %v7336_v32 }
 0x22d   : > { %v2312_v10 = vmax.f32 %v1862_v28, 0.0  ;;  %v1865_v44 = vadd.f32 %v7330_v7, %v1864_v6  ;;  %v1235_v57 = vpop.f32.mrb[156].mxu0 }
 0x22e   : > { %v7561_v43 = vadd.f32 %v2314_v18, %v958_v62  ;;  %v2315_v31 = vmax.f32 %v1873_v9, 0.0  ;;  %v1236_v15 = vadd.f32 %v1235_v57, %v7038_v36  ;;  %v7564_v27 = vpop.f32.mrb[157].mxu0  ;;  %6277 = vmatprep.mubr.bf16.mxu1 %v1650_v48 }
 0x22f   : > { %v7568_v42 = vadd.f32 %v2312_v10, %v948_v13  ;;  %v2313_v60 = vmax.f32 %v1865_v44, 0.0  ;;  %v1239_v28 = vpop.f32.mrb[158].mxu0 }
 0x230   : > { %9972 = vst [vmem:[#allocation41_spill] sm:$0xff] %v7561_v43  ;;  %v7570_v6 = vadd.f32 %v2315_v31, %v962_v23  ;;  %v1240_v59 = vadd.f32 %v1239_v28, %v7038_v36  ;;  %v7573_v20 = vpop.f32.mrb[159].mxu0  ;;  %v1562_v9 = vmax.f32 %v1236_v15, 0.0 }
 0x231   : > { %9973 = vst [vmem:[#allocation42_spill] sm:$0xff] %v7568_v42  ;;  %v7575_v18 = vadd.f32 %v2313_v60, %v952_v19 }
 0x232   : > { %9974 = vst [vmem:[#allocation43_spill] sm:$0xff] %v7570_v6  ;;  %v1563_v48 = vmax.f32 %v1240_v59, 0.0 }
 0x233   : > { %9975 = vst [vmem:[#allocation44_spill] sm:$0xff] %v7575_v18 }
 0x234   : > { %v1651_v10 = vpack.c.bf16 %v1563_v48, %v1562_v9  ;;  %v978_v48 = vadd.f32 %v7174_v55, %v7336_v32 }
 0x235   : > { %v1245_v13 = vpop.f32.mrb[160].mxu0 }
 0x236   : > { %v1246_v44 = vadd.f32 %v1245_v13, %v7038_v36  ;;  %v7582_v31 = vpop.f32.mrb[161].mxu0  ;;  %6278 = vmatmul.mubr.bf16.gmra.mrb[76].mxu1 %v1651_v10 }
 0x237   : > { %v1249_v57 = vpop.f32.mrb[162].mxu0 }
 0x238   : > { %v1250_v23 = vadd.f32 %v1249_v57, %v7038_v36  ;;  %v7585_v19 = vpop.f32.mrb[163].mxu0  ;;  %v1564_v28 = vmax.f32 %v1246_v44, 0.0  ;;  %v968_v57 = vadd.f32 %v7164_v33, %v7336_v32 }
 0x239   : > { %v6227_v60 = vpop.f32.mrb[24].mxu1 }
 0x23a   : > { %v1565_v62 = vmax.f32 %v1250_v23, 0.0  ;;  %v1886_v15 = vadd.f32 %v6227_v60, %v7330_v7  ;;  %v1877_v59 = vpop.f32.mrb[25].mxu1  ;;  %v982_v60 = vadd.f32 %v7177_v63, %v7336_v32 }
 0x23b   : > { %v1878_v2 = vadd.f32 %v7330_v7, %v1877_v59  ;;  %v6228_v9 = vpop.f32.mrb[26].mxu1 }
 0x23c   : > { %v1652_v13 = vpack.c.bf16 %v1565_v62, %v1564_v28  ;;  %v2318_v43 = vmax.f32 %v1886_v15, 0.0  ;;  %v1889_v10 = vadd.f32 %v6228_v9, %v7330_v7  ;;  %v1880_v6 = vpop.f32.mrb[27].mxu1  ;;  %v972_v28 = vadd.f32 %v7167_v41, %v7336_v32 }
 0x23d   : > { %v2316_v42 = vmax.f32 %v1878_v2, 0.0  ;;  %v1881_v44 = vadd.f32 %v7330_v7, %v1880_v6  ;;  %v1255_v23 = vpop.f32.mrb[164].mxu0 }
 0x23e   : > { %v7597_v59 = vadd.f32 %v2318_v43, %v978_v48  ;;  %v2319_v18 = vmax.f32 %v1889_v10, 0.0  ;;  %v1256_v55 = vadd.f32 %v1255_v23, %v7038_v36  ;;  %v7600_v62 = vpop.f32.mrb[165].mxu0  ;;  %6281 = vmatprep.mubr.bf16.mxu1 %v1652_v13 }
 0x23f   : > { %v7604_v15 = vadd.f32 %v2316_v42, %v968_v57  ;;  %v2317_v33 = vmax.f32 %v1881_v44, 0.0  ;;  %v1259_v2 = vpop.f32.mrb[166].mxu0  ;;  %v6686_v42 = vld [vmem:[%s9854_s5] sm:$0xff]  }
 0x240   : > { %9976 = vst [vmem:[#allocation45_spill] sm:$0xff] %v7597_v59  ;;  %v7606_v6 = vadd.f32 %v2319_v18, %v982_v60  ;;  %v1260_v9 = vadd.f32 %v1259_v2, %v7038_v36  ;;  %v7609_v63 = vpop.f32.mrb[167].mxu0  ;;  %v1566_v10 = vmax.f32 %v1256_v55, 0.0  ;;  %6329 = vmatprep.subr.bf16.mxu1 %v6686_v42 }
 0x241   : > { %v7611_v43 = vadd.f32 %v2317_v33, %v972_v28  ;;  %6330 = vmatpush3.bf16.msra.mxu1 %v6686_v42 }
 0x242   : > { %9977 = vst [vmem:[#allocation46_spill] sm:$0xff] %v7606_v6  ;;  %v1567_v13 = vmax.f32 %v1260_v9, 0.0 }
 0x244   : > { %v1653_v18 = vpack.c.bf16 %v1567_v13, %v1566_v10 }
 0x245   : > { %v1265_v57 = vpop.f32.mrb[168].mxu0 }
 0x246   : > { %v1266_v44 = vadd.f32 %v1265_v57, %v7038_v36  ;;  %v7621_v23 = vpop.f32.mrb[169].mxu0  ;;  %6282 = vmatmul.mubr.bf16.gmra.mrb[80].mxu1 %v1653_v18  ;;  %v998_v57 = vadd.f32 %v7194_v38, %v7336_v32 }
 0x247   : > { %9978 = vst [vmem:[#allocation47_spill] sm:$0xff] %v7621_v23  ;;  %v1269_v60 = vpop.f32.mrb[170].mxu0 }
 0x248   : > { %v1270_v55 = vadd.f32 %v1269_v60, %v7038_v36  ;;  %v7624_v28 = vpop.f32.mrb[171].mxu0  ;;  %v1568_v2 = vmax.f32 %v1266_v44, 0.0  ;;  %v988_v60 = vadd.f32 %v7184_v12, %v7336_v32 }
 0x249   : > { %9979 = vst [vmem:[#allocation48_spill] sm:$0xff] %v7624_v28  ;;  %v6231_v33 = vpop.f32.mrb[28].mxu1 }
 0x24a   : > { %v1569_v9 = vmax.f32 %v1270_v55, 0.0  ;;  %v1902_v48 = vadd.f32 %v6231_v33, %v7330_v7  ;;  %v1893_v41 = vpop.f32.mrb[29].mxu1  ;;  %v1002_v33 = vadd.f32 %v7197_v47, %v7336_v32 }
 0x24b   : > { %v1894_v10 = vadd.f32 %v7330_v7, %v1893_v41  ;;  %v6232_v13 = vpop.f32.mrb[30].mxu1 }
 0x24c   : > { %v1654_v59 = vpack.c.bf16 %v1569_v9, %v1568_v2  ;;  %v2322_v18 = vmax.f32 %v1902_v48, 0.0  ;;  %v1905_v42 = vadd.f32 %v6232_v13, %v7330_v7  ;;  %v1896_v6 = vpop.f32.mrb[31].mxu1  ;;  %v992_v48 = vadd.f32 %v7187_v21, %v7336_v32 }
 0x24d   : > { %v2320_v28 = vmax.f32 %v1894_v10, 0.0  ;;  %v1897_v44 = vadd.f32 %v7330_v7, %v1896_v6  ;;  %v1275_v55 = vpop.f32.mrb[172].mxu0 }
 0x24e   : > { %v7636_v41 = vadd.f32 %v2322_v18, %v998_v57  ;;  %v2323_v23 = vmax.f32 %v1905_v42, 0.0  ;;  %v1276_v38 = vadd.f32 %v1275_v55, %v7038_v36  ;;  %v7639_v2 = vpop.f32.mrb[173].mxu0  ;;  %6285 = vmatprep.mubr.bf16.mxu1 %v1654_v59 }
 0x24f   : > { %v7643_v9 = vadd.f32 %v2320_v28, %v988_v60  ;;  %v2321_v12 = vmax.f32 %v1897_v44, 0.0  ;;  %v1279_v10 = vpop.f32.mrb[174].mxu0 }
 0x250   : > { %9980 = vst [vmem:[#allocation49_spill] sm:$0xff] %v7636_v41  ;;  %v7645_v6 = vadd.f32 %v2323_v23, %v1002_v33  ;;  %v1280_v13 = vadd.f32 %v1279_v10, %v7038_v36  ;;  %v7648_v47 = vpop.f32.mrb[175].mxu0  ;;  %v1570_v42 = vmax.f32 %v1276_v38, 0.0 }
 0x251   : > { %v7650_v57 = vadd.f32 %v2321_v12, %v992_v48 }
 0x252   : > { %9981 = vst [vmem:[#allocation50_spill] sm:$0xff] %v7645_v6  ;;  %v1571_v59 = vmax.f32 %v1280_v13, 0.0 }
 0x254   : > { %v1655_v28 = vpack.c.bf16 %v1571_v59, %v1570_v42  ;;  %v1018_v59 = vadd.f32 %v7214_v25, %v7336_v32 }
 0x255   : > { %v1285_v60 = vpop.f32.mrb[176].mxu0 }
 0x256   : > { %v1286_v44 = vadd.f32 %v1285_v60, %v7038_v36  ;;  %v7657_v23 = vpop.f32.mrb[177].mxu0  ;;  %6286 = vmatmul.mubr.bf16.gmra.mrb[84].mxu1 %v1655_v28 }
 0x257   : > { %9982 = vst [vmem:[#allocation51_spill] sm:$0xff] %v7657_v23  ;;  %v1289_v55 = vpop.f32.mrb[178].mxu0 }
 0x258   : > { %v1290_v33 = vadd.f32 %v1289_v55, %v7038_v36  ;;  %v7660_v48 = vpop.f32.mrb[179].mxu0  ;;  %v1572_v10 = vmax.f32 %v1286_v44, 0.0  ;;  %v1008_v55 = vadd.f32 %v7204_v0, %v7336_v32 }
 0x259   : > { %9983 = vst [vmem:[#allocation52_spill] sm:$0xff] %v7660_v48  ;;  %v6235_v12 = vpop.f32.mrb[32].mxu1 }
 0x25a   : > { %v1573_v18 = vmax.f32 %v1290_v33, 0.0  ;;  %v1918_v38 = vadd.f32 %v6235_v12, %v7330_v7  ;;  %v1909_v13 = vpop.f32.mrb[33].mxu1  ;;  %v1022_v12 = vadd.f32 %v7217_v37, %v7336_v32 }
 0x25b   : > { %v1910_v21 = vadd.f32 %v7330_v7, %v1909_v13  ;;  %v6236_v42 = vpop.f32.mrb[34].mxu1 }
 0x25c   : > { %v1656_v60 = vpack.c.bf16 %v1573_v18, %v1572_v10  ;;  %v2326_v23 = vmax.f32 %v1918_v38, 0.0  ;;  %v1921_v28 = vadd.f32 %v6236_v42, %v7330_v7  ;;  %v1912_v41 = vpop.f32.mrb[35].mxu1  ;;  %v1012_v10 = vadd.f32 %v7207_v8, %v7336_v32 }
 0x25d   : > { %v2324_v48 = vmax.f32 %v1910_v21, 0.0  ;;  %v1913_v44 = vadd.f32 %v7330_v7, %v1912_v41  ;;  %v1295_v33 = vpop.f32.mrb[180].mxu0 }
 0x25e   : > { %v7672_v13 = vadd.f32 %v2326_v23, %v1018_v59  ;;  %v2327_v6 = vmax.f32 %v1921_v28, 0.0  ;;  %v1296_v25 = vadd.f32 %v1295_v33, %v7038_v36  ;;  %v7675_v18 = vpop.f32.mrb[181].mxu0  ;;  %6289 = vmatprep.mubr.bf16.mxu1 %v1656_v60 }
 0x25f   : > { %v7679_v38 = vadd.f32 %v2324_v48, %v1008_v55  ;;  %v2325_v0 = vmax.f32 %v1913_v44, 0.0  ;;  %v1299_v21 = vpop.f32.mrb[182].mxu0 }
 0x260   : > { %9984 = vst [vmem:[#allocation53_spill] sm:$0xff] %v7672_v13  ;;  %v7681_v41 = vadd.f32 %v2327_v6, %v1022_v12  ;;  %v1300_v42 = vadd.f32 %v1299_v21, %v7038_v36  ;;  %v7684_v37 = vpop.f32.mrb[183].mxu0  ;;  %v1574_v28 = vmax.f32 %v1296_v25, 0.0 }
 0x261   : > { %v7686_v23 = vadd.f32 %v2325_v0, %v1012_v10 }
 0x262   : > { %9985 = vst [vmem:[#allocation54_spill] sm:$0xff] %v7681_v41  ;;  %v1575_v60 = vmax.f32 %v1300_v42, 0.0 }
 0x264   : > { %v1657_v48 = vpack.c.bf16 %v1575_v60, %v1574_v28  ;;  %v1038_v60 = vadd.f32 %v7234_v24, %v7336_v32 }
 0x265   : > { %v1305_v55 = vpop.f32.mrb[184].mxu0 }
 0x266   : > { %v1306_v44 = vadd.f32 %v1305_v55, %v7038_v36  ;;  %v7693_v6 = vpop.f32.mrb[185].mxu0  ;;  %6290 = vmatmul.mubr.bf16.gmra.mrb[88].mxu1 %v1657_v48 }
 0x267   : > { %9986 = vst [vmem:[#allocation55_spill] sm:$0xff] %v7693_v6  ;;  %v1309_v33 = vpop.f32.mrb[186].mxu0 }
 0x268   : > { %v1310_v12 = vadd.f32 %v1309_v33, %v7038_v36  ;;  %v7696_v10 = vpop.f32.mrb[187].mxu0  ;;  %v1576_v21 = vmax.f32 %v1306_v44, 0.0  ;;  %v1028_v33 = vadd.f32 %v7224_v56, %v7336_v32 }
 0x269   : > { %9987 = vst [vmem:[#allocation56_spill] sm:$0xff] %v7696_v10  ;;  %v6239_v0 = vpop.f32.mrb[36].mxu1 }
 0x26a   : > { %v1577_v59 = vmax.f32 %v1310_v12, 0.0  ;;  %v1934_v25 = vadd.f32 %v6239_v0, %v7330_v7  ;;  %v1925_v42 = vpop.f32.mrb[37].mxu1  ;;  %v1042_v0 = vadd.f32 %v7237_v39, %v7336_v32 }
 0x26b   : > { %v1926_v8 = vadd.f32 %v7330_v7, %v1925_v42  ;;  %v6240_v28 = vpop.f32.mrb[38].mxu1 }
 0x26c   : > { %v1658_v55 = vpack.c.bf16 %v1577_v59, %v1576_v21  ;;  %v2330_v6 = vmax.f32 %v1934_v25, 0.0  ;;  %v1937_v48 = vadd.f32 %v6240_v28, %v7330_v7  ;;  %v1928_v13 = vpop.f32.mrb[39].mxu1  ;;  %v1032_v21 = vadd.f32 %v7227_v5, %v7336_v32 }
 0x26d   : > { %v2328_v10 = vmax.f32 %v1926_v8, 0.0  ;;  %v1929_v44 = vadd.f32 %v7330_v7, %v1928_v13  ;;  %v1315_v12 = vpop.f32.mrb[188].mxu0 }
 0x26e   : > { %v7708_v42 = vadd.f32 %v2330_v6, %v1038_v60  ;;  %v2331_v41 = vmax.f32 %v1937_v48, 0.0  ;;  %v1316_v24 = vadd.f32 %v1315_v12, %v7038_v36  ;;  %v7711_v59 = vpop.f32.mrb[189].mxu0  ;;  %6293 = vmatprep.mubr.bf16.mxu1 %v1658_v55  ;;  %v6687_v6 = vld [vmem:[%s9854_s5 + $0x8] sm:$0xff]  }
 0x26f   : > { %9989 = vst [vmem:[#allocation58_spill] sm:$0xff] %v7711_v59  ;;  %v7715_v25 = vadd.f32 %v2328_v10, %v1028_v33  ;;  %v2329_v56 = vmax.f32 %v1929_v44, 0.0  ;;  %v1319_v8 = vpop.f32.mrb[190].mxu0  ;;  %6331 = vmatprep.subr.bf16.mxu1 %v6687_v6  ;;  %v6688_v33 = vld [vmem:[%s9854_s5 + $0x10] sm:$0xff]  }
 0x270   : > { %9988 = vst [vmem:[#allocation57_spill] sm:$0xff] %v7708_v42  ;;  %v7717_v13 = vadd.f32 %v2331_v41, %v1042_v0  ;;  %v1320_v28 = vadd.f32 %v1319_v8, %v7038_v36  ;;  %v7720_v39 = vpop.f32.mrb[191].mxu0  ;;  %v1578_v5 = vmax.f32 %v1316_v24, 0.0  ;;  %6332 = vmatpush3.bf16.msra.mxu1 %v6687_v6  ;;  %v6689_v8 = vld [vmem:[%s9854_s5 + $0x18] sm:$0xff]   ;;  %v9996_v42 = vld [vmem:[#allocation9_spill] sm:$0xff] }
 0x271   : > { %9990 = vst [vmem:[#allocation59_spill] sm:$0xff] %v7715_v25  ;;  %9992 = vst [vmem:[#allocation61_spill] sm:$0xff] %v7720_v39  ;;  %v7725_v60 = vadd.f32 %v2329_v56, %v1032_v21  ;;  %6333 = vmatprep.subr.bf16.mxu1 %v6688_v33  ;;  %v9995_v39 = vld [vmem:[#allocation7_spill] sm:$0xff] }
 0x272   : > { %9991 = vst [vmem:[#allocation60_spill] sm:$0xff] %v7717_v13  ;;  %v1579_v10 = vmax.f32 %v1320_v28, 0.0 }
 0x274   : > { %v1659_v48 = vpack.c.bf16 %v1579_v10, %v1578_v5  ;;  %6334 = vmatpush3.bf16.msra.mxu1 %v6688_v33  ;;  %v1058_v33 = vadd.f32 %v7254_v45, %v7336_v32 }
 0x275   : > { %v1325_v44 = vpop.f32.mrb[192].mxu0  ;;  %6335 = vmatprep.subr.bf16.mxu1 %v6689_v8 }
 0x276   : > { %v1326_v12 = vadd.f32 %v1325_v44, %v7038_v36  ;;  %v7735_v0 = vpop.f32.mrb[193].mxu0  ;;  %6294 = vmatmul.mubr.bf16.gmra.mrb[92].mxu1 %v1659_v48 }
 0x277   : > { %9993 = vst [vmem:[#allocation62_spill] sm:$0xff] %v7735_v0  ;;  %v1329_v21 = vpop.f32.mrb[194].mxu0 }
 0x278   : > { %v1330_v24 = vadd.f32 %v1329_v21, %v7038_v36  ;;  %v7738_v56 = vpop.f32.mrb[195].mxu0  ;;  %v1580_v6 = vmax.f32 %v1326_v12, 0.0  ;;  %6336 = vmatpush3.bf16.msra.mxu1 %v6689_v8  ;;  %v1048_v12 = vadd.f32 %v9995_v39, %v7336_v32 }
 0x279   : > { %9994 = vst [vmem:[#allocation63_spill] sm:$0xff] %v7738_v56  ;;  %v6243_v28 = vpop.f32.mrb[40].mxu1 }
 0x27a   : > { %v1581_v5 = vmax.f32 %v1330_v24, 0.0  ;;  %v1950_v10 = vadd.f32 %v6243_v28, %v7330_v7  ;;  %v1941_v44 = vpop.f32.mrb[41].mxu1 }
 0x27b   : > { %v1942_v48 = vadd.f32 %v7330_v7, %v1941_v44  ;;  %v6244_v55 = vpop.f32.mrb[42].mxu1  ;;  %v1062_v44 = vadd.f32 %v9996_v42, %v7336_v32 }
 0x27c   : > { %v1660_v21 = vpack.c.bf16 %v1581_v5, %v1580_v6  ;;  %v2334_v41 = vmax.f32 %v1950_v10, 0.0  ;;  %v1953_v56 = vadd.f32 %v6244_v55, %v7330_v7  ;;  %v1944_v0 = vpop.f32.mrb[43].mxu1  ;;  %v9999_v55 = vld [vmem:[#allocation8_spill] sm:$0xff] }
 0x27d   : > { %v2332_v24 = vmax.f32 %v1942_v48, 0.0  ;;  %v1945_v28 = vadd.f32 %v7330_v7, %v1944_v0  ;;  %v1335_v59 = vpop.f32.mrb[196].mxu0  ;;  %v1052_v5 = vadd.f32 %v9999_v55, %v7336_v32 }
 0x27e   : > { %v7753_v13 = vadd.f32 %v2334_v41, %v1058_v33  ;;  %v2335_v8 = vmax.f32 %v1953_v56, 0.0  ;;  %v1336_v45 = vadd.f32 %v1335_v59, %v7038_v36  ;;  %v7756_v6 = vpop.f32.mrb[197].mxu0  ;;  %6297 = vmatprep.mubr.bf16.mxu1 %v1660_v21 }
 0x27f   : > { %9998 = vst [vmem:[#allocation9_spill] sm:$0xff] %v7756_v6  ;;  %v7760_v10 = vadd.f32 %v2332_v24, %v1048_v12  ;;  %v2333_v39 = vmax.f32 %v1945_v28, 0.0  ;;  %v1339_v48 = vpop.f32.mrb[198].mxu0 }
 0x280   : > { %9997 = vst [vmem:[#allocation7_spill] sm:$0xff] %v7753_v13  ;;  %v7762_v7 = vadd.f32 %v2335_v8, %v1062_v44  ;;  %v1340_v0 = vadd.f32 %v1339_v48, %v7038_v36  ;;  %v7765_v42 = vpop.f32.mrb[199].mxu0  ;;  %v1582_v56 = vmax.f32 %v1336_v45, 0.0  ;;  %v7782_v45 = vld [vmem:[%s9853_s4] ss:$0 sm:$0xff] }
 0x281   : > { %10000 = vst [vmem:[#allocation8_spill] sm:$0xff] %v7760_v10  ;;  %10002 = vst [vmem:[#allocation65_spill] sm:$0xff] %v7765_v42  ;;  %v7767_v41 = vadd.f32 %v2333_v39, %v1052_v5 }
 0x282   : > { %10001 = vst [vmem:[#allocation64_spill] sm:$0xff] %v7762_v7  ;;  %v1583_v33 = vmax.f32 %v1340_v0, 0.0 }
 0x283   : > { %10003 = vst [vmem:[#allocation66_spill] sm:$0xff] %v7767_v41 }
 0x284   : > { %v1661_v12 = vpack.c.bf16 %v1583_v33, %v1582_v56 }
 0x285   : > { %v1345_v24 = vpop.f32.mrb[200].mxu0 }
 0x286   : > { %v1346_v28 = vadd.f32 %v1345_v24, %v7038_v36  ;;  %v7774_v44 = vpop.f32.mrb[201].mxu0  ;;  %6298 = vmatmul.mubr.bf16.gmra.mrb[96].mxu1 %v1661_v12  ;;  %v10006_v12 = vld [vmem:[#allocation12_spill] sm:$0xff] }
 0x287   : > { %10004 = vst [vmem:[#allocation67_spill] sm:$0xff] %v7774_v44  ;;  %v1349_v8 = vpop.f32.mrb[202].mxu0  ;;  %v1078_v21 = vadd.f32 %v10006_v12, %v7336_v32 }
 0x288   : > { %v1350_v55 = vadd.f32 %v1349_v8, %v7038_v36  ;;  %v7777_v5 = vpop.f32.mrb[203].mxu0  ;;  %v1584_v48 = vmax.f32 %v1346_v28, 0.0 }
 0x289   : > { %10005 = vst [vmem:[#allocation68_spill] sm:$0xff] %v7777_v5  ;;  %v6247_v39 = vpop.f32.mrb[44].mxu1 }
 0x28a   : > { %v1585_v59 = vmax.f32 %v1350_v55, 0.0  ;;  %v1966_v0 = vadd.f32 %v7782_v45, %v6247_v39  ;;  %v1957_v56 = vpop.f32.mrb[45].mxu1  ;;  %v10007_v55 = vld [vmem:[#allocation10_spill] sm:$0xff]  ;;  %v10008_v39 = vld [vmem:[#allocation13_spill] sm:$0xff] }
 0x28b   : > { %v1958_v33 = vadd.f32 %v7782_v45, %v1957_v56  ;;  %v6248_v24 = vpop.f32.mrb[46].mxu1  ;;  %v1068_v42 = vadd.f32 %v10007_v55, %v7336_v32  ;;  %v1082_v10 = vadd.f32 %v10008_v39, %v7336_v32 }
 0x28c   : > { %v1662_v8 = vpack.c.bf16 %v1585_v59, %v1584_v48  ;;  %v2338_v44 = vmax.f32 %v1966_v0, 0.0  ;;  %v1969_v5 = vadd.f32 %v7782_v45, %v6248_v24  ;;  %v1960_v28 = vpop.f32.mrb[47].mxu1  ;;  %v10011_v48 = vld [vmem:[#allocation11_spill] sm:$0xff] }
 0x28d   : > { %v2336_v6 = vmax.f32 %v1958_v33, 0.0  ;;  %v1961_v13 = vadd.f32 %v7782_v45, %v1960_v28  ;;  %v1355_v7 = vpop.f32.mrb[204].mxu0  ;;  %v1072_v0 = vadd.f32 %v10011_v48, %v7336_v32 }
 0x28e   : > { %v7794_v56 = vadd.f32 %v2338_v44, %v1078_v21  ;;  %v2339_v41 = vmax.f32 %v1969_v5, 0.0  ;;  %v1356_v12 = vadd.f32 %v1355_v7, %v7038_v36  ;;  %v7797_v59 = vpop.f32.mrb[205].mxu0  ;;  %6301 = vmatprep.mubr.bf16.mxu1 %v1662_v8 }
 0x28f   : > { %10010 = vst [vmem:[#allocation10_spill] sm:$0xff] %v7797_v59  ;;  %v7801_v24 = vadd.f32 %v2336_v6, %v1068_v42  ;;  %v2337_v33 = vmax.f32 %v1961_v13, 0.0  ;;  %v1359_v55 = vpop.f32.mrb[206].mxu0  ;;  %v6690_v13 = vld [vmem:[%s9856_s7] sm:$0xff]  }
 0x290   : > { %10009 = vst [vmem:[#allocation12_spill] sm:$0xff] %v7794_v56  ;;  %v7803_v28 = vadd.f32 %v2339_v41, %v1082_v10  ;;  %v1360_v25 = vadd.f32 %v1359_v55, %v7038_v36  ;;  %v7806_v39 = vpop.f32.mrb[207].mxu0  ;;  %v1586_v44 = vmax.f32 %v1356_v12, 0.0  ;;  %6465 = vmatprep.subr.bf16.mxu0 %v6690_v13 }
 0x291   : > { %10012 = vst [vmem:[#allocation13_spill] sm:$0xff] %v7801_v24  ;;  %10014 = vst [vmem:[#allocation69_spill] sm:$0xff] %v7806_v39  ;;  %v7808_v21 = vadd.f32 %v2337_v33, %v1072_v0  ;;  %6466 = vmatpush3.bf16.msra.mxu0 %v6690_v13 }
 0x292   : > { %10013 = vst [vmem:[#allocation11_spill] sm:$0xff] %v7803_v28  ;;  %v1587_v5 = vmax.f32 %v1360_v25, 0.0 }
 0x293   : > { %10015 = vst [vmem:[#allocation70_spill] sm:$0xff] %v7808_v21 }
 0x294   : > { %v1663_v6 = vpack.c.bf16 %v1587_v5, %v1586_v44 }
 0x295   : > { %v1365_v10 = vpop.f32.mrb[208].mxu0 }
 0x296   : > { %v1366_v42 = vadd.f32 %v1365_v10, %v7038_v36  ;;  %v7818_v41 = vpop.f32.mrb[209].mxu0  ;;  %6302 = vmatmul.mubr.bf16.gmra.mrb[100].mxu1 %v1663_v6  ;;  %v10018_v10 = vld [vmem:[#allocation16_spill] sm:$0xff] }
 0x297   : > { %10016 = vst [vmem:[#allocation71_spill] sm:$0xff] %v7818_v41  ;;  %v1369_v48 = vpop.f32.mrb[210].mxu0  ;;  %v1098_v39 = vadd.f32 %v10018_v10, %v7336_v32 }
 0x298   : > { %v1370_v12 = vadd.f32 %v1369_v48, %v7038_v36  ;;  %v7821_v25 = vpop.f32.mrb[211].mxu0  ;;  %v1588_v33 = vmax.f32 %v1366_v42, 0.0  ;;  %v10019_v48 = vld [vmem:[#allocation14_spill] sm:$0xff] }
 0x299   : > { %10017 = vst [vmem:[#allocation72_spill] sm:$0xff] %v7821_v25  ;;  %v6251_v0 = vpop.f32.mrb[48].mxu1  ;;  %v1088_v25 = vadd.f32 %v10019_v48, %v7336_v32 }
 0x29a   : > { %v1589_v55 = vmax.f32 %v1370_v12, 0.0  ;;  %v1982_v7 = vadd.f32 %v7782_v45, %v6251_v0  ;;  %v1973_v8 = vpop.f32.mrb[49].mxu1  ;;  %v10020_v0 = vld [vmem:[#allocation17_spill] sm:$0xff] }
 0x29b   : > { %v1974_v44 = vadd.f32 %v7782_v45, %v1973_v8  ;;  %v6252_v5 = vpop.f32.mrb[50].mxu1  ;;  %v1102_v28 = vadd.f32 %v10020_v0, %v7336_v32 }
 0x29c   : > { %v1664_v41 = vpack.c.bf16 %v1589_v55, %v1588_v33  ;;  %v2342_v6 = vmax.f32 %v1982_v7, 0.0  ;;  %v1985_v13 = vadd.f32 %v7782_v45, %v6252_v5  ;;  %v1976_v59 = vpop.f32.mrb[51].mxu1  ;;  %v10023_v7 = vld [vmem:[#allocation15_spill] sm:$0xff] }
 0x29d   : > { %v2340_v56 = vmax.f32 %v1974_v44, 0.0  ;;  %v1977_v42 = vadd.f32 %v7782_v45, %v1976_v59  ;;  %v1375_v12 = vpop.f32.mrb[212].mxu0  ;;  %v1092_v55 = vadd.f32 %v10023_v7, %v7336_v32 }
 0x29e   : > { %v7833_v8 = vadd.f32 %v2342_v6, %v1098_v39  ;;  %v2343_v24 = vmax.f32 %v1985_v13, 0.0  ;;  %v1376_v10 = vadd.f32 %v1375_v12, %v7038_v36  ;;  %v7836_v33 = vpop.f32.mrb[213].mxu0  ;;  %6305 = vmatprep.mubr.bf16.mxu1 %v1664_v41 }
 0x29f   : > { %10022 = vst [vmem:[#allocation14_spill] sm:$0xff] %v7836_v33  ;;  %v7840_v5 = vadd.f32 %v2340_v56, %v1088_v25  ;;  %v2341_v44 = vmax.f32 %v1977_v42, 0.0  ;;  %v1379_v48 = vpop.f32.mrb[214].mxu0 }
 0x2a0   : > { %10021 = vst [vmem:[#allocation16_spill] sm:$0xff] %v7833_v8  ;;  %v7842_v59 = vadd.f32 %v2343_v24, %v1102_v28  ;;  %v1380_v21 = vadd.f32 %v1379_v48, %v7038_v36  ;;  %v7845_v0 = vpop.f32.mrb[215].mxu0  ;;  %v1590_v13 = vmax.f32 %v1376_v10, 0.0 }
 0x2a1   : > { %10024 = vst [vmem:[#allocation17_spill] sm:$0xff] %v7840_v5  ;;  %10026 = vst [vmem:[#allocation73_spill] sm:$0xff] %v7845_v0  ;;  %v7847_v39 = vadd.f32 %v2341_v44, %v1092_v55 }
 0x2a2   : > { %10025 = vst [vmem:[#allocation15_spill] sm:$0xff] %v7842_v59  ;;  %v1591_v41 = vmax.f32 %v1380_v21, 0.0 }
 0x2a3   : > { %10027 = vst [vmem:[#allocation74_spill] sm:$0xff] %v7847_v39 }
 0x2a4   : > { %v1665_v56 = vpack.c.bf16 %v1591_v41, %v1590_v13  ;;  %v10030_v41 = vld [vmem:[#allocation20_spill] sm:$0xff] }
 0x2a5   : > { %v1385_v25 = vpop.f32.mrb[216].mxu0 }
 0x2a6   : > { %v1386_v42 = vadd.f32 %v1385_v25, %v7038_v36  ;;  %v7854_v24 = vpop.f32.mrb[217].mxu0  ;;  %6306 = vmatmul.mubr.bf16.gmra.mrb[104].mxu1 %v1665_v56  ;;  %v1118_v25 = vadd.f32 %v10030_v41, %v7336_v32 }
 0x2a7   : > { %10028 = vst [vmem:[#allocation75_spill] sm:$0xff] %v7854_v24  ;;  %v1389_v28 = vpop.f32.mrb[218].mxu0 }
 0x2a8   : > { %v1390_v7 = vadd.f32 %v1389_v28, %v7038_v36  ;;  %v7857_v55 = vpop.f32.mrb[219].mxu0  ;;  %v1592_v48 = vmax.f32 %v1386_v42, 0.0  ;;  %v10031_v28 = vld [vmem:[#allocation18_spill] sm:$0xff] }
 0x2a9   : > { %10029 = vst [vmem:[#allocation76_spill] sm:$0xff] %v7857_v55  ;;  %v6255_v44 = vpop.f32.mrb[52].mxu1  ;;  %v1108_v55 = vadd.f32 %v10031_v28, %v7336_v32 }
 0x2aa   : > { %v1593_v6 = vmax.f32 %v1390_v7, 0.0  ;;  %v1998_v21 = vadd.f32 %v7782_v45, %v6255_v44  ;;  %v1989_v10 = vpop.f32.mrb[53].mxu1  ;;  %v10032_v44 = vld [vmem:[#allocation21_spill] sm:$0xff] }
 0x2ab   : > { %v1990_v12 = vadd.f32 %v7782_v45, %v1989_v10  ;;  %v6256_v13 = vpop.f32.mrb[54].mxu1  ;;  %v1122_v59 = vadd.f32 %v10032_v44, %v7336_v32 }
 0x2ac   : > { %v1666_v0 = vpack.c.bf16 %v1593_v6, %v1592_v48  ;;  %v2346_v24 = vmax.f32 %v1998_v21, 0.0  ;;  %v2001_v56 = vadd.f32 %v7782_v45, %v6256_v13  ;;  %v1992_v33 = vpop.f32.mrb[55].mxu1  ;;  %v10035_v48 = vld [vmem:[#allocation19_spill] sm:$0xff] }
 0x2ad   : > { %v2344_v8 = vmax.f32 %v1990_v12, 0.0  ;;  %v1993_v42 = vadd.f32 %v7782_v45, %v1992_v33  ;;  %v1395_v7 = vpop.f32.mrb[220].mxu0  ;;  %v1112_v21 = vadd.f32 %v10035_v48, %v7336_v32 }
 0x2ae   : > { %v7869_v10 = vadd.f32 %v2346_v24, %v1118_v25  ;;  %v2347_v5 = vmax.f32 %v2001_v56, 0.0  ;;  %v1396_v41 = vadd.f32 %v1395_v7, %v7038_v36  ;;  %v7872_v6 = vpop.f32.mrb[221].mxu0  ;;  %6309 = vmatprep.mubr.bf16.mxu1 %v1666_v0 }
 0x2af   : > { %10034 = vst [vmem:[#allocation18_spill] sm:$0xff] %v7872_v6  ;;  %v7876_v13 = vadd.f32 %v2344_v8, %v1108_v55  ;;  %v2345_v12 = vmax.f32 %v1993_v42, 0.0  ;;  %v1399_v28 = vpop.f32.mrb[222].mxu0 }
 0x2b0   : > { %10033 = vst [vmem:[#allocation20_spill] sm:$0xff] %v7869_v10  ;;  %v7878_v33 = vadd.f32 %v2347_v5, %v1122_v59  ;;  %v1400_v39 = vadd.f32 %v1399_v28, %v7038_v36  ;;  %v7881_v44 = vpop.f32.mrb[223].mxu0  ;;  %v1594_v56 = vmax.f32 %v1396_v41, 0.0 }
 0x2b1   : > { %10037 = vst [vmem:[#allocation19_spill] sm:$0xff] %v7881_v44  ;;  %v7883_v24 = vadd.f32 %v2345_v12, %v1112_v21 }
 0x2b2   : > { %10036 = vst [vmem:[#allocation21_spill] sm:$0xff] %v7878_v33  ;;  %v1595_v0 = vmax.f32 %v1400_v39, 0.0 }
 0x2b4   : > { %v1667_v8 = vpack.c.bf16 %v1595_v0, %v1594_v56  ;;  %v1138_v0 = vadd.f32 %v7355_v50, %v7336_v32 }
 0x2b5   : > { %v1405_v55 = vpop.f32.mrb[224].mxu0 }
 0x2b6   : > { %v1406_v42 = vadd.f32 %v1405_v55, %v7038_v36  ;;  %v7890_v5 = vpop.f32.mrb[225].mxu0  ;;  %6310 = vmatmul.mubr.bf16.gmra.mrb[108].mxu1 %v1667_v8 }
 0x2b7   : > { %10038 = vst [vmem:[#allocation77_spill] sm:$0xff] %v7890_v5  ;;  %v1409_v59 = vpop.f32.mrb[226].mxu0 }
 0x2b8   : > { %v1410_v48 = vadd.f32 %v1409_v59, %v7038_v36  ;;  %v7893_v21 = vpop.f32.mrb[227].mxu0  ;;  %v1596_v28 = vmax.f32 %v1406_v42, 0.0  ;;  %v10040_v59 = vld [vmem:[#allocation22_spill] sm:$0xff] }
 0x2b9   : > { %10039 = vst [vmem:[#allocation78_spill] sm:$0xff] %v7893_v21  ;;  %v6259_v12 = vpop.f32.mrb[56].mxu1  ;;  %v1128_v21 = vadd.f32 %v10040_v59, %v7336_v32 }
 0x2ba   : > { %v1597_v25 = vmax.f32 %v1410_v48, 0.0  ;;  %v2014_v39 = vadd.f32 %v7782_v45, %v6259_v12  ;;  %v2005_v41 = vpop.f32.mrb[57].mxu1  ;;  %v1142_v12 = vadd.f32 %v7364_v35, %v7336_v32 }
 0x2bb   : > { %v2006_v7 = vadd.f32 %v7782_v45, %v2005_v41  ;;  %v6260_v56 = vpop.f32.mrb[58].mxu1 }
 0x2bc   : > { %v1668_v55 = vpack.c.bf16 %v1597_v25, %v1596_v28  ;;  %v2350_v5 = vmax.f32 %v2014_v39, 0.0  ;;  %v2017_v8 = vadd.f32 %v7782_v45, %v6260_v56  ;;  %v2008_v44 = vpop.f32.mrb[59].mxu1  ;;  %v10042_v28 = vld [vmem:[#allocation23_spill] sm:$0xff] }
 0x2bd   : > { %v2348_v6 = vmax.f32 %v2006_v7, 0.0  ;;  %v2009_v42 = vadd.f32 %v7782_v45, %v2008_v44  ;;  %v1415_v48 = vpop.f32.mrb[228].mxu0  ;;  %v1132_v39 = vadd.f32 %v10042_v28, %v7336_v32 }
 0x2be   : > { %v7905_v41 = vadd.f32 %v2350_v5, %v1138_v0  ;;  %v2351_v10 = vmax.f32 %v2017_v8, 0.0  ;;  %v1416_v50 = vadd.f32 %v1415_v48, %v7038_v36  ;;  %v7908_v25 = vpop.f32.mrb[229].mxu0  ;;  %6313 = vmatprep.mubr.bf16.mxu1 %v1668_v55 }
 0x2bf   : > { %10041 = vst [vmem:[#allocation22_spill] sm:$0xff] %v7908_v25  ;;  %v7912_v56 = vadd.f32 %v2348_v6, %v1128_v21  ;;  %v2349_v7 = vmax.f32 %v2009_v42, 0.0  ;;  %v1419_v59 = vpop.f32.mrb[230].mxu0 }
 0x2c0   : > { %v7914_v44 = vadd.f32 %v2351_v10, %v1142_v12  ;;  %v1420_v33 = vadd.f32 %v1419_v59, %v7038_v36  ;;  %v7917_v35 = vpop.f32.mrb[231].mxu0  ;;  %v1598_v8 = vmax.f32 %v1416_v50, 0.0 }
 0x2c1   : > { %10043 = vst [vmem:[#allocation23_spill] sm:$0xff] %v7917_v35  ;;  %v7919_v5 = vadd.f32 %v2349_v7, %v1132_v39 }
 0x2c2   : > { %v1599_v55 = vmax.f32 %v1420_v33, 0.0 }
 0x2c4   : > { %v1669_v6 = vpack.c.bf16 %v1599_v55, %v1598_v8  ;;  %v1158_v55 = vadd.f32 %v7399_v46, %v7336_v32 }
 0x2c5   : > { %v1425_v21 = vpop.f32.mrb[232].mxu0 }
 0x2c6   : > { %v1426_v42 = vadd.f32 %v1425_v21, %v7038_v36  ;;  %v7926_v10 = vpop.f32.mrb[233].mxu0  ;;  %6314 = vmatmul.mubr.bf16.gmra.mrb[112].mxu1 %v1669_v6 }
 0x2c7   : > { %10044 = vst [vmem:[#allocation79_spill] sm:$0xff] %v7926_v10  ;;  %v1429_v12 = vpop.f32.mrb[234].mxu0 }
 0x2c8   : > { %v1430_v28 = vadd.f32 %v1429_v12, %v7038_v36  ;;  %v7929_v39 = vpop.f32.mrb[235].mxu0  ;;  %v1600_v59 = vmax.f32 %v1426_v42, 0.0  ;;  %v1148_v12 = vadd.f32 %v7377_v54, %v7336_v32 }
 0x2c9   : > { %10045 = vst [vmem:[#allocation80_spill] sm:$0xff] %v7929_v39  ;;  %v6263_v7 = vpop.f32.mrb[60].mxu1 }
 0x2ca   : > { %v1601_v0 = vmax.f32 %v1430_v28, 0.0  ;;  %v2030_v33 = vadd.f32 %v7782_v45, %v6263_v7  ;;  %v2021_v50 = vpop.f32.mrb[61].mxu1  ;;  %v1162_v7 = vadd.f32 %v7408_v61, %v7336_v32 }
 0x2cb   : > { %v2022_v48 = vadd.f32 %v7782_v45, %v2021_v50  ;;  %v6264_v8 = vpop.f32.mrb[62].mxu1 }
 0x2cc   : > { %v1670_v21 = vpack.c.bf16 %v1601_v0, %v1600_v59  ;;  %v2354_v10 = vmax.f32 %v2030_v33, 0.0  ;;  %v2033_v6 = vadd.f32 %v7782_v45, %v6264_v8  ;;  %v2024_v35 = vpop.f32.mrb[63].mxu1  ;;  %v1152_v59 = vadd.f32 %v7380_v30, %v7336_v32 }
 0x2cd   : > { %v2352_v39 = vmax.f32 %v2022_v48, 0.0  ;;  %v2025_v42 = vadd.f32 %v7782_v45, %v2024_v35  ;;  %v1435_v28 = vpop.f32.mrb[236].mxu0 }
 0x2ce   : > { %v7941_v50 = vadd.f32 %v2354_v10, %v1158_v55  ;;  %v2355_v25 = vmax.f32 %v2033_v6, 0.0  ;;  %v1436_v46 = vadd.f32 %v1435_v28, %v7038_v36  ;;  %v7944_v0 = vpop.f32.mrb[237].mxu0  ;;  %6317 = vmatprep.mubr.bf16.mxu1 %v1670_v21 }
 0x2cf   : > { %10046 = vst [vmem:[#allocation81_spill] sm:$0xff] %v7944_v0  ;;  %v7948_v33 = vadd.f32 %v2352_v39, %v1148_v12  ;;  %v2353_v54 = vmax.f32 %v2025_v42, 0.0  ;;  %v1439_v48 = vpop.f32.mrb[238].mxu0 }
 0x2d0   : > { %v7950_v35 = vadd.f32 %v2355_v25, %v1162_v7  ;;  %v1440_v8 = vadd.f32 %v1439_v48, %v7038_v36  ;;  %v7953_v61 = vpop.f32.mrb[239].mxu0  ;;  %v1602_v6 = vmax.f32 %v1436_v46, 0.0 }
 0x2d1   : > { %10047 = vst [vmem:[#allocation82_spill] sm:$0xff] %v7953_v61  ;;  %v7955_v10 = vadd.f32 %v2353_v54, %v1152_v59 }
 0x2d2   : > { %v1603_v21 = vmax.f32 %v1440_v8, 0.0 }
 0x2d4   : > { %v1671_v39 = vpack.c.bf16 %v1603_v21, %v1602_v6  ;;  %v1178_v21 = vadd.f32 %v7443_v16, %v7336_v32 }
 0x2d5   : > { %v1445_v12 = vpop.f32.mrb[240].mxu0 }
 0x2d6   : > { %v1446_v42 = vadd.f32 %v1445_v12, %v7038_v36  ;;  %v7962_v25 = vpop.f32.mrb[241].mxu0  ;;  %6318 = vmatmul.mubr.bf16.gmra.mrb[116].mxu1 %v1671_v39 }
 0x2d7   : > { %10048 = vst [vmem:[#allocation83_spill] sm:$0xff] %v7962_v25  ;;  %v1449_v28 = vpop.f32.mrb[242].mxu0 }
 0x2d8   : > { %v1450_v7 = vadd.f32 %v1449_v28, %v7038_v36  ;;  %v7965_v59 = vpop.f32.mrb[243].mxu0  ;;  %v1604_v48 = vmax.f32 %v1446_v42, 0.0  ;;  %v1168_v28 = vadd.f32 %v7421_v34, %v7336_v32 }
 0x2d9   : > { %10049 = vst [vmem:[#allocation84_spill] sm:$0xff] %v7965_v59  ;;  %v6267_v54 = vpop.f32.mrb[64].mxu1 }
 0x2da   : > { %v1605_v55 = vmax.f32 %v1450_v7, 0.0  ;;  %v2046_v46 = vadd.f32 %v7782_v45, %v6267_v54  ;;  %v2037_v8 = vpop.f32.mrb[65].mxu1  ;;  %v1182_v54 = vadd.f32 %v7452_v52, %v7336_v32 }
 0x2db   : > { %v2038_v30 = vadd.f32 %v7782_v45, %v2037_v8  ;;  %v6268_v6 = vpop.f32.mrb[66].mxu1 }
 0x2dc   : > { %v1672_v12 = vpack.c.bf16 %v1605_v55, %v1604_v48  ;;  %v2358_v25 = vmax.f32 %v2046_v46, 0.0  ;;  %v2049_v39 = vadd.f32 %v7782_v45, %v6268_v6  ;;  %v2040_v61 = vpop.f32.mrb[67].mxu1  ;;  %v1172_v48 = vadd.f32 %v7424_v1, %v7336_v32 }
 0x2dd   : > { %v2356_v59 = vmax.f32 %v2038_v30, 0.0  ;;  %v2041_v42 = vadd.f32 %v7782_v45, %v2040_v61  ;;  %v1455_v7 = vpop.f32.mrb[244].mxu0 }
 0x2de   : > { %v7977_v8 = vadd.f32 %v2358_v25, %v1178_v21  ;;  %v2359_v0 = vmax.f32 %v2049_v39, 0.0  ;;  %v1456_v16 = vadd.f32 %v1455_v7, %v7038_v36  ;;  %v7980_v55 = vpop.f32.mrb[245].mxu0  ;;  %6321 = vmatprep.mubr.bf16.mxu1 %v1672_v12 }
 0x2df   : > { %10050 = vst [vmem:[#allocation85_spill] sm:$0xff] %v7980_v55  ;;  %v7984_v46 = vadd.f32 %v2356_v59, %v1168_v28  ;;  %v2357_v34 = vmax.f32 %v2041_v42, 0.0  ;;  %v1459_v30 = vpop.f32.mrb[246].mxu0 }
 0x2e0   : > { %v7986_v61 = vadd.f32 %v2359_v0, %v1182_v54  ;;  %v1460_v6 = vadd.f32 %v1459_v30, %v7038_v36  ;;  %v7989_v52 = vpop.f32.mrb[247].mxu0  ;;  %v1606_v39 = vmax.f32 %v1456_v16, 0.0 }
 0x2e1   : > { %10051 = vst [vmem:[#allocation86_spill] sm:$0xff] %v7989_v52  ;;  %v7991_v25 = vadd.f32 %v2357_v34, %v1172_v48 }
 0x2e2   : > { %v1607_v12 = vmax.f32 %v1460_v6, 0.0 }
 0x2e4   : > { %v1673_v59 = vpack.c.bf16 %v1607_v12, %v1606_v39  ;;  %v1198_v12 = vadd.f32 %v7487_v4, %v7336_v32 }
 0x2e5   : > { %v1465_v28 = vpop.f32.mrb[248].mxu0 }
 0x2e6   : > { %v1466_v42 = vadd.f32 %v1465_v28, %v7038_v36  ;;  %v7998_v0 = vpop.f32.mrb[249].mxu0  ;;  %6322 = vmatmul.mubr.bf16.gmra.mrb[120].mxu1 %v1673_v59 }
 0x2e7   : > { %10052 = vst [vmem:[#allocation87_spill] sm:$0xff] %v7998_v0  ;;  %v1469_v7 = vpop.f32.mrb[250].mxu0 }
 0x2e8   : > { %v1470_v54 = vadd.f32 %v1469_v7, %v7038_v36  ;;  %v8001_v48 = vpop.f32.mrb[251].mxu0  ;;  %v1608_v30 = vmax.f32 %v1466_v42, 0.0  ;;  %v1188_v7 = vadd.f32 %v7465_v51, %v7336_v32 }
 0x2e9   : > { %10053 = vst [vmem:[#allocation88_spill] sm:$0xff] %v8001_v48  ;;  %v6271_v34 = vpop.f32.mrb[68].mxu1 }
 0x2ea   : > { %v1609_v21 = vmax.f32 %v1470_v54, 0.0  ;;  %v2062_v16 = vadd.f32 %v7782_v45, %v6271_v34  ;;  %v2053_v6 = vpop.f32.mrb[69].mxu1  ;;  %v1202_v34 = vadd.f32 %v7496_v40, %v7336_v32 }
 0x2eb   : > { %v2054_v1 = vadd.f32 %v7782_v45, %v2053_v6  ;;  %v6272_v39 = vpop.f32.mrb[70].mxu1 }
 0x2ec   : > { %v1674_v28 = vpack.c.bf16 %v1609_v21, %v1608_v30  ;;  %v2362_v0 = vmax.f32 %v2062_v16, 0.0  ;;  %v2065_v59 = vadd.f32 %v7782_v45, %v6272_v39  ;;  %v2056_v52 = vpop.f32.mrb[71].mxu1  ;;  %v1192_v30 = vadd.f32 %v7468_v26, %v7336_v32 }
 0x2ed   : > { %v2360_v48 = vmax.f32 %v2054_v1, 0.0  ;;  %v2057_v42 = vadd.f32 %v7782_v45, %v2056_v52  ;;  %v1475_v54 = vpop.f32.mrb[252].mxu0 }
 0x2ee   : > { %v8013_v6 = vadd.f32 %v2362_v0, %v1198_v12  ;;  %v2363_v55 = vmax.f32 %v2065_v59, 0.0  ;;  %v1476_v4 = vadd.f32 %v1475_v54, %v7038_v36  ;;  %v8016_v21 = vpop.f32.mrb[253].mxu0  ;;  %6325 = vmatprep.mubr.bf16.mxu1 %v1674_v28  ;;  %v10059_v12 = vld [vmem:[#allocation24_spill] sm:$0xff] }
 0x2ef   : > { %v8020_v16 = vadd.f32 %v2360_v48, %v1188_v7  ;;  %v2361_v51 = vmax.f32 %v2057_v42, 0.0  ;;  %v1479_v1 = vpop.f32.mrb[254].mxu0  ;;  %v10055_v7 = vld [vmem:[#allocation27_spill] sm:$0xff] }
 0x2f0   : > { %v8022_v52 = vadd.f32 %v2363_v55, %v1202_v34  ;;  %v1480_v39 = vadd.f32 %v1479_v1, %v7038_v36  ;;  %v8025_v40 = vpop.f32.mrb[255].mxu0  ;;  %v1610_v59 = vmax.f32 %v1476_v4, 0.0  ;;  %v10056_v55 = vld [vmem:[#allocation25_spill] sm:$0xff]  ;;  %v1218_v4 = vadd.f32 %v7528_v17, %v7336_v32 }
 0x2f1   : > { %10054 = vst [vmem:[#allocation89_spill] sm:$0xff] %v8025_v40  ;;  %v8027_v0 = vadd.f32 %v2361_v51, %v1192_v30  ;;  %v10057_v42 = vpack.c.bf16 %v10055_v7, %v10056_v55  ;;  %v1222_v55 = vadd.f32 %v7537_v49, %v7336_v32  ;;  %v1212_v17 = vadd.f32 %v7512_v58, %v7336_v32  ;;  %v10065_v58 = vld [vmem:[#allocation28_spill] sm:$0xff] }
 0x2f2   : > { %v1611_v28 = vmax.f32 %v1480_v39, 0.0 }
 0x2f4   : > { %v1675_v48 = vpack.c.bf16 %v1611_v28, %v1610_v59  ;;  %v1208_v28 = vadd.f32 %v7509_v53, %v7336_v32 }
 0x2f6   : > { %6326 = vmatmul.mubr.bf16.gmra.mrb[124].mxu1 %v1675_v48 }
 0x2f7   : > { %6337 = vmatprep.mubr.msk.bf16.mxu1 %vm2651_vm1, %v10057_v42 }
 0x2f9   : > { %v6275_v36 = vpop.f32.mrb[72].mxu1 }
 0x2fa   : > { %v2078_v54 = vadd.f32 %v7782_v45, %v6275_v36  ;;  %v2069_v34 = vpop.f32.mrb[73].mxu1 }
 0x2fb   : > { %v2070_v30 = vadd.f32 %v7782_v45, %v2069_v34  ;;  %v6276_v51 = vpop.f32.mrb[74].mxu1  ;;  %v10058_v34 = vld [vmem:[#allocation26_spill] sm:$0xff] }
 0x2fc   : > { %v2366_v1 = vmax.f32 %v2078_v54, 0.0  ;;  %v2081_v39 = vadd.f32 %v7782_v45, %v6276_v51  ;;  %v2072_v59 = vpop.f32.mrb[75].mxu1  ;;  %v10060_v26 = vpack.c.bf16 %v10058_v34, %v10059_v12  ;;  %v10062_v51 = vld [vmem:[#allocation29_spill] sm:$0xff]  ;;  %v10071_v12 = vld [vmem:[#allocation32_spill] sm:$0xff] }
 0x2fd   : > { %v2364_v48 = vmax.f32 %v2070_v30, 0.0  ;;  %v2073_v7 = vadd.f32 %v7782_v45, %v2072_v59  ;;  %v10061_v30 = vld [vmem:[#allocation31_spill] sm:$0xff] }
 0x2fe   : > { %v8047_v42 = vadd.f32 %v2366_v1, %v1218_v4  ;;  %v2367_v36 = vmax.f32 %v2081_v39, 0.0  ;;  %6338 = vmatmul.mubr.msk.bf16.vlgmr.msra.gmra.mrb[128].mxu1 %vm2651_vm1, %v10060_v26  ;;  %v10063_v59 = vpack.c.bf16 %v10061_v30, %v10062_v51  ;;  %v10064_v1 = vld [vmem:[#allocation30_spill] sm:$0xff]  ;;  %v1238_v30 = vadd.f32 %v7564_v27, %v7336_v32 }
 0x2ff   : > { %v8055_v54 = vadd.f32 %v2364_v48, %v1208_v28  ;;  %v2365_v53 = vmax.f32 %v2073_v7, 0.0  ;;  %v10066_v39 = vpack.c.bf16 %v10064_v1, %v10065_v58  ;;  %v10067_v28 = vld [vmem:[#allocation35_spill] sm:$0xff]  ;;  %v10068_v48 = vld [vmem:[#allocation33_spill] sm:$0xff]  ;;  %v1228_v58 = vadd.f32 %v7546_v29, %v7336_v32 }
 0x300   : > { %6341 = vmatprep.mubr.msk.bf16.mxu1 %vm2651_vm1, %v10063_v59  ;;  %v8061_v49 = vadd.f32 %v2367_v36, %v1222_v55  ;;  %v10069_v7 = vpack.c.bf16 %v10067_v28, %v10068_v48  ;;  %v1242_v48 = vadd.f32 %v7573_v20, %v7336_v32  ;;  %v1232_v27 = vadd.f32 %v7549_v22, %v7336_v32  ;;  %v10074_v22 = vld [vmem:[#allocation36_spill] sm:$0xff] }
 0x301   : > { %v8063_v4 = vadd.f32 %v2365_v53, %v1212_v17 }
 0x306   : > { %6342 = vmatmul.mubr.msk.bf16.gmra.mrb[132].mxu1 %vm2651_vm1, %v10066_v39 }
 0x307   : > { %6345 = vmatprep.mubr.msk.bf16.mxu1 %vm2651_vm1, %v10069_v7 }
 0x309   : > { %v6279_v55 = vpop.f32.mrb[76].mxu1 }
 0x30a   : > { %v2094_v36 = vadd.f32 %v7782_v45, %v6279_v55  ;;  %v2085_v34 = vpop.f32.mrb[77].mxu1 }
 0x30b   : > { %v2086_v17 = vadd.f32 %v7782_v45, %v2085_v34  ;;  %v6280_v53 = vpop.f32.mrb[78].mxu1  ;;  %v10070_v34 = vld [vmem:[#allocation34_spill] sm:$0xff] }
 0x30c   : > { %v2370_v51 = vmax.f32 %v2094_v36, 0.0  ;;  %v2097_v59 = vadd.f32 %v7782_v45, %v6280_v53  ;;  %v2088_v1 = vpop.f32.mrb[79].mxu1  ;;  %v10072_v26 = vpack.c.bf16 %v10070_v34, %v10071_v12  ;;  %v10131_v12 = vld [vmem:[#allocation15_spill] sm:$0xff] }
 0x30d   : > { %v2368_v39 = vmax.f32 %v2086_v17, 0.0  ;;  %v2089_v28 = vadd.f32 %v7782_v45, %v2088_v1  ;;  %v10073_v17 = vpack.c.bf16 %v7498_v3, %v7491_v11 }
 0x30e   : > { %v8087_v7 = vadd.f32 %v2370_v51, %v1238_v30  ;;  %v2371_v55 = vmax.f32 %v2097_v59, 0.0  ;;  %6346 = vmatmul.mubr.msk.bf16.gmra.mrb[136].mxu1 %vm2651_vm1, %v10072_v26  ;;  %v10075_v30 = vpack.c.bf16 %v7493_v14, %v10074_v22  ;;  %v10076_v51 = vld [vmem:[#allocation40_spill] sm:$0xff]  ;;  %v10077_v59 = vld [vmem:[#allocation38_spill] sm:$0xff]  ;;  %v1262_v22 = vadd.f32 %v7609_v63, %v7336_v32 }
 0x30f   : > { %v8095_v36 = vadd.f32 %v2368_v39, %v1228_v58  ;;  %v2369_v29 = vmax.f32 %v2089_v28, 0.0  ;;  %6349 = vmatprep.mubr.msk.bf16.mxu1 %vm2651_vm1, %v10073_v17  ;;  %v10078_v11 = vpack.c.bf16 %v10076_v51, %v10077_v59  ;;  %v10079_v59 = vld [vmem:[#allocation39_spill] sm:$0xff]  ;;  %v10132_v26 = vld [vmem:[#allocation16_spill] sm:$0xff] }
 0x310   : > { %v8101_v20 = vadd.f32 %v2371_v55, %v1242_v48  ;;  %v1258_v48 = vadd.f32 %v7600_v62, %v7336_v32  ;;  %v1252_v62 = vadd.f32 %v7585_v19, %v7336_v32  ;;  %v10086_v19 = vld [vmem:[#allocation41_spill] sm:$0xff]  ;;  %v10133_v40 = vpack.c.bf16 %v10131_v12, %v10132_v26 }
 0x311   : > { %v8103_v53 = vadd.f32 %v2369_v29, %v1232_v27  ;;  %v1248_v27 = vadd.f32 %v7582_v31, %v7336_v32  ;;  %v10136_v26 = vld [vmem:[#allocation21_spill] sm:$0xff] }
 0x316   : > { %6350 = vmatmul.mubr.msk.bf16.gmra.mrb[140].mxu1 %vm2651_vm1, %v10075_v30 }
 0x317   : > { %6353 = vmatprep.mubr.msk.bf16.mxu1 %vm2651_vm1, %v10078_v11  ;;  %v10080_v11 = vld [vmem:[#allocation37_spill] sm:$0xff] }
 0x319   : > { %v6283_v3 = vpop.f32.mrb[80].mxu1 }
 0x31a   : > { %v2110_v1 = vadd.f32 %v7782_v45, %v6283_v3  ;;  %v2101_v58 = vpop.f32.mrb[81].mxu1  ;;  %v10081_v3 = vpack.c.bf16 %v10079_v59, %v10080_v11 }
 0x31b   : > { %v2102_v39 = vadd.f32 %v7782_v45, %v2101_v58  ;;  %v6284_v28 = vpop.f32.mrb[82].mxu1  ;;  %v10082_v58 = vld [vmem:[#allocation44_spill] sm:$0xff] }
 0x31c   : > { %v2374_v55 = vmax.f32 %v2110_v1, 0.0  ;;  %v2113_v14 = vadd.f32 %v7782_v45, %v6284_v28  ;;  %v2104_v34 = vpop.f32.mrb[83].mxu1 }
 0x31d   : > { %v2372_v29 = vmax.f32 %v2102_v39, 0.0  ;;  %v2105_v17 = vadd.f32 %v7782_v45, %v2104_v34  ;;  %v10083_v39 = vld [vmem:[#allocation42_spill] sm:$0xff]  ;;  %v10085_v34 = vld [vmem:[#allocation43_spill] sm:$0xff] }
 0x31e   : > { %v8127_v30 = vadd.f32 %v2374_v55, %v1258_v48  ;;  %v2375_v51 = vmax.f32 %v2113_v14, 0.0  ;;  %6354 = vmatmul.mubr.msk.bf16.gmra.mrb[144].mxu1 %vm2651_vm1, %v10081_v3  ;;  %v10084_v28 = vpack.c.bf16 %v10082_v58, %v10083_v39  ;;  %v1278_v3 = vadd.f32 %v7639_v2, %v7336_v32  ;;  %v10089_v39 = vld [vmem:[#allocation47_spill] sm:$0xff]  ;;  %v10093_v2 = vld [vmem:[#allocation48_spill] sm:$0xff]  ;;  %v10120_v14 = vld [vmem:[#allocation13_spill] sm:$0xff] }
 0x31f   : > { %v8135_v1 = vadd.f32 %v2372_v29, %v1248_v27  ;;  %v2373_v31 = vmax.f32 %v2105_v17, 0.0  ;;  %v10087_v27 = vpack.c.bf16 %v10085_v34, %v10086_v19  ;;  %v10088_v29 = vpack.c.bf16 %v7611_v43, %v7604_v15 }
 0x320   : > { %6357 = vmatprep.mubr.msk.bf16.mxu1 %vm2651_vm1, %v10084_v28  ;;  %v8141_v63 = vadd.f32 %v2375_v51, %v1262_v22  ;;  %v1268_v28 = vadd.f32 %v10089_v39, %v7336_v32  ;;  %v1282_v34 = vadd.f32 %v7648_v47, %v7336_v32 }
 0x321   : > { %v8143_v48 = vadd.f32 %v2373_v31, %v1252_v62 }
 0x326   : > { %6358 = vmatmul.mubr.msk.bf16.gmra.mrb[148].mxu1 %vm2651_vm1, %v10087_v27 }
 0x327   : > { %6361 = vmatprep.mubr.msk.bf16.mxu1 %vm2651_vm1, %v10088_v29  ;;  %v10090_v29 = vld [vmem:[#allocation46_spill] sm:$0xff] }
 0x329   : > { %v6287_v17 = vpop.f32.mrb[84].mxu1 }
 0x32a   : > { %v2126_v22 = vadd.f32 %v7782_v45, %v6287_v17  ;;  %v2117_v51 = vpop.f32.mrb[85].mxu1  ;;  %v10091_v17 = vld [vmem:[#allocation45_spill] sm:$0xff] }
 0x32b   : > { %v2118_v59 = vadd.f32 %v7782_v45, %v2117_v51  ;;  %v6288_v11 = vpop.f32.mrb[86].mxu1  ;;  %v10092_v51 = vpack.c.bf16 %v10090_v29, %v10091_v17  ;;  %v10096_v29 = vld [vmem:[#allocation49_spill] sm:$0xff]  ;;  %v1298_v17 = vadd.f32 %v7675_v18, %v7336_v32  ;;  %v10103_v18 = vld [vmem:[#allocation52_spill] sm:$0xff] }
 0x32c   : > { %v2378_v62 = vmax.f32 %v2126_v22, 0.0  ;;  %v2129_v31 = vadd.f32 %v7782_v45, %v6288_v11  ;;  %v2120_v58 = vpop.f32.mrb[87].mxu1  ;;  %v1272_v22 = vadd.f32 %v10093_v2, %v7336_v32 }
 0x32d   : > { %v2376_v15 = vmax.f32 %v2118_v59, 0.0  ;;  %v2121_v43 = vadd.f32 %v7782_v45, %v2120_v58  ;;  %v10094_v59 = vpack.c.bf16 %v7650_v57, %v7643_v9  ;;  %v10095_v58 = vld [vmem:[#allocation50_spill] sm:$0xff]  ;;  %v10098_v9 = vpack.c.bf16 %v7686_v23, %v7679_v38 }
 0x32e   : > { %v8167_v19 = vadd.f32 %v2378_v62, %v1278_v3  ;;  %v2379_v27 = vmax.f32 %v2129_v31, 0.0  ;;  %6362 = vmatmul.mubr.msk.bf16.gmra.mrb[152].mxu1 %vm2651_vm1, %v10092_v51  ;;  %v10115_v62 = vld [vmem:[#allocation64_spill] sm:$0xff]  ;;  %v10116_v31 = vld [vmem:[#allocation7_spill] sm:$0xff] }
 0x32f   : > { %v8175_v11 = vadd.f32 %v2376_v15, %v1268_v28  ;;  %v2377_v39 = vmax.f32 %v2121_v43, 0.0  ;;  %6365 = vmatprep.mubr.msk.bf16.mxu1 %vm2651_vm1, %v10094_v59  ;;  %v10097_v28 = vpack.c.bf16 %v10095_v58, %v10096_v29  ;;  %v1302_v58 = vadd.f32 %v7684_v37, %v7336_v32 }
 0x330   : > { %v8181_v47 = vadd.f32 %v2379_v27, %v1282_v34  ;;  %v10117_v55 = vpack.c.bf16 %v10115_v62, %v10116_v31  ;;  %v10122_v31 = vld [vmem:[#allocation11_spill] sm:$0xff] }
 0x331   : > { %v8183_v3 = vadd.f32 %v2377_v39, %v1272_v22  ;;  %v10099_v39 = vld [vmem:[#allocation51_spill] sm:$0xff] }
 0x332   : > { %v1288_v59 = vadd.f32 %v10099_v39, %v7336_v32 }
 0x336   : > { %6366 = vmatmul.mubr.msk.bf16.gmra.mrb[156].mxu1 %vm2651_vm1, %v10097_v28 }
 0x337   : > { %6369 = vmatprep.mubr.msk.bf16.mxu1 %vm2651_vm1, %v10098_v9  ;;  %v10100_v9 = vld [vmem:[#allocation54_spill] sm:$0xff] }
 0x339   : > { %v6291_v57 = vpop.f32.mrb[88].mxu1 }
 0x33a   : > { %v2142_v15 = vadd.f32 %v7782_v45, %v6291_v57  ;;  %v2133_v43 = vpop.f32.mrb[89].mxu1  ;;  %v10101_v57 = vld [vmem:[#allocation53_spill] sm:$0xff] }
 0x33b   : > { %v2134_v34 = vadd.f32 %v7782_v45, %v2133_v43  ;;  %v6292_v27 = vpop.f32.mrb[90].mxu1  ;;  %v10102_v43 = vpack.c.bf16 %v10100_v9, %v10101_v57  ;;  %v10106_v9 = vld [vmem:[#allocation60_spill] sm:$0xff]  ;;  %v10107_v57 = vld [vmem:[#allocation57_spill] sm:$0xff] }
 0x33c   : > { %v2382_v51 = vmax.f32 %v2142_v15, 0.0  ;;  %v2145_v2 = vadd.f32 %v7782_v45, %v6292_v27  ;;  %v2136_v22 = vpop.f32.mrb[91].mxu1  ;;  %v1292_v15 = vadd.f32 %v10103_v18, %v7336_v32 }
 0x33d   : > { %v2380_v38 = vmax.f32 %v2134_v34, 0.0  ;;  %v2137_v23 = vadd.f32 %v7782_v45, %v2136_v22  ;;  %v10104_v34 = vld [vmem:[#allocation59_spill] sm:$0xff] }
 0x33e   : > { %v8207_v29 = vadd.f32 %v2382_v51, %v1298_v17  ;;  %v2383_v28 = vmax.f32 %v2145_v2, 0.0  ;;  %6370 = vmatmul.mubr.msk.bf16.gmra.mrb[160].mxu1 %vm2651_vm1, %v10102_v43  ;;  %v10105_v22 = vpack.c.bf16 %v7725_v60, %v10104_v34 }
 0x33f   : > { %v8215_v27 = vadd.f32 %v2380_v38, %v1288_v59  ;;  %v2381_v39 = vmax.f32 %v2137_v23, 0.0  ;;  %v10108_v59 = vpack.c.bf16 %v10106_v9, %v10107_v57  ;;  %v10109_v38 = vld [vmem:[#allocation66_spill] sm:$0xff]  ;;  %v10110_v23 = vld [vmem:[#allocation8_spill] sm:$0xff] }
 0x340   : > { %6373 = vmatprep.mubr.msk.bf16.mxu1 %vm2651_vm1, %v10105_v22  ;;  %v8221_v37 = vadd.f32 %v2383_v28, %v1302_v58  ;;  %v10111_v60 = vpack.c.bf16 %v10109_v38, %v10110_v23 }
 0x341   : > { %v8223_v17 = vadd.f32 %v2381_v39, %v1292_v15  ;;  %v10112_v39 = vld [vmem:[#allocation58_spill] sm:$0xff] }
 0x342   : > { %v1318_v34 = vadd.f32 %v10112_v39, %v7336_v32 }
 0x346   : > { %6374 = vmatmul.mubr.msk.bf16.gmra.mrb[164].mxu1 %vm2651_vm1, %v10108_v59  ;;  %v10113_v59 = vld [vmem:[#allocation55_spill] sm:$0xff] }
 0x347   : > { %6377 = vmatprep.mubr.msk.bf16.mxu1 %vm2651_vm1, %v10111_v60  ;;  %v1308_v51 = vadd.f32 %v10113_v59, %v7336_v32  ;;  %v10114_v60 = vld [vmem:[#allocation61_spill] sm:$0xff] }
 0x349   : > { %v6295_v58 = vpop.f32.mrb[92].mxu1 }
 0x34a   : > { %v2158_v28 = vadd.f32 %v7782_v45, %v6295_v58  ;;  %v2149_v43 = vpop.f32.mrb[93].mxu1  ;;  %v1322_v58 = vadd.f32 %v10114_v60, %v7336_v32 }
 0x34b   : > { %v2150_v18 = vadd.f32 %v7782_v45, %v2149_v43  ;;  %v6296_v15 = vpop.f32.mrb[94].mxu1 }
 0x34c   : > { %v2386_v22 = vmax.f32 %v2158_v28, 0.0  ;;  %v2161_v9 = vadd.f32 %v7782_v45, %v6296_v15  ;;  %v2152_v57 = vpop.f32.mrb[95].mxu1  ;;  %v10118_v28 = vld [vmem:[#allocation56_spill] sm:$0xff] }
 0x34d   : > { %v2384_v38 = vmax.f32 %v2150_v18, 0.0  ;;  %v2153_v23 = vadd.f32 %v7782_v45, %v2152_v57  ;;  %v1312_v15 = vadd.f32 %v10118_v28, %v7336_v32  ;;  %v10119_v18 = vld [vmem:[#allocation70_spill] sm:$0xff] }
 0x34e   : > { %v8247_v2 = vadd.f32 %v2386_v22, %v1318_v34  ;;  %v2387_v43 = vmax.f32 %v2161_v9, 0.0  ;;  %6378 = vmatmul.mubr.msk.bf16.gmra.mrb[168].mxu1 %vm2651_vm1, %v10117_v55  ;;  %v10121_v57 = vpack.c.bf16 %v10119_v18, %v10120_v14  ;;  %v10123_v22 = vld [vmem:[#allocation12_spill] sm:$0xff]  ;;  %v10125_v9 = vld [vmem:[#allocation74_spill] sm:$0xff] }
 0x34f   : > { %v8255_v39 = vadd.f32 %v2384_v38, %v1308_v51  ;;  %v2385_v59 = vmax.f32 %v2153_v23, 0.0  ;;  %v10124_v51 = vpack.c.bf16 %v10122_v31, %v10123_v22  ;;  %v10126_v38 = vld [vmem:[#allocation17_spill] sm:$0xff] }
 0x350   : > { %6381 = vmatprep.mubr.msk.bf16.mxu1 %vm2651_vm1, %v10121_v57  ;;  %v8261_v60 = vadd.f32 %v2387_v43, %v1322_v58  ;;  %v10127_v14 = vpack.c.bf16 %v10125_v9, %v10126_v38 }
 0x351   : > { %v8263_v34 = vadd.f32 %v2385_v59, %v1312_v15  ;;  %v10128_v59 = vld [vmem:[#allocation9_spill] sm:$0xff] }
 0x352   : > { %v1338_v18 = vadd.f32 %v10128_v59, %v7336_v32 }
 0x356   : > { %6382 = vmatmul.mubr.msk.bf16.gmra.mrb[172].mxu1 %vm2651_vm1, %v10124_v51  ;;  %v10129_v51 = vld [vmem:[#allocation62_spill] sm:$0xff] }
 0x357   : > { %6385 = vmatprep.mubr.msk.bf16.mxu1 %vm2651_vm1, %v10127_v14  ;;  %v1328_v62 = vadd.f32 %v10129_v51, %v7336_v32  ;;  %v10130_v14 = vld [vmem:[#allocation65_spill] sm:$0xff] }
 0x359   : > { %v6299_v23 = vpop.f32.mrb[96].mxu1 }
 0x35a   : > { %v2174_v58 = vadd.f32 %v7782_v45, %v6299_v23  ;;  %v2165_v43 = vpop.f32.mrb[97].mxu1  ;;  %v1342_v23 = vadd.f32 %v10130_v14, %v7336_v32 }
 0x35b   : > { %v2166_v28 = vadd.f32 %v7782_v45, %v2165_v43  ;;  %v6300_v15 = vpop.f32.mrb[98].mxu1 }
 0x35c   : > { %v2390_v57 = vmax.f32 %v2174_v58, 0.0  ;;  %v2177_v31 = vadd.f32 %v7782_v45, %v6300_v15  ;;  %v2168_v22 = vpop.f32.mrb[99].mxu1  ;;  %v10134_v58 = vld [vmem:[#allocation63_spill] sm:$0xff] }
 0x35d   : > { %v2388_v9 = vmax.f32 %v2166_v28, 0.0  ;;  %v2169_v38 = vadd.f32 %v7782_v45, %v2168_v22  ;;  %v1332_v15 = vadd.f32 %v10134_v58, %v7336_v32  ;;  %v10135_v28 = vpack.c.bf16 %v7883_v24, %v7876_v13 }
 0x35e   : > { %v8287_v55 = vadd.f32 %v2390_v57, %v1338_v18  ;;  %v2391_v43 = vmax.f32 %v2177_v31, 0.0  ;;  %6386 = vmatmul.mubr.msk.bf16.gmra.mrb[176].mxu1 %vm2651_vm1, %v10133_v40  ;;  %v10137_v57 = vld [vmem:[#allocation20_spill] sm:$0xff]  ;;  %v10139_v13 = vpack.c.bf16 %v7919_v5, %v7912_v56 }
 0x35f   : > { %v8295_v59 = vadd.f32 %v2388_v9, %v1328_v62  ;;  %v2389_v51 = vmax.f32 %v2169_v38, 0.0  ;;  %6389 = vmatprep.mubr.msk.bf16.mxu1 %vm2651_vm1, %v10135_v28  ;;  %v10138_v62 = vpack.c.bf16 %v10136_v26, %v10137_v57  ;;  %v10141_v28 = vld [vmem:[#allocation67_spill] sm:$0xff]  ;;  %v10142_v57 = vld [vmem:[#allocation69_spill] sm:$0xff] }
 0x360   : > { %v8301_v22 = vadd.f32 %v2391_v43, %v1342_v23  ;;  %v10140_v23 = vld [vmem:[#allocation10_spill] sm:$0xff]  ;;  %v1348_v26 = vadd.f32 %v10141_v28, %v7336_v32 }
 0x361   : > { %v8303_v18 = vadd.f32 %v2389_v51, %v1332_v15  ;;  %v1358_v43 = vadd.f32 %v10140_v23, %v7336_v32 }
 0x362   : > { %v2597_v12 = vpack.c.bf16 %v8301_v22, %v8287_v55 }
 0x363   : > { %v2596_v40 = vpack.c.bf16 %v8303_v18, %v8295_v59 }
 0x366   : > { %6390 = vmatmul.mubr.msk.bf16.gmra.mrb[180].mxu1 %vm2651_vm1, %v10138_v62  ;;  %v1362_v62 = vadd.f32 %v10142_v57, %v7336_v32  ;;  %v10148_v57 = vld [vmem:[#allocation14_spill] sm:$0xff] }
 0x367   : > { %6393 = vmatprep.mubr.msk.bf16.mxu1 %vm2651_vm1, %v10139_v13 }
 0x369   : > { %v6303_v24 = vpop.f32.mrb[100].mxu1 }
 0x36a   : > { %v2190_v31 = vadd.f32 %v7782_v45, %v6303_v24  ;;  %v2181_v9 = vpop.f32.mrb[101].mxu1 }
 0x36b   : > { %v2182_v38 = vadd.f32 %v7782_v45, %v2181_v9  ;;  %v6304_v14 = vpop.f32.mrb[102].mxu1  ;;  %v10143_v9 = vpack.c.bf16 %v7914_v44, %v7905_v41 }
 0x36c   : > { %v2394_v58 = vmax.f32 %v2190_v31, 0.0  ;;  %v2193_v15 = vadd.f32 %v7782_v45, %v6304_v14  ;;  %v2184_v51 = vpop.f32.mrb[103].mxu1  ;;  %v10144_v31 = vld [vmem:[#allocation68_spill] sm:$0xff] }
 0x36d   : > { %v2392_v56 = vmax.f32 %v2182_v38, 0.0  ;;  %v2185_v5 = vadd.f32 %v7782_v45, %v2184_v51  ;;  %v1352_v14 = vadd.f32 %v10144_v31, %v7336_v32  ;;  %v10145_v38 = vpack.c.bf16 %v7955_v10, %v7948_v33 }
 0x36e   : > { %v8327_v13 = vadd.f32 %v2394_v58, %v1358_v43  ;;  %v2395_v24 = vmax.f32 %v2193_v15, 0.0  ;;  %6394 = vmatmul.mubr.msk.bf16.gmra.mrb[184].mxu1 %vm2651_vm1, %v10143_v9  ;;  %v10146_v58 = vpack.c.bf16 %v7950_v35, %v7941_v50  ;;  %v10147_v33 = vpack.c.bf16 %v7991_v25, %v7984_v46  ;;  %v10149_v9 = vld [vmem:[#allocation71_spill] sm:$0xff] }
 0x36f   : > { %v8335_v23 = vadd.f32 %v2392_v56, %v1348_v26  ;;  %v2393_v28 = vmax.f32 %v2185_v5, 0.0  ;;  %6397 = vmatprep.mubr.msk.bf16.mxu1 %vm2651_vm1, %v10145_v38  ;;  %v1368_v31 = vadd.f32 %v10149_v9, %v7336_v32 }
 0x370   : > { %v8341_v51 = vadd.f32 %v2395_v24, %v1362_v62  ;;  %v1378_v62 = vadd.f32 %v10148_v57, %v7336_v32 }
 0x371   : > { %v8343_v43 = vadd.f32 %v2393_v28, %v1352_v14  ;;  %v10150_v14 = vld [vmem:[#allocation73_spill] sm:$0xff] }
 0x372   : > { %v2599_v41 = vpack.c.bf16 %v8341_v51, %v8327_v13  ;;  %v1382_v28 = vadd.f32 %v10150_v14, %v7336_v32 }
 0x373   : > { %v2598_v44 = vpack.c.bf16 %v8343_v43, %v8335_v23 }
 0x376   : > { %6398 = vmatmul.mubr.msk.bf16.gmra.mrb[188].mxu1 %vm2651_vm1, %v10146_v58 }
 0x377   : > { %6401 = vmatprep.mubr.msk.bf16.mxu1 %vm2651_vm1, %v10147_v33  ;;  %v10151_v33 = vpack.c.bf16 %v7986_v61, %v7977_v8 }
 0x379   : > { %v6307_v10 = vpop.f32.mrb[104].mxu1 }
 0x37a   : > { %v2206_v15 = vadd.f32 %v7782_v45, %v6307_v10  ;;  %v2197_v26 = vpop.f32.mrb[105].mxu1  ;;  %v10152_v10 = vld [vmem:[#allocation72_spill] sm:$0xff] }
 0x37b   : > { %v2198_v56 = vadd.f32 %v7782_v45, %v2197_v26  ;;  %v6308_v5 = vpop.f32.mrb[106].mxu1 }
 0x37c   : > { %v2398_v24 = vmax.f32 %v2206_v15, 0.0  ;;  %v2209_v50 = vadd.f32 %v7782_v45, %v6308_v5  ;;  %v2200_v35 = vpop.f32.mrb[107].mxu1  ;;  %v1372_v15 = vadd.f32 %v10152_v10, %v7336_v32 }
 0x37d   : > { %v2396_v46 = vmax.f32 %v2198_v56, 0.0  ;;  %v2201_v25 = vadd.f32 %v7782_v45, %v2200_v35  ;;  %v10153_v45 = vpack.c.bf16 %v8027_v0, %v8020_v16  ;;  %v10155_v16 = vpack.c.bf16 %v8063_v4, %v8055_v54 }
 0x37e   : > { %v8367_v38 = vadd.f32 %v2398_v24, %v1378_v62  ;;  %v2399_v58 = vmax.f32 %v2209_v50, 0.0  ;;  %6402 = vmatmul.mubr.msk.bf16.gmra.mrb[192].mxu1 %vm2651_vm1, %v10151_v33  ;;  %v10154_v62 = vpack.c.bf16 %v8022_v52, %v8013_v6  ;;  %v8400_v24 = vld [vmem:[%s9853_s4] ss:$0 sm:$0xff]  ;;  %v10156_v6 = vld [vmem:[#allocation18_spill] sm:$0xff] }
 0x37f   : > { %v8375_v26 = vadd.f32 %v2396_v46, %v1368_v31  ;;  %v2397_v5 = vmax.f32 %v2201_v25, 0.0  ;;  %6405 = vmatprep.mubr.msk.bf16.mxu1 %vm2651_vm1, %v10153_v45  ;;  %v1398_v52 = vadd.f32 %v10156_v6, %v7336_v32  ;;  %v10157_v25 = vld [vmem:[#allocation75_spill] sm:$0xff]  ;;  %v10159_v45 = vpack.c.bf16 %v8061_v49, %v8047_v42  ;;  %v6691_v49 = vld [vmem:[%s9856_s7 + $0x8] sm:$0xff]  }
 0x380   : > { %v8381_v56 = vadd.f32 %v2399_v58, %v1382_v28  ;;  %v1388_v14 = vadd.f32 %v10157_v25, %v7336_v32  ;;  %v10158_v33 = vld [vmem:[#allocation19_spill] sm:$0xff]  ;;  %6467 = vmatprep.subr.bf16.mxu0 %v6691_v49 }
 0x381   : > { %v8383_v57 = vadd.f32 %v2397_v5, %v1372_v15  ;;  %v1402_v10 = vadd.f32 %v10158_v33, %v7336_v32  ;;  %6468 = vmatpush3.bf16.msra.mxu0 %v6691_v49  ;;  %v10165_v33 = vld [vmem:[#allocation77_spill] sm:$0xff] }
 0x382   : > { %v2601_v8 = vpack.c.bf16 %v8381_v56, %v8367_v38 }
 0x383   : > { %v2600_v61 = vpack.c.bf16 %v8383_v57, %v8375_v26 }
 0x386   : > { %6406 = vmatmul.mubr.msk.bf16.gmra.mrb[196].mxu1 %vm2651_vm1, %v10154_v62  ;;  %v10160_v62 = vld [vmem:[#allocation76_spill] sm:$0xff] }
 0x387   : > { %6409 = vmatprep.mubr.msk.bf16.mxu1 %vm2651_vm1, %v10155_v16  ;;  %v1392_v16 = vadd.f32 %v10160_v62, %v7336_v32 }
 0x389   : > { %v6311_v0 = vpop.f32.mrb[108].mxu1 }
 0x38a   : > { %v2222_v50 = vadd.f32 %v8400_v24, %v6311_v0  ;;  %v2213_v35 = vpop.f32.mrb[109].mxu1 }
 0x38b   : > { %v2214_v9 = vadd.f32 %v8400_v24, %v2213_v35  ;;  %v6312_v31 = vpop.f32.mrb[110].mxu1  ;;  %v10161_v35 = vpack.c.bf16 %v8103_v53, %v8095_v36  ;;  %v10162_v36 = vpack.c.bf16 %v8101_v20, %v8087_v7  ;;  %v10163_v53 = vpack.c.bf16 %v8143_v48, %v8135_v1 }
 0x38c   : > { %v2402_v46 = vmax.f32 %v2222_v50, 0.0  ;;  %v2225_v54 = vadd.f32 %v8400_v24, %v6312_v31  ;;  %v2216_v4 = vpop.f32.mrb[111].mxu1 }
 0x38d   : > { %v2400_v28 = vmax.f32 %v2214_v9, 0.0  ;;  %v2217_v58 = vadd.f32 %v8400_v24, %v2216_v4 }
 0x38e   : > { %v8412_v15 = vadd.f32 %v2402_v46, %v1398_v52  ;;  %v2403_v5 = vmax.f32 %v2225_v54, 0.0  ;;  %6410 = vmatmul.mubr.msk.bf16.gmra.mrb[200].mxu1 %vm2651_vm1, %v10159_v45 }
 0x38f   : > { %v8420_v0 = vadd.f32 %v2400_v28, %v1388_v14  ;;  %v2401_v50 = vmax.f32 %v2217_v58, 0.0  ;;  %6413 = vmatprep.mubr.msk.bf16.mxu1 %vm2651_vm1, %v10161_v35  ;;  %v10164_v14 = vld [vmem:[#allocation22_spill] sm:$0xff] }
 0x390   : > { %v8426_v9 = vadd.f32 %v2403_v5, %v1402_v10  ;;  %v1418_v28 = vadd.f32 %v10164_v14, %v7336_v32  ;;  %v1408_v10 = vadd.f32 %v10165_v33, %v7336_v32  ;;  %v10166_v5 = vld [vmem:[#allocation23_spill] sm:$0xff]  ;;  %v10168_v35 = vld [vmem:[#allocation78_spill] sm:$0xff] }
 0x391   : > { %v8428_v31 = vadd.f32 %v2401_v50, %v1392_v16  ;;  %v1422_v45 = vadd.f32 %v10166_v5, %v7336_v32  ;;  %v10167_v50 = vpack.c.bf16 %v8141_v63, %v8127_v30  ;;  %v1412_v49 = vadd.f32 %v10168_v35, %v7336_v32  ;;  %v10176_v35 = vld [vmem:[#allocation80_spill] sm:$0xff] }
 0x392   : > { %v2603_v42 = vpack.c.bf16 %v8426_v9, %v8412_v15 }
 0x393   : > { %v2602_v6 = vpack.c.bf16 %v8428_v31, %v8420_v0 }
 0x396   : > { %6414 = vmatmul.mubr.msk.bf16.gmra.mrb[204].mxu1 %vm2651_vm1, %v10162_v36 }
 0x397   : > { %6417 = vmatprep.mubr.msk.bf16.mxu1 %vm2651_vm1, %v10163_v53 }
 0x399   : > { %v6315_v52 = vpop.f32.mrb[112].mxu1 }
 0x39a   : > { %v2238_v46 = vadd.f32 %v8400_v24, %v6315_v52  ;;  %v2229_v54 = vpop.f32.mrb[113].mxu1  ;;  %v10169_v52 = vpack.c.bf16 %v8183_v3, %v8175_v11  ;;  %v10171_v11 = vpack.c.bf16 %v8223_v17, %v8215_v27 }
 0x39b   : > { %v2230_v4 = vadd.f32 %v8400_v24, %v2229_v54  ;;  %v6316_v25 = vpop.f32.mrb[114].mxu1 }
 0x39c   : > { %v2406_v58 = vmax.f32 %v2238_v46, 0.0  ;;  %v2241_v7 = vadd.f32 %v8400_v24, %v6316_v25  ;;  %v2232_v20 = vpop.f32.mrb[115].mxu1 }
 0x39d   : > { %v2404_v1 = vmax.f32 %v2230_v4, 0.0  ;;  %v2233_v48 = vadd.f32 %v8400_v24, %v2232_v20  ;;  %v10170_v4 = vpack.c.bf16 %v8181_v47, %v8167_v19 }
 0x39e   : > { %v8455_v62 = vadd.f32 %v2406_v58, %v1418_v28  ;;  %v2407_v16 = vmax.f32 %v2241_v7, 0.0  ;;  %6418 = vmatmul.mubr.msk.bf16.gmra.mrb[208].mxu1 %vm2651_vm1, %v10167_v50  ;;  %v10172_v7 = vld [vmem:[#allocation81_spill] sm:$0xff]  ;;  %v10175_v50 = vpack.c.bf16 %v8221_v37, %v8207_v29 }
 0x39f   : > { %v8463_v36 = vadd.f32 %v2404_v1, %v1408_v10  ;;  %v2405_v53 = vmax.f32 %v2233_v48, 0.0  ;;  %6421 = vmatprep.mubr.msk.bf16.mxu1 %vm2651_vm1, %v10169_v52  ;;  %v1438_v20 = vadd.f32 %v10172_v7, %v7336_v32  ;;  %v10173_v10 = vld [vmem:[#allocation79_spill] sm:$0xff]  ;;  %v10174_v48 = vld [vmem:[#allocation82_spill] sm:$0xff]  ;;  %v10179_v7 = vld [vmem:[#allocation85_spill] sm:$0xff] }
 0x3a0   : > { %v8469_v46 = vadd.f32 %v2407_v16, %v1422_v45  ;;  %v1428_v1 = vadd.f32 %v10173_v10, %v7336_v32  ;;  %v1442_v5 = vadd.f32 %v10174_v48, %v7336_v32 }
 0x3a1   : > { %v8471_v54 = vadd.f32 %v2405_v53, %v1412_v49  ;;  %v1432_v49 = vadd.f32 %v10176_v35, %v7336_v32 }
 0x3a2   : > { %v2605_v30 = vpack.c.bf16 %v8469_v46, %v8455_v62 }
 0x3a3   : > { %v2604_v63 = vpack.c.bf16 %v8471_v54, %v8463_v36 }
 0x3a6   : > { %6422 = vmatmul.mubr.msk.bf16.gmra.mrb[212].mxu1 %vm2651_vm1, %v10170_v4  ;;  %v10177_v4 = vpack.c.bf16 %v8263_v34, %v8255_v39 }
 0x3a7   : > { %6425 = vmatprep.mubr.msk.bf16.mxu1 %vm2651_vm1, %v10171_v11 }
 0x3a9   : > { %v6319_v3 = vpop.f32.mrb[116].mxu1 }
 0x3aa   : > { %v2254_v25 = vadd.f32 %v8400_v24, %v6319_v3  ;;  %v2245_v14 = vpop.f32.mrb[117].mxu1 }
 0x3ab   : > { %v2246_v28 = vadd.f32 %v8400_v24, %v2245_v14  ;;  %v6320_v58 = vpop.f32.mrb[118].mxu1 }
 0x3ac   : > { %v2410_v33 = vmax.f32 %v2254_v25, 0.0  ;;  %v2257_v19 = vadd.f32 %v8400_v24, %v6320_v58  ;;  %v2248_v47 = vpop.f32.mrb[119].mxu1  ;;  %v10178_v25 = vpack.c.bf16 %v8261_v60, %v8247_v2 }
 0x3ad   : > { %v2408_v27 = vmax.f32 %v2246_v28, 0.0  ;;  %v2249_v17 = vadd.f32 %v8400_v24, %v2248_v47 }
 0x3ae   : > { %v8495_v45 = vadd.f32 %v2410_v33, %v1438_v20  ;;  %v2411_v16 = vmax.f32 %v2257_v19, 0.0  ;;  %6426 = vmatmul.mubr.msk.bf16.gmra.mrb[216].mxu1 %vm2651_vm1, %v10175_v50  ;;  %v1458_v20 = vadd.f32 %v10179_v7, %v7336_v32  ;;  %v10180_v19 = vld [vmem:[#allocation83_spill] sm:$0xff] }
 0x3af   : > { %v8503_v53 = vadd.f32 %v2408_v27, %v1428_v1  ;;  %v2409_v52 = vmax.f32 %v2249_v17, 0.0  ;;  %6429 = vmatprep.mubr.msk.bf16.mxu1 %vm2651_vm1, %v10177_v4  ;;  %v1448_v47 = vadd.f32 %v10180_v19, %v7336_v32  ;;  %v10182_v17 = vld [vmem:[#allocation84_spill] sm:$0xff] }
 0x3b0   : > { %v8509_v11 = vadd.f32 %v2411_v16, %v1442_v5  ;;  %v1452_v48 = vadd.f32 %v10182_v17, %v7336_v32 }
 0x3b1   : > { %v8511_v3 = vadd.f32 %v2409_v52, %v1432_v49  ;;  %v1478_v52 = vadd.f32 %v8016_v21, %v7336_v32  ;;  %v10185_v21 = vld [vmem:[#allocation88_spill] sm:$0xff] }
 0x3b2   : > { %v2607_v29 = vpack.c.bf16 %v8509_v11, %v8495_v45 }
 0x3b3   : > { %v2606_v37 = vpack.c.bf16 %v8511_v3, %v8503_v53 }
 0x3b6   : > { %6430 = vmatmul.mubr.msk.bf16.gmra.mrb[220].mxu1 %vm2651_vm1, %v10178_v25 }
 0x3b7   : > { %6433 = vmatprep.mubr.msk.bf16.mxu1 %vm2651_vm1, %v2596_v40  ;;  %v10181_v40 = vld [vmem:[#allocation86_spill] sm:$0xff] }
 0x3b8   : > { %v1462_v10 = vadd.f32 %v10181_v40, %v7336_v32 }
 0x3b9   : > { %v6323_v39 = vpop.f32.mrb[120].mxu1 }
 0x3ba   : > { %v2270_v34 = vadd.f32 %v8400_v24, %v6323_v39  ;;  %v2261_v14 = vpop.f32.mrb[121].mxu1 }
 0x3bb   : > { %v2262_v28 = vadd.f32 %v8400_v24, %v2261_v14  ;;  %v6324_v58 = vpop.f32.mrb[122].mxu1 }
 0x3bc   : > { %v2414_v33 = vmax.f32 %v2270_v34, 0.0  ;;  %v2273_v2 = vadd.f32 %v8400_v24, %v6324_v58  ;;  %v2264_v60 = vpop.f32.mrb[123].mxu1 }
 0x3bd   : > { %v2412_v59 = vmax.f32 %v2262_v28, 0.0  ;;  %v2265_v18 = vadd.f32 %v8400_v24, %v2264_v60  ;;  %v1472_v28 = vadd.f32 %v10185_v21, %v7336_v32 }
 0x3be   : > { %v8535_v1 = vadd.f32 %v2414_v33, %v1458_v20  ;;  %v2415_v27 = vmax.f32 %v2273_v2, 0.0  ;;  %6434 = vmatmul.mubr.msk.bf16.gmra.mrb[224].mxu1 %vm2651_vm1, %v2597_v12 }
 0x3bf   : > { %v8543_v5 = vadd.f32 %v2412_v59, %v1448_v47  ;;  %v2413_v16 = vmax.f32 %v2265_v18, 0.0  ;;  %6437 = vmatprep.mubr.msk.bf16.mxu1 %vm2651_vm1, %v2598_v44 }
 0x3c0   : > { %v8549_v50 = vadd.f32 %v2415_v27, %v1462_v10 }
 0x3c1   : > { %v8551_v35 = vadd.f32 %v2413_v16, %v1452_v48 }
 0x3c2   : > { %v2609_v55 = vpack.c.bf16 %v8549_v50, %v8535_v1 }
 0x3c3   : > { %v2608_v22 = vpack.c.bf16 %v8551_v35, %v8543_v5 }
 0x3c6   : > { %6438 = vmatmul.mubr.msk.bf16.gmra.mrb[228].mxu1 %vm2651_vm1, %v2599_v41  ;;  %v10183_v41 = vld [vmem:[#allocation87_spill] sm:$0xff] }
 0x3c7   : > { %6441 = vmatprep.mubr.msk.bf16.mxu1 %vm2651_vm1, %v2600_v61  ;;  %v1468_v25 = vadd.f32 %v10183_v41, %v7336_v32  ;;  %v10184_v61 = vld [vmem:[#allocation89_spill] sm:$0xff] }
 0x3c8   : > { %v1482_v39 = vadd.f32 %v10184_v61, %v7336_v32 }
 0x3c9   : > { %v6327_v12 = vpop.f32.mrb[124].mxu1 }
 0x3ca   : > { %v2286_v23 = vadd.f32 %v8400_v24, %v6327_v12  ;;  %v2277_v43 = vpop.f32.mrb[125].mxu1 }
 0x3cb   : > { %v2278_v44 = vadd.f32 %v8400_v24, %v2277_v43  ;;  %v6328_v49 = vpop.f32.mrb[126].mxu1 }
 0x3cc   : > { %v2418_v4 = vmax.f32 %v2286_v23, 0.0  ;;  %v2289_v13 = vadd.f32 %v8400_v24, %v6328_v49  ;;  %v2280_v51 = vpop.f32.mrb[127].mxu1 }
 0x3cd   : > { %v2416_v26 = vmax.f32 %v2278_v44, 0.0  ;;  %v2281_v57 = vadd.f32 %v8400_v24, %v2280_v51  ;;  %v8590_v24 = vld [vmem:[%s9855_s6] ss:$0 sm:$0xff] }
 0x3ce   : > { %v8575_v34 = vadd.f32 %v2418_v4, %v1478_v52  ;;  %v2419_v14 = vmax.f32 %v2289_v13, 0.0  ;;  %6442 = vmatmul.mubr.msk.bf16.gmra.mrb[232].mxu1 %vm2651_vm1, %v2601_v8 }
 0x3cf   : > { %v2544_v58 = vadd.f32 %v2416_v26, %v1468_v25  ;;  %v2417_v7 = vmax.f32 %v2281_v57, 0.0  ;;  %6445 = vmatprep.mubr.msk.bf16.mxu1 %vm2651_vm1, %v2602_v6 }
 0x3d0   : > { %v8592_v20 = vadd.f32 %v2419_v14, %v1482_v39 }
 0x3d1   : > { %v2545_v38 = vadd.f32 %v2417_v7, %v1472_v28  ;;  %v6339_v56 = vpop.f32.mrb[128].mxu1 }
 0x3d2   : > { %v2611_v8 = vpack.c.bf16 %v8592_v20, %v8575_v34  ;;  %v8597_v32 = vadd.f32 %v6339_v56, %v8590_v24  ;;  %v2878_v33 = vpop.f32.mrb[129].mxu1 }
 0x3d3   : > { %v2610_v2 = vpack.c.bf16 %v2545_v38, %v2544_v58  ;;  %v8600_v0 = vadd.f32 %v8590_v24, %v2878_v33  ;;  %v6340_v31 = vpop.f32.mrb[130].mxu1 }
 0x3d4   : > { %3649 = vrot.lane.b32.xlu1 %v8597_v32, %s6762_s23  ;;  %v2881_v6 = vpop.f32.mrb[131].mxu1  ;;  %v8607_v60 = vadd.f32 %v6340_v31, %v8590_v24 }
 0x3d5   : > { %3645 = vrot.lane.b32.xlu0 %v8600_v0, %s6762_s23  ;;  %v8614_v19 = vadd.f32 %v8590_v24, %v2881_v6 }
 0x3d6   : > { %6446 = vmatmul.mubr.msk.bf16.gmra.mrb[236].mxu1 %vm2651_vm1, %v2603_v42 }
 0x3d7   : > { %6449 = vmatprep.mubr.msk.bf16.mxu1 %vm2651_vm1, %v2604_v63 }
 0x3d8   : > { %3651 = vrot.lane.b32.xlu1 %v8607_v60, %s6762_s23 }
 0x3d9   : > { %v6343_v47 = vpop.f32.mrb[132].mxu1  ;;  %3647 = vrot.lane.b32.xlu0 %v8614_v19, %s6762_s23 }
 0x3da   : > { %v2894_v59 = vpop.f32.mrb[133].mxu1  ;;  %v8637_v36 = vadd.f32 %v6343_v47, %v8590_v24 }
 0x3db   : > { %v8625_v15 = vadd.f32 %v8590_v24, %v2894_v59  ;;  %v6344_v9 = vpop.f32.mrb[134].mxu1 }
 0x3dc   : > { %v2897_v42 = vpop.f32.mrb[135].mxu1  ;;  %v8646_v54 = vadd.f32 %v6344_v9, %v8590_v24 }
 0x3dd   : > { %v8628_v18 = vadd.f32 %v8590_v24, %v2897_v42  ;;  %3653 = vrot.lane.b32.xlu0 %v8625_v15, %s6762_s23 }
 0x3de   : > { %6450 = vmatmul.mubr.msk.bf16.gmra.mrb[240].mxu1 %vm2651_vm1, %v2605_v30 }
 0x3df   : > { %6453 = vmatprep.mubr.msk.bf16.mxu1 %vm2651_vm1, %v2606_v37  ;;  %3655 = vrot.lane.b32.xlu1 %v8628_v18, %s6762_s23 }
 0x3e1   : > { %v6347_v63 = vpop.f32.mrb[136].mxu1  ;;  %3657 = vrot.lane.b32.xlu0 %v8637_v36, %s6762_s23 }
 0x3e2   : > { %v2910_v62 = vpop.f32.mrb[137].mxu1  ;;  %v8665_v37 = vadd.f32 %v6347_v63, %v8590_v24 }
 0x3e3   : > { %v8651_v46 = vadd.f32 %v8590_v24, %v2910_v62  ;;  %v6348_v30 = vpop.f32.mrb[138].mxu1  ;;  %3659 = vrot.lane.b32.xlu1 %v8646_v54, %s6762_s23 }
 0x3e4   : > { %v2913_v53 = vpop.f32.mrb[139].mxu1  ;;  %v8674_v40 = vadd.f32 %v6348_v30, %v8590_v24 }
 0x3e5   : > { %v8656_v3 = vadd.f32 %v8590_v24, %v2913_v53  ;;  %3661 = vrot.lane.b32.xlu0 %v8651_v46, %s6762_s23 }
 0x3e6   : > { %6454 = vmatmul.mubr.msk.bf16.gmra.mrb[244].mxu1 %vm2651_vm1, %v2607_v29 }
 0x3e7   : > { %6457 = vmatprep.mubr.msk.bf16.mxu1 %vm2651_vm1, %v2608_v22  ;;  %3663 = vrot.lane.b32.xlu1 %v8656_v3, %s6762_s23 }
 0x3e9   : > { %v6351_v10 = vpop.f32.mrb[140].mxu1  ;;  %3665 = vrot.lane.b32.xlu0 %v8665_v37, %s6762_s23 }
 0x3ea   : > { %v2926_v45 = vpop.f32.mrb[141].mxu1  ;;  %v8693_v48 = vadd.f32 %v6351_v10, %v8590_v24 }
 0x3eb   : > { %v8679_v11 = vadd.f32 %v8590_v24, %v2926_v45  ;;  %v6352_v29 = vpop.f32.mrb[142].mxu1  ;;  %3667 = vrot.lane.b32.xlu1 %v8674_v40, %s6762_s23 }
 0x3ec   : > { %v2929_v27 = vpop.f32.mrb[143].mxu1  ;;  %v8699_v5 = vadd.f32 %v6352_v29, %v8590_v24 }
 0x3ed   : > { %v8684_v17 = vadd.f32 %v8590_v24, %v2929_v27  ;;  %3669 = vrot.lane.b32.xlu0 %v8679_v11, %s6762_s23 }
 0x3ee   : > { %6458 = vmatmul.mubr.msk.bf16.gmra.mrb[248].mxu1 %vm2651_vm1, %v2609_v55 }
 0x3ef   : > { %6461 = vmatprep.mubr.msk.bf16.mxu1 %vm2651_vm1, %v2610_v2  ;;  %3671 = vrot.lane.b32.xlu1 %v8684_v17, %s6762_s23 }
 0x3f1   : > { %v6355_v16 = vpop.f32.mrb[144].mxu1  ;;  %3673 = vrot.lane.b32.xlu0 %v8693_v48, %s6762_s23 }
 0x3f2   : > { %v2942_v35 = vpop.f32.mrb[145].mxu1  ;;  %v8718_v12 = vadd.f32 %v6355_v16, %v8590_v24 }
 0x3f3   : > { %v8704_v1 = vadd.f32 %v8590_v24, %v2942_v35  ;;  %v6356_v50 = vpop.f32.mrb[146].mxu1  ;;  %3675 = vrot.lane.b32.xlu1 %v8699_v5, %s6762_s23 }
 0x3f4   : > { %v2945_v55 = vpop.f32.mrb[147].mxu1  ;;  %v8723_v23 = vadd.f32 %v6356_v50, %v8590_v24 }
 0x3f5   : > { %v8709_v22 = vadd.f32 %v8590_v24, %v2945_v55  ;;  %3677 = vrot.lane.b32.xlu0 %v8704_v1, %s6762_s23 }
 0x3f6   : > { %6462 = vmatmul.mubr.msk.bf16.gmra.mrb[252].mxu1 %vm2651_vm1, %v2611_v8 }
 0x3f7   : > { %3679 = vrot.lane.b32.xlu1 %v8709_v22, %s6762_s23 }
 0x3f9   : > { %v6359_v43 = vpop.f32.mrb[148].mxu1  ;;  %3681 = vrot.lane.b32.xlu0 %v8718_v12, %s6762_s23 }
 0x3fa   : > { %v2958_v44 = vpop.f32.mrb[149].mxu1  ;;  %v8738_v51 = vadd.f32 %v6359_v43, %v8590_v24 }
 0x3fb   : > { %v8728_v49 = vadd.f32 %v8590_v24, %v2958_v44  ;;  %v6360_v52 = vpop.f32.mrb[150].mxu1  ;;  %3683 = vrot.lane.b32.xlu1 %v8723_v23, %s6762_s23 }
 0x3fc   : > { %v2961_v4 = vpop.f32.mrb[151].mxu1  ;;  %v8743_v41 = vadd.f32 %v6360_v52, %v8590_v24 }
 0x3fd   : > { %v8733_v13 = vadd.f32 %v8590_v24, %v2961_v4  ;;  %3685 = vrot.lane.b32.xlu0 %v8728_v49, %s6762_s23 }
 0x3ff   : > { %3687 = vrot.lane.b32.xlu1 %v8733_v13, %s6762_s23 }
 0x401   : > { %v6363_v25 = vpop.f32.mrb[152].mxu1  ;;  %3689 = vrot.lane.b32.xlu0 %v8738_v51, %s6762_s23 }
 0x402   : > { %v2974_v26 = vpop.f32.mrb[153].mxu1  ;;  %v8758_v14 = vadd.f32 %v6363_v25, %v8590_v24 }
 0x403   : > { %v8748_v57 = vadd.f32 %v8590_v24, %v2974_v26  ;;  %v6364_v61 = vpop.f32.mrb[154].mxu1  ;;  %3691 = vrot.lane.b32.xlu1 %v8743_v41, %s6762_s23 }
 0x404   : > { %v2977_v39 = vpop.f32.mrb[155].mxu1  ;;  %v8763_v21 = vadd.f32 %v6364_v61, %v8590_v24 }
 0x405   : > { %v8753_v34 = vadd.f32 %v8590_v24, %v2977_v39  ;;  %3693 = vrot.lane.b32.xlu0 %v8748_v57, %s6762_s23 }
 0x407   : > { %3695 = vrot.lane.b32.xlu1 %v8753_v34, %s6762_s23 }
 0x409   : > { %v6367_v28 = vpop.f32.mrb[156].mxu1  ;;  %3697 = vrot.lane.b32.xlu0 %v8758_v14, %s6762_s23 }
 0x40a   : > { %v2990_v58 = vpop.f32.mrb[157].mxu1  ;;  %v8778_v8 = vadd.f32 %v6367_v28, %v8590_v24 }
 0x40b   : > { %v8768_v7 = vadd.f32 %v8590_v24, %v2990_v58  ;;  %v6368_v20 = vpop.f32.mrb[158].mxu1  ;;  %3699 = vrot.lane.b32.xlu1 %v8763_v21, %s6762_s23 }
 0x40c   : > { %v2993_v38 = vpop.f32.mrb[159].mxu1  ;;  %v8783_v33 = vadd.f32 %v6368_v20, %v8590_v24 }
 0x40d   : > { %v8773_v56 = vadd.f32 %v8590_v24, %v2993_v38  ;;  %3701 = vrot.lane.b32.xlu0 %v8768_v7, %s6762_s23 }
 0x40f   : > { %3703 = vrot.lane.b32.xlu1 %v8773_v56, %s6762_s23 }
 0x411   : > { %v6371_v2 = vpop.f32.mrb[160].mxu1  ;;  %3705 = vrot.lane.b32.xlu0 %v8778_v8, %s6762_s23 }
 0x412   : > { %v3006_v31 = vpop.f32.mrb[161].mxu1  ;;  %v8798_v42 = vadd.f32 %v6371_v2, %v8590_v24 }
 0x413   : > { %v8788_v6 = vadd.f32 %v8590_v24, %v3006_v31  ;;  %v6372_v47 = vpop.f32.mrb[162].mxu1  ;;  %3707 = vrot.lane.b32.xlu1 %v8783_v33, %s6762_s23 }
 0x414   : > { %v3009_v59 = vpop.f32.mrb[163].mxu1  ;;  %v8803_v63 = vadd.f32 %v6372_v47, %v8590_v24 }
 0x415   : > { %v8793_v9 = vadd.f32 %v8590_v24, %v3009_v59  ;;  %3709 = vrot.lane.b32.xlu0 %v8788_v6, %s6762_s23 }
 0x417   : > { %3711 = vrot.lane.b32.xlu1 %v8793_v9, %s6762_s23 }
 0x419   : > { %v6375_v62 = vpop.f32.mrb[164].mxu1  ;;  %3713 = vrot.lane.b32.xlu0 %v8798_v42, %s6762_s23 }
 0x41a   : > { %v3022_v30 = vpop.f32.mrb[165].mxu1  ;;  %v8818_v27 = vadd.f32 %v6375_v62, %v8590_v24 }
 0x41b   : > { %v8808_v53 = vadd.f32 %v8590_v24, %v3022_v30  ;;  %v6376_v10 = vpop.f32.mrb[166].mxu1  ;;  %3715 = vrot.lane.b32.xlu1 %v8803_v63, %s6762_s23 }
 0x41c   : > { %v3025_v45 = vpop.f32.mrb[167].mxu1  ;;  %v8823_v16 = vadd.f32 %v6376_v10, %v8590_v24 }
 0x41d   : > { %v8813_v29 = vadd.f32 %v8590_v24, %v3025_v45  ;;  %3717 = vrot.lane.b32.xlu0 %v8808_v53, %s6762_s23 }
 0x41f   : > { %3719 = vrot.lane.b32.xlu1 %v8813_v29, %s6762_s23 }
 0x421   : > { %v6379_v35 = vpop.f32.mrb[168].mxu1  ;;  %3721 = vrot.lane.b32.xlu0 %v8818_v27, %s6762_s23 }
 0x422   : > { %v3038_v50 = vpop.f32.mrb[169].mxu1  ;;  %v8838_v4 = vadd.f32 %v6379_v35, %v8590_v24 }
 0x423   : > { %v8828_v55 = vadd.f32 %v8590_v24, %v3038_v50  ;;  %v6380_v43 = vpop.f32.mrb[170].mxu1  ;;  %3723 = vrot.lane.b32.xlu1 %v8823_v16, %s6762_s23 }
 0x424   : > { %v3041_v44 = vpop.f32.mrb[171].mxu1  ;;  %v8843_v25 = vadd.f32 %v6380_v43, %v8590_v24 }
 0x425   : > { %v8833_v52 = vadd.f32 %v8590_v24, %v3041_v44  ;;  %3725 = vrot.lane.b32.xlu0 %v8828_v55, %s6762_s23 }
 0x427   : > { %3727 = vrot.lane.b32.xlu1 %v8833_v52, %s6762_s23 }
 0x429   : > { %v6383_v26 = vpop.f32.mrb[172].mxu1  ;;  %3729 = vrot.lane.b32.xlu0 %v8838_v4, %s6762_s23 }
 0x42a   : > { %v3054_v61 = vpop.f32.mrb[173].mxu1  ;;  %v8858_v38 = vadd.f32 %v6383_v26, %v8590_v24 }
 0x42b   : > { %v8848_v39 = vadd.f32 %v8590_v24, %v3054_v61  ;;  %v6384_v28 = vpop.f32.mrb[174].mxu1  ;;  %3731 = vrot.lane.b32.xlu1 %v8843_v25, %s6762_s23 }
 0x42c   : > { %v3057_v58 = vpop.f32.mrb[175].mxu1  ;;  %10186 = vst [vmem:[#allocation27_spill] sm:$0xff] %v8858_v38  ;;  %v8863_v2 = vadd.f32 %v6384_v28, %v8590_v24 }
 0x42d   : > { %v8853_v20 = vadd.f32 %v8590_v24, %v3057_v58  ;;  %3733 = vrot.lane.b32.xlu0 %v8848_v39, %s6762_s23 }
 0x42e   : > { %10187 = vst [vmem:[#allocation25_spill] sm:$0xff] %v8863_v2 }
 0x42f   : > { %3735 = vrot.lane.b32.xlu1 %v8853_v20, %s6762_s23 }
 0x431   : > { %v6387_v31 = vpop.f32.mrb[176].mxu1  ;;  %3737 = vrot.lane.b32.xlu0 %v8858_v38, %s6762_s23 }
 0x432   : > { %v3070_v47 = vpop.f32.mrb[177].mxu1  ;;  %v8878_v45 = vadd.f32 %v6387_v31, %v8590_v24 }
 0x433   : > { %v8868_v59 = vadd.f32 %v8590_v24, %v3070_v47  ;;  %v6388_v62 = vpop.f32.mrb[178].mxu1  ;;  %3739 = vrot.lane.b32.xlu1 %v8863_v2, %s6762_s23 }
 0x434   : > { %v3073_v30 = vpop.f32.mrb[179].mxu1  ;;  %10190 = vst [vmem:[#allocation31_spill] sm:$0xff] %v8878_v45  ;;  %v8883_v35 = vadd.f32 %v6388_v62, %v8590_v24 }
 0x435   : > { %10188 = vst [vmem:[#allocation26_spill] sm:$0xff] %v8868_v59  ;;  %v8873_v10 = vadd.f32 %v8590_v24, %v3073_v30  ;;  %3741 = vrot.lane.b32.xlu0 %v8868_v59, %s6762_s23 }
 0x436   : > { %10191 = vst [vmem:[#allocation29_spill] sm:$0xff] %v8883_v35 }
 0x437   : > { %10189 = vst [vmem:[#allocation24_spill] sm:$0xff] %v8873_v10  ;;  %3743 = vrot.lane.b32.xlu1 %v8873_v10, %s6762_s23 }
 0x439   : > { %v6391_v50 = vpop.f32.mrb[180].mxu1  ;;  %3745 = vrot.lane.b32.xlu0 %v8878_v45, %s6762_s23 }
 0x43a   : > { %v3086_v43 = vpop.f32.mrb[181].mxu1  ;;  %v8898_v58 = vadd.f32 %v6391_v50, %v8590_v24 }
 0x43b   : > { %v8888_v44 = vadd.f32 %v8590_v24, %v3086_v43  ;;  %v6392_v26 = vpop.f32.mrb[182].mxu1  ;;  %3747 = vrot.lane.b32.xlu1 %v8883_v35, %s6762_s23 }
 0x43c   : > { %v3089_v61 = vpop.f32.mrb[183].mxu1  ;;  %10194 = vst [vmem:[#allocation35_spill] sm:$0xff] %v8898_v58  ;;  %v8903_v31 = vadd.f32 %v6392_v26, %v8590_v24 }
 0x43d   : > { %10192 = vst [vmem:[#allocation30_spill] sm:$0xff] %v8888_v44  ;;  %v8893_v28 = vadd.f32 %v8590_v24, %v3089_v61  ;;  %3749 = vrot.lane.b32.xlu0 %v8888_v44, %s6762_s23  ;;  %v3392_v44 = vmax.f32 %v8607_v60, 0.0 }
 0x43e   : > { %10195 = vst [vmem:[#allocation33_spill] sm:$0xff] %v8903_v31 }
 0x43f   : > { %10193 = vst [vmem:[#allocation28_spill] sm:$0xff] %v8893_v28  ;;  %3751 = vrot.lane.b32.xlu1 %v8893_v28, %s6762_s23 }
 0x441   : > { %v6395_v47 = vpop.f32.mrb[184].mxu1  ;;  %3753 = vrot.lane.b32.xlu0 %v8898_v58, %s6762_s23  ;;  %v3391_v58 = vmax.f32 %v8597_v32, 0.0 }
 0x442   : > { %v3102_v62 = vpop.f32.mrb[185].mxu1  ;;  %v8918_v28 = vadd.f32 %v6395_v47, %v8590_v24  ;;  %v3390_v47 = vmax.f32 %v8614_v19, 0.0 }
 0x443   : > { %v8908_v30 = vadd.f32 %v8590_v24, %v3102_v62  ;;  %v6396_v43 = vpop.f32.mrb[186].mxu1  ;;  %3755 = vrot.lane.b32.xlu1 %v8903_v31, %s6762_s23 }
 0x444   : > { %v3105_v50 = vpop.f32.mrb[187].mxu1  ;;  %10198 = vst [vmem:[#allocation36_spill] sm:$0xff] %v8918_v28  ;;  %v8925_v31 = vadd.f32 %v6396_v43, %v8590_v24 }
 0x445   : > { %10196 = vst [vmem:[#allocation34_spill] sm:$0xff] %v8908_v30  ;;  %v8913_v61 = vadd.f32 %v8590_v24, %v3105_v50  ;;  %3757 = vrot.lane.b32.xlu0 %v8908_v30, %s6762_s23  ;;  %v3389_v30 = vmax.f32 %v8600_v0, 0.0 }
 0x446   : > { %v3650_v26 = vpop.permute.xlu1 %3649 }
 0x447   : > { %10197 = vst [vmem:[#allocation32_spill] sm:$0xff] %v8913_v61  ;;  %3759 = vrot.lane.b32.xlu1 %v8913_v61, %s6762_s23  ;;  %v3646_v62 = vpop.permute.xlu0 %3645  ;;  %v4031_v10 = vadd.f32 %v3650_v26, %v3391_v58  ;;  %v3394_v58 = vmax.f32 %v8628_v18, 0.0 }
 0x448   : > { %v4029_v43 = vadd.f32 %v3646_v62, %v3389_v30 }
 0x449   : > { %v6399_v50 = vpop.f32.mrb[188].mxu1  ;;  %3761 = vrot.lane.b32.xlu0 %v8918_v28, %s6762_s23 }
 0x44a   : > { %v3652_v35 = vpop.permute.xlu1 %3651  ;;  %v3118_v45 = vpop.f32.mrb[189].mxu1 }
 0x44b   : > { %v4032_v61 = vadd.f32 %v3652_v35, %v3392_v44  ;;  %v8932_v59 = vadd.f32 %v8590_v24, %v3118_v45  ;;  %v6400_v32 = vpop.f32.mrb[190].mxu1  ;;  %3763 = vrot.lane.b32.xlu1 %v8925_v31, %s6762_s23  ;;  %v3648_v60 = vpop.permute.xlu0 %3647  ;;  %v8942_v35 = vadd.f32 %v6399_v50, %v8590_v24  ;;  %v3393_v44 = vmax.f32 %v8625_v15, 0.0 }
 0x44c   : > { %v4030_v2 = vadd.f32 %v3648_v60, %v3390_v47  ;;  %v3121_v38 = vpop.f32.mrb[191].mxu1  ;;  %v3395_v50 = vmax.f32 %v8637_v36, 0.0  ;;  %v3396_v47 = vmax.f32 %v8646_v54, 0.0  ;;  %v3397_v54 = vmax.f32 %v8651_v46, 0.0 }
 0x44d   : > { %v4158_v28 = vpack.c.bf16 %v4032_v61, %v4031_v10  ;;  %v8937_v0 = vadd.f32 %v8590_v24, %v3121_v38  ;;  %3765 = vrot.lane.b32.xlu0 %v8932_v59, %s6762_s23  ;;  %v8950_v38 = vadd.f32 %v6400_v32, %v8590_v24 }
 0x44e   : > { %v4157_v19 = vpack.c.bf16 %v4030_v2, %v4029_v43 }
 0x44f   : > { %3767 = vrot.lane.b32.xlu1 %v8937_v0, %s6762_s23  ;;  %v3654_v45 = vpop.permute.xlu0 %3653 }
 0x450   : > { %6469 = vmatprep.mubr.msk.bf16.mxu0 %vm618_vm0, %v4157_v19  ;;  %v4033_v2 = vadd.f32 %v3654_v45, %v3393_v44 }
 0x451   : > { %v6403_v10 = vpop.f32.mrb[192].mxu1  ;;  %v3656_v30 = vpop.permute.xlu1 %3655  ;;  %3769 = vrot.lane.b32.xlu0 %v8942_v35, %s6762_s23  ;;  %6470 = vmatmul.mubr.msk.bf16.vlgmr.msra.gmra.mrb[0].mxu0 %vm618_vm0, %v4158_v28 }
 0x452   : > { %v4034_v61 = vadd.f32 %v3656_v30, %v3394_v58  ;;  %v3134_v26 = vpop.f32.mrb[193].mxu1  ;;  %v8969_v44 = vadd.f32 %v6403_v10, %v8590_v24  ;;  %v3398_v58 = vmax.f32 %v8656_v3, 0.0 }
 0x453   : > { %v8956_v62 = vadd.f32 %v8590_v24, %v3134_v26  ;;  %v6404_v15 = vpop.f32.mrb[194].mxu1  ;;  %3771 = vrot.lane.b32.xlu1 %v8950_v38, %s6762_s23  ;;  %v3658_v18 = vpop.permute.xlu0 %3657 }
 0x454   : > { %v4159_v32 = vpack.c.bf16 %v4034_v61, %v4033_v2  ;;  %v3137_v60 = vpop.f32.mrb[195].mxu1  ;;  %v4035_v19 = vadd.f32 %v3658_v18, %v3395_v50  ;;  %v8976_v2 = vadd.f32 %v6404_v15, %v8590_v24  ;;  %v3399_v15 = vmax.f32 %v8665_v37, 0.0 }
 0x455   : > { %v8963_v43 = vadd.f32 %v8590_v24, %v3137_v60  ;;  %v3660_v28 = vpop.permute.xlu1 %3659  ;;  %3773 = vrot.lane.b32.xlu0 %v8956_v62, %s6762_s23 }
 0x456   : > { %v4036_v45 = vadd.f32 %v3660_v28, %v3396_v47  ;;  %6473 = vmatprep.mubr.msk.bf16.mxu0 %vm618_vm0, %v4159_v32  ;;  %v3400_v32 = vmax.f32 %v8674_v40, 0.0  ;;  %v3401_v40 = vmax.f32 %v8679_v11, 0.0 }
 0x457   : > { %3775 = vrot.lane.b32.xlu1 %v8963_v43, %s6762_s23  ;;  %v3662_v36 = vpop.permute.xlu0 %3661 }
 0x458   : > { %v4160_v30 = vpack.c.bf16 %v4036_v45, %v4035_v19  ;;  %v4037_v18 = vadd.f32 %v3662_v36, %v3397_v54 }
 0x459   : > { %v6407_v61 = vpop.f32.mrb[196].mxu1  ;;  %v3664_v26 = vpop.permute.xlu1 %3663  ;;  %3777 = vrot.lane.b32.xlu0 %v8969_v44, %s6762_s23 }
 0x45a   : > { %v4038_v10 = vadd.f32 %v3664_v26, %v3398_v58  ;;  %v3150_v50 = vpop.f32.mrb[197].mxu1  ;;  %6474 = vmatmul.mubr.msk.bf16.gmra.mrb[4].mxu0 %vm618_vm0, %v4160_v30  ;;  %v8995_v58 = vadd.f32 %v6407_v61, %v8590_v24  ;;  %v3402_v30 = vmax.f32 %v8684_v17, 0.0 }
 0x45b   : > { %v8982_v47 = vadd.f32 %v8590_v24, %v3150_v50  ;;  %v6408_v46 = vpop.f32.mrb[198].mxu1  ;;  %3779 = vrot.lane.b32.xlu1 %v8976_v2, %s6762_s23  ;;  %v3666_v3 = vpop.permute.xlu0 %3665 }
 0x45c   : > { %v4161_v60 = vpack.c.bf16 %v4038_v10, %v4037_v18  ;;  %v3153_v28 = vpop.f32.mrb[199].mxu1  ;;  %v4039_v36 = vadd.f32 %v3666_v3, %v3399_v15  ;;  %v9002_v18 = vadd.f32 %v6408_v46, %v8590_v24  ;;  %v3403_v46 = vmax.f32 %v8693_v48, 0.0 }
 0x45d   : > { %v8989_v19 = vadd.f32 %v8590_v24, %v3153_v28  ;;  %v3668_v45 = vpop.permute.xlu1 %3667  ;;  %3781 = vrot.lane.b32.xlu0 %v8982_v47, %s6762_s23 }
 0x45e   : > { %v4040_v54 = vadd.f32 %v3668_v45, %v3400_v32  ;;  %6477 = vmatprep.mubr.msk.bf16.mxu0 %vm618_vm0, %v4161_v60  ;;  %v3404_v60 = vmax.f32 %v8699_v5, 0.0  ;;  %v3405_v5 = vmax.f32 %v8704_v1, 0.0 }
 0x45f   : > { %3783 = vrot.lane.b32.xlu1 %v8989_v19, %s6762_s23  ;;  %v3670_v37 = vpop.permute.xlu0 %3669 }
 0x460   : > { %v4162_v26 = vpack.c.bf16 %v4040_v54, %v4039_v36  ;;  %v4041_v3 = vadd.f32 %v3670_v37, %v3401_v40 }
 0x461   : > { %v6411_v10 = vpop.f32.mrb[200].mxu1  ;;  %v3672_v50 = vpop.permute.xlu1 %3671  ;;  %3785 = vrot.lane.b32.xlu0 %v8995_v58, %s6762_s23 }
 0x462   : > { %v4042_v61 = vadd.f32 %v3672_v50, %v3402_v30  ;;  %v3166_v15 = vpop.f32.mrb[201].mxu1  ;;  %6478 = vmatmul.mubr.msk.bf16.gmra.mrb[8].mxu0 %vm618_vm0, %v4162_v26  ;;  %v9021_v30 = vadd.f32 %v6411_v10, %v8590_v24  ;;  %v3406_v26 = vmax.f32 %v8709_v22, 0.0 }
 0x463   : > { %v9008_v32 = vadd.f32 %v8590_v24, %v3166_v15  ;;  %v6412_v11 = vpop.f32.mrb[202].mxu1  ;;  %3787 = vrot.lane.b32.xlu1 %v9002_v18, %s6762_s23  ;;  %v3674_v17 = vpop.permute.xlu0 %3673 }
 0x464   : > { %v4163_v28 = vpack.c.bf16 %v4042_v61, %v4041_v3  ;;  %v3169_v45 = vpop.f32.mrb[203].mxu1  ;;  %v4043_v37 = vadd.f32 %v3674_v17, %v3403_v46  ;;  %v9028_v3 = vadd.f32 %v6412_v11, %v8590_v24  ;;  %v3407_v11 = vmax.f32 %v8718_v12, 0.0 }
 0x465   : > { %v9015_v36 = vadd.f32 %v8590_v24, %v3169_v45  ;;  %v3676_v54 = vpop.permute.xlu1 %3675  ;;  %3789 = vrot.lane.b32.xlu0 %v9008_v32, %s6762_s23 }
 0x466   : > { %v4044_v40 = vadd.f32 %v3676_v54, %v3404_v60  ;;  %6481 = vmatprep.mubr.msk.bf16.mxu0 %vm618_vm0, %v4163_v28  ;;  %v3408_v28 = vmax.f32 %v8723_v23, 0.0  ;;  %v3409_v23 = vmax.f32 %v8728_v49, 0.0 }
 0x467   : > { %3791 = vrot.lane.b32.xlu1 %v9015_v36, %s6762_s23  ;;  %v3678_v48 = vpop.permute.xlu0 %3677 }
 0x468   : > { %v4164_v50 = vpack.c.bf16 %v4044_v40, %v4043_v37  ;;  %v4045_v17 = vadd.f32 %v3678_v48, %v3405_v5 }
 0x469   : > { %v6415_v61 = vpop.f32.mrb[204].mxu1  ;;  %v3680_v15 = vpop.permute.xlu1 %3679  ;;  %3793 = vrot.lane.b32.xlu0 %v9021_v30, %s6762_s23 }
 0x46a   : > { %v4046_v10 = vadd.f32 %v3680_v15, %v3406_v26  ;;  %v3182_v46 = vpop.f32.mrb[205].mxu1  ;;  %6482 = vmatmul.mubr.msk.bf16.gmra.mrb[12].mxu0 %vm618_vm0, %v4164_v50  ;;  %v9047_v26 = vadd.f32 %v6415_v61, %v8590_v24  ;;  %v3410_v50 = vmax.f32 %v8733_v13, 0.0 }
 0x46b   : > { %v9034_v60 = vadd.f32 %v8590_v24, %v3182_v46  ;;  %v6416_v1 = vpop.f32.mrb[206].mxu1  ;;  %3795 = vrot.lane.b32.xlu1 %v9028_v3, %s6762_s23  ;;  %v3682_v22 = vpop.permute.xlu0 %3681 }
 0x46c   : > { %v4165_v45 = vpack.c.bf16 %v4046_v10, %v4045_v17  ;;  %v3185_v54 = vpop.f32.mrb[207].mxu1  ;;  %v4047_v48 = vadd.f32 %v3682_v22, %v3407_v11  ;;  %v9054_v17 = vadd.f32 %v6416_v1, %v8590_v24  ;;  %v3411_v1 = vmax.f32 %v8738_v51, 0.0 }
 0x46d   : > { %v9041_v37 = vadd.f32 %v8590_v24, %v3185_v54  ;;  %v3684_v40 = vpop.permute.xlu1 %3683  ;;  %3797 = vrot.lane.b32.xlu0 %v9034_v60, %s6762_s23 }
 0x46e   : > { %v4048_v5 = vadd.f32 %v3684_v40, %v3408_v28  ;;  %6485 = vmatprep.mubr.msk.bf16.mxu0 %vm618_vm0, %v4165_v45  ;;  %v3412_v45 = vmax.f32 %v8743_v41, 0.0  ;;  %v3413_v41 = vmax.f32 %v8748_v57, 0.0 }
 0x46f   : > { %3799 = vrot.lane.b32.xlu1 %v9041_v37, %s6762_s23  ;;  %v3686_v12 = vpop.permute.xlu0 %3685 }
 0x470   : > { %v4166_v15 = vpack.c.bf16 %v4048_v5, %v4047_v48  ;;  %v4049_v22 = vadd.f32 %v3686_v12, %v3409_v23 }
 0x471   : > { %v6419_v10 = vpop.f32.mrb[208].mxu1  ;;  %v3688_v46 = vpop.permute.xlu1 %3687  ;;  %3801 = vrot.lane.b32.xlu0 %v9047_v26, %s6762_s23 }
 0x472   : > { %v4050_v61 = vadd.f32 %v3688_v46, %v3410_v50  ;;  %v3198_v11 = vpop.f32.mrb[209].mxu1  ;;  %6486 = vmatmul.mubr.msk.bf16.gmra.mrb[16].mxu0 %vm618_vm0, %v4166_v15  ;;  %v9073_v50 = vadd.f32 %v6419_v10, %v8590_v24  ;;  %v3414_v15 = vmax.f32 %v8753_v34, 0.0 }
 0x473   : > { %v9060_v28 = vadd.f32 %v8590_v24, %v3198_v11  ;;  %v6420_v49 = vpop.f32.mrb[210].mxu1  ;;  %3803 = vrot.lane.b32.xlu1 %v9054_v17, %s6762_s23  ;;  %v3690_v13 = vpop.permute.xlu0 %3689 }
 0x474   : > { %v4167_v54 = vpack.c.bf16 %v4050_v61, %v4049_v22  ;;  %v3201_v40 = vpop.f32.mrb[211].mxu1  ;;  %v4051_v12 = vadd.f32 %v3690_v13, %v3411_v1  ;;  %v9080_v22 = vadd.f32 %v6420_v49, %v8590_v24  ;;  %v3415_v49 = vmax.f32 %v8758_v14, 0.0 }
 0x475   : > { %v9067_v48 = vadd.f32 %v8590_v24, %v3201_v40  ;;  %v3692_v5 = vpop.permute.xlu1 %3691  ;;  %3805 = vrot.lane.b32.xlu0 %v9060_v28, %s6762_s23 }
 0x476   : > { %v4052_v23 = vadd.f32 %v3692_v5, %v3412_v45  ;;  %6489 = vmatprep.mubr.msk.bf16.mxu0 %vm618_vm0, %v4167_v54  ;;  %v3416_v54 = vmax.f32 %v8763_v21, 0.0  ;;  %v3417_v21 = vmax.f32 %v8768_v7, 0.0 }
 0x477   : > { %3807 = vrot.lane.b32.xlu1 %v9067_v48, %s6762_s23  ;;  %v3694_v51 = vpop.permute.xlu0 %3693 }
 0x478   : > { %v4168_v46 = vpack.c.bf16 %v4052_v23, %v4051_v12  ;;  %v4053_v13 = vadd.f32 %v3694_v51, %v3413_v41 }
 0x479   : > { %v6423_v61 = vpop.f32.mrb[212].mxu1  ;;  %v3696_v11 = vpop.permute.xlu1 %3695  ;;  %3809 = vrot.lane.b32.xlu0 %v9073_v50, %s6762_s23 }
 0x47a   : > { %v4054_v10 = vadd.f32 %v3696_v11, %v3414_v15  ;;  %v3214_v1 = vpop.f32.mrb[213].mxu1  ;;  %6490 = vmatmul.mubr.msk.bf16.gmra.mrb[20].mxu0 %vm618_vm0, %v4168_v46  ;;  %v9099_v15 = vadd.f32 %v6423_v61, %v8590_v24  ;;  %v3418_v46 = vmax.f32 %v8773_v56, 0.0 }
 0x47b   : > { %v9086_v45 = vadd.f32 %v8590_v24, %v3214_v1  ;;  %v6424_v57 = vpop.f32.mrb[214].mxu1  ;;  %3811 = vrot.lane.b32.xlu1 %v9080_v22, %s6762_s23  ;;  %v3698_v34 = vpop.permute.xlu0 %3697 }
 0x47c   : > { %v4169_v40 = vpack.c.bf16 %v4054_v10, %v4053_v13  ;;  %v3217_v5 = vpop.f32.mrb[215].mxu1  ;;  %v4055_v51 = vadd.f32 %v3698_v34, %v3415_v49  ;;  %v9106_v13 = vadd.f32 %v6424_v57, %v8590_v24  ;;  %v3419_v57 = vmax.f32 %v8778_v8, 0.0 }
 0x47d   : > { %v9093_v12 = vadd.f32 %v8590_v24, %v3217_v5  ;;  %v3700_v23 = vpop.permute.xlu1 %3699  ;;  %3813 = vrot.lane.b32.xlu0 %v9086_v45, %s6762_s23 }
 0x47e   : > { %v4056_v41 = vadd.f32 %v3700_v23, %v3416_v54  ;;  %6493 = vmatprep.mubr.msk.bf16.mxu0 %vm618_vm0, %v4169_v40  ;;  %v3420_v23 = vmax.f32 %v8783_v33, 0.0  ;;  %v3421_v33 = vmax.f32 %v8788_v6, 0.0 }
 0x47f   : > { %3815 = vrot.lane.b32.xlu1 %v9093_v12, %s6762_s23  ;;  %v3702_v14 = vpop.permute.xlu0 %3701 }
 0x480   : > { %v4170_v11 = vpack.c.bf16 %v4056_v41, %v4055_v51  ;;  %v4057_v34 = vadd.f32 %v3702_v14, %v3417_v21 }
 0x481   : > { %v6427_v10 = vpop.f32.mrb[216].mxu1  ;;  %v3704_v1 = vpop.permute.xlu1 %3703  ;;  %3817 = vrot.lane.b32.xlu0 %v9099_v15, %s6762_s23 }
 0x482   : > { %v4058_v61 = vadd.f32 %v3704_v1, %v3418_v46  ;;  %v3230_v49 = vpop.f32.mrb[217].mxu1  ;;  %6494 = vmatmul.mubr.msk.bf16.gmra.mrb[24].mxu0 %vm618_vm0, %v4170_v11  ;;  %v9125_v46 = vadd.f32 %v6427_v10, %v8590_v24  ;;  %v3422_v1 = vmax.f32 %v8793_v9, 0.0 }
 0x483   : > { %v9112_v54 = vadd.f32 %v8590_v24, %v3230_v49  ;;  %v6428_v7 = vpop.f32.mrb[218].mxu1  ;;  %3819 = vrot.lane.b32.xlu1 %v9106_v13, %s6762_s23  ;;  %v3706_v56 = vpop.permute.xlu0 %3705 }
 0x484   : > { %v4171_v40 = vpack.c.bf16 %v4058_v61, %v4057_v34  ;;  %v3233_v5 = vpop.f32.mrb[219].mxu1  ;;  %v4059_v14 = vadd.f32 %v3706_v56, %v3419_v57  ;;  %v9132_v34 = vadd.f32 %v6428_v7, %v8590_v24  ;;  %v3423_v7 = vmax.f32 %v8798_v42, 0.0 }
 0x485   : > { %v9119_v51 = vadd.f32 %v8590_v24, %v3233_v5  ;;  %v3708_v41 = vpop.permute.xlu1 %3707  ;;  %3821 = vrot.lane.b32.xlu0 %v9112_v54, %s6762_s23 }
 0x486   : > { %v4060_v21 = vadd.f32 %v3708_v41, %v3420_v23  ;;  %6497 = vmatprep.mubr.msk.bf16.mxu0 %vm618_vm0, %v4171_v40  ;;  %v3424_v41 = vmax.f32 %v8803_v63, 0.0  ;;  %v3425_v63 = vmax.f32 %v8808_v53, 0.0 }
 0x487   : > { %3823 = vrot.lane.b32.xlu1 %v9119_v51, %s6762_s23  ;;  %v3710_v8 = vpop.permute.xlu0 %3709 }
 0x488   : > { %v4172_v11 = vpack.c.bf16 %v4060_v21, %v4059_v14  ;;  %v4061_v56 = vadd.f32 %v3710_v8, %v3421_v33 }
 0x489   : > { %v6431_v61 = vpop.f32.mrb[220].mxu1  ;;  %v3712_v49 = vpop.permute.xlu1 %3711  ;;  %3825 = vrot.lane.b32.xlu0 %v9125_v46, %s6762_s23 }
 0x48a   : > { %v4062_v10 = vadd.f32 %v3712_v49, %v3422_v1  ;;  %v3246_v57 = vpop.f32.mrb[221].mxu1  ;;  %6498 = vmatmul.mubr.msk.bf16.gmra.mrb[28].mxu0 %vm618_vm0, %v4172_v11  ;;  %v9151_v33 = vadd.f32 %v6431_v61, %v8590_v24  ;;  %v3426_v49 = vmax.f32 %v8813_v29, 0.0 }
 0x48b   : > { %v9138_v40 = vadd.f32 %v8590_v24, %v3246_v57  ;;  %v6432_v5 = vpop.f32.mrb[222].mxu1  ;;  %3827 = vrot.lane.b32.xlu1 %v9132_v34, %s6762_s23  ;;  %v3714_v6 = vpop.permute.xlu0 %3713 }
 0x48c   : > { %v4173_v9 = vpack.c.bf16 %v4062_v10, %v4061_v56  ;;  %v3249_v23 = vpop.f32.mrb[223].mxu1  ;;  %v4063_v8 = vadd.f32 %v3714_v6, %v3423_v7  ;;  %v9158_v56 = vadd.f32 %v6432_v5, %v8590_v24  ;;  %v3427_v5 = vmax.f32 %v8818_v27, 0.0 }
 0x48d   : > { %v9145_v14 = vadd.f32 %v8590_v24, %v3249_v23  ;;  %v3716_v21 = vpop.permute.xlu1 %3715  ;;  %3829 = vrot.lane.b32.xlu0 %v9138_v40, %s6762_s23 }
 0x48e   : > { %v4064_v11 = vadd.f32 %v3716_v21, %v3424_v41  ;;  %6501 = vmatprep.mubr.msk.bf16.mxu0 %vm618_vm0, %v4173_v9  ;;  %v3428_v21 = vmax.f32 %v8823_v16, 0.0  ;;  %v3429_v16 = vmax.f32 %v8828_v55, 0.0 }
 0x48f   : > { %3831 = vrot.lane.b32.xlu1 %v9145_v14, %s6762_s23  ;;  %v3718_v42 = vpop.permute.xlu0 %3717 }
 0x490   : > { %v4174_v1 = vpack.c.bf16 %v4064_v11, %v4063_v8  ;;  %v4065_v6 = vadd.f32 %v3718_v42, %v3425_v63 }
 0x491   : > { %v6435_v10 = vpop.f32.mrb[224].mxu1  ;;  %v3720_v57 = vpop.permute.xlu1 %3719  ;;  %3833 = vrot.lane.b32.xlu0 %v9151_v33, %s6762_s23 }
 0x492   : > { %v4066_v61 = vadd.f32 %v3720_v57, %v3426_v49  ;;  %v3262_v9 = vpop.f32.mrb[225].mxu1  ;;  %6502 = vmatmul.mubr.msk.bf16.gmra.mrb[32].mxu0 %vm618_vm0, %v4174_v1  ;;  %v9177_v63 = vadd.f32 %v6435_v10, %v8590_v24  ;;  %v3430_v57 = vmax.f32 %v8833_v52, 0.0 }
 0x493   : > { %v9164_v7 = vadd.f32 %v8590_v24, %v3262_v9  ;;  %v6436_v23 = vpop.f32.mrb[226].mxu1  ;;  %3835 = vrot.lane.b32.xlu1 %v9158_v56, %s6762_s23  ;;  %v3722_v53 = vpop.permute.xlu0 %3721 }
 0x494   : > { %v4175_v29 = vpack.c.bf16 %v4066_v61, %v4065_v6  ;;  %v3265_v41 = vpop.f32.mrb[227].mxu1  ;;  %v4067_v42 = vadd.f32 %v3722_v53, %v3427_v5  ;;  %v9184_v6 = vadd.f32 %v6436_v23, %v8590_v24  ;;  %v3431_v23 = vmax.f32 %v8838_v4, 0.0 }
 0x495   : > { %v9171_v8 = vadd.f32 %v8590_v24, %v3265_v41  ;;  %v3724_v11 = vpop.permute.xlu1 %3723  ;;  %3837 = vrot.lane.b32.xlu0 %v9164_v7, %s6762_s23 }
 0x496   : > { %v4068_v1 = vadd.f32 %v3724_v11, %v3428_v21  ;;  %6505 = vmatprep.mubr.msk.bf16.mxu0 %vm618_vm0, %v4175_v29  ;;  %v3432_v11 = vmax.f32 %v8843_v25, 0.0  ;;  %v3433_v25 = vmax.f32 %v8848_v39, 0.0 }
 0x497   : > { %3839 = vrot.lane.b32.xlu1 %v9171_v8, %s6762_s23  ;;  %v3726_v27 = vpop.permute.xlu0 %3725 }
 0x498   : > { %v4176_v49 = vpack.c.bf16 %v4068_v1, %v4067_v42  ;;  %v4069_v53 = vadd.f32 %v3726_v27, %v3429_v16 }
 0x499   : > { %v6439_v61 = vpop.f32.mrb[228].mxu1  ;;  %v3728_v9 = vpop.permute.xlu1 %3727  ;;  %3841 = vrot.lane.b32.xlu0 %v9177_v63, %s6762_s23 }
 0x49a   : > { %v4070_v10 = vadd.f32 %v3728_v9, %v3430_v57  ;;  %v3278_v29 = vpop.f32.mrb[229].mxu1  ;;  %6506 = vmatmul.mubr.msk.bf16.gmra.mrb[36].mxu0 %vm618_vm0, %v4176_v49  ;;  %v9203_v16 = vadd.f32 %v6439_v61, %v8590_v24  ;;  %v3434_v9 = vmax.f32 %v8853_v20, 0.0 }
 0x49b   : > { %v9190_v5 = vadd.f32 %v8590_v24, %v3278_v29  ;;  %v6440_v41 = vpop.f32.mrb[230].mxu1  ;;  %3843 = vrot.lane.b32.xlu1 %v9184_v6, %s6762_s23  ;;  %v3730_v55 = vpop.permute.xlu0 %3729 }
 0x49c   : > { %v4177_v52 = vpack.c.bf16 %v4070_v10, %v4069_v53  ;;  %v3281_v21 = vpop.f32.mrb[231].mxu1  ;;  %v4071_v27 = vadd.f32 %v3730_v55, %v3431_v23  ;;  %10199 = vst [vmem:[#allocation40_spill] sm:$0xff] %v9203_v16  ;;  %v9210_v53 = vadd.f32 %v6440_v41, %v8590_v24  ;;  %v10202_v41 = vld [vmem:[#allocation27_spill] sm:$0xff] }
 0x49d   : > { %v9197_v42 = vadd.f32 %v8590_v24, %v3281_v21  ;;  %v3732_v1 = vpop.permute.xlu1 %3731  ;;  %3845 = vrot.lane.b32.xlu0 %v9190_v5, %s6762_s23 }
 0x49e   : > { %v4072_v49 = vadd.f32 %v3732_v1, %v3432_v11  ;;  %6509 = vmatprep.mubr.msk.bf16.mxu0 %vm618_vm0, %v4177_v52  ;;  %10200 = vst [vmem:[#allocation38_spill] sm:$0xff] %v9210_v53  ;;  %v3435_v11 = vmax.f32 %v10202_v41, 0.0 }
 0x49f   : > { %3847 = vrot.lane.b32.xlu1 %v9197_v42, %s6762_s23  ;;  %v3734_v4 = vpop.permute.xlu0 %3733 }
 0x4a0   : > { %v4178_v57 = vpack.c.bf16 %v4072_v49, %v4071_v27  ;;  %v4073_v55 = vadd.f32 %v3734_v4, %v3433_v25  ;;  %v10203_v27 = vld [vmem:[#allocation25_spill] sm:$0xff]  ;;  %v9225_v4 = vld [vmem:[%s9855_s6] ss:$0 sm:$0xff] }
 0x4a1   : > { %v6443_v10 = vpop.f32.mrb[232].mxu1  ;;  %v3736_v29 = vpop.permute.xlu1 %3735  ;;  %3849 = vrot.lane.b32.xlu0 %v9203_v16, %s6762_s23  ;;  %v3436_v49 = vmax.f32 %v10203_v27, 0.0 }
 0x4a2   : > { %v4074_v61 = vadd.f32 %v3736_v29, %v3434_v9  ;;  %v3294_v52 = vpop.f32.mrb[233].mxu1  ;;  %6510 = vmatmul.mubr.msk.bf16.gmra.mrb[40].mxu0 %vm618_vm0, %v4178_v57  ;;  %v9234_v29 = vadd.f32 %v9225_v4, %v6443_v10 }
 0x4a3   : > { %v9216_v23 = vadd.f32 %v8590_v24, %v3294_v52  ;;  %v6444_v21 = vpop.f32.mrb[234].mxu1  ;;  %3851 = vrot.lane.b32.xlu1 %v9210_v53, %s6762_s23  ;;  %v3738_v39 = vpop.permute.xlu0 %3737  ;;  %v10206_v52 = vld [vmem:[#allocation26_spill] sm:$0xff] }
 0x4a4   : > { %v4179_v20 = vpack.c.bf16 %v4074_v61, %v4073_v55  ;;  %v3297_v1 = vpop.f32.mrb[235].mxu1  ;;  %v4075_v25 = vadd.f32 %v3738_v39, %v3435_v11  ;;  %10205 = vst [vmem:[#allocation44_spill] sm:$0xff] %v9234_v29  ;;  %v3437_v41 = vmax.f32 %v10206_v52, 0.0  ;;  %v9241_v53 = vadd.f32 %v9225_v4, %v6444_v21 }
 0x4a5   : > { %10201 = vst [vmem:[#allocation39_spill] sm:$0xff] %v9216_v23  ;;  %v9228_v57 = vadd.f32 %v9225_v4, %v3297_v1  ;;  %v3740_v24 = vpop.permute.xlu1 %3739  ;;  %3853 = vrot.lane.b32.xlu0 %v9216_v23, %s6762_s23  ;;  %v10207_v1 = vld [vmem:[#allocation24_spill] sm:$0xff] }
 0x4a6   : > { %v4076_v9 = vadd.f32 %v3740_v24, %v3436_v49  ;;  %6513 = vmatprep.mubr.msk.bf16.mxu0 %vm618_vm0, %v4179_v20  ;;  %v3438_v27 = vmax.f32 %v10207_v1, 0.0  ;;  %10208 = vst [vmem:[#allocation42_spill] sm:$0xff] %v9241_v53 }
 0x4a7   : > { %10204 = vst [vmem:[#allocation37_spill] sm:$0xff] %v9228_v57  ;;  %3855 = vrot.lane.b32.xlu1 %v9228_v57, %s6762_s23  ;;  %v3742_v55 = vpop.permute.xlu0 %3741  ;;  %v10211_v57 = vld [vmem:[#allocation29_spill] sm:$0xff] }
 0x4a8   : > { %v4180_v61 = vpack.c.bf16 %v4076_v9, %v4075_v25  ;;  %v4077_v20 = vadd.f32 %v3742_v55, %v3437_v41  ;;  %v10210_v9 = vld [vmem:[#allocation31_spill] sm:$0xff]  ;;  %v3440_v16 = vmax.f32 %v10211_v57, 0.0  ;;  %v10213_v57 = vld [vmem:[#allocation30_spill] sm:$0xff] }
 0x4a9   : > { %v6447_v23 = vpop.f32.mrb[236].mxu1  ;;  %v3744_v39 = vpop.permute.xlu1 %3743  ;;  %3857 = vrot.lane.b32.xlu0 %v9234_v29, %s6762_s23  ;;  %v3439_v52 = vmax.f32 %v10210_v9, 0.0  ;;  %v10214_v9 = vld [vmem:[#allocation28_spill] sm:$0xff] }
 0x4aa   : > { %v4078_v10 = vadd.f32 %v3744_v39, %v3438_v27  ;;  %v3310_v11 = vpop.f32.mrb[237].mxu1  ;;  %6514 = vmatmul.mubr.msk.bf16.gmra.mrb[44].mxu0 %vm618_vm0, %v4180_v61  ;;  %v9260_v39 = vadd.f32 %v9225_v4, %v6447_v23 }
 0x4ab   : > { %v9247_v49 = vadd.f32 %v9225_v4, %v3310_v11  ;;  %v6448_v24 = vpop.f32.mrb[238].mxu1  ;;  %3859 = vrot.lane.b32.xlu1 %v9241_v53, %s6762_s23  ;;  %v3746_v25 = vpop.permute.xlu0 %3745  ;;  %v3441_v11 = vmax.f32 %v10213_v57, 0.0 }
 0x4ac   : > { %v4181_v21 = vpack.c.bf16 %v4078_v10, %v4077_v20  ;;  %v3313_v1 = vpop.f32.mrb[239].mxu1  ;;  %v4079_v61 = vadd.f32 %v3746_v25, %v3439_v52  ;;  %v9267_v53 = vadd.f32 %v9225_v4, %v6448_v24 }
 0x4ad   : > { %10209 = vst [vmem:[#allocation43_spill] sm:$0xff] %v9247_v49  ;;  %v9254_v55 = vadd.f32 %v9225_v4, %v3313_v1  ;;  %v3748_v41 = vpop.permute.xlu1 %3747  ;;  %3861 = vrot.lane.b32.xlu0 %v9247_v49, %s6762_s23  ;;  %v3442_v1 = vmax.f32 %v10214_v9, 0.0 }
 0x4ae   : > { %v4080_v27 = vadd.f32 %v3748_v41, %v3440_v16  ;;  %6517 = vmatprep.mubr.msk.bf16.mxu0 %vm618_vm0, %v4181_v21  ;;  %10215 = vst [vmem:[#allocation47_spill] sm:$0xff] %v9267_v53 }
 0x4af   : > { %10212 = vst [vmem:[#allocation41_spill] sm:$0xff] %v9254_v55  ;;  %3863 = vrot.lane.b32.xlu1 %v9254_v55, %s6762_s23  ;;  %v3750_v20 = vpop.permute.xlu0 %3749  ;;  %v10218_v55 = vld [vmem:[#allocation33_spill] sm:$0xff] }
 0x4b0   : > { %v4182_v10 = vpack.c.bf16 %v4080_v27, %v4079_v61  ;;  %v4081_v16 = vadd.f32 %v3750_v20, %v3441_v11  ;;  %v10217_v27 = vld [vmem:[#allocation35_spill] sm:$0xff]  ;;  %v3444_v29 = vmax.f32 %v10218_v55, 0.0  ;;  %v10220_v55 = vld [vmem:[#allocation34_spill] sm:$0xff] }
 0x4b1   : > { %v6451_v49 = vpop.f32.mrb[240].mxu1  ;;  %v3752_v25 = vpop.permute.xlu1 %3751  ;;  %3865 = vrot.lane.b32.xlu0 %v9260_v39, %s6762_s23  ;;  %v3443_v57 = vmax.f32 %v10217_v27, 0.0  ;;  %v10221_v27 = vld [vmem:[#allocation32_spill] sm:$0xff] }
 0x4b2   : > { %v4082_v23 = vadd.f32 %v3752_v25, %v3442_v1  ;;  %v3326_v21 = vpop.f32.mrb[241].mxu1  ;;  %6518 = vmatmul.mubr.msk.bf16.gmra.mrb[48].mxu0 %vm618_vm0, %v4182_v10  ;;  %v9286_v25 = vadd.f32 %v9225_v4, %v6451_v49 }
 0x4b3   : > { %v9273_v52 = vadd.f32 %v9225_v4, %v3326_v21  ;;  %v6452_v41 = vpop.f32.mrb[242].mxu1  ;;  %3867 = vrot.lane.b32.xlu1 %v9267_v53, %s6762_s23  ;;  %v3754_v61 = vpop.permute.xlu0 %3753  ;;  %v3445_v21 = vmax.f32 %v10220_v55, 0.0 }
 0x4b4   : > { %v4183_v24 = vpack.c.bf16 %v4082_v23, %v4081_v16  ;;  %v3329_v9 = vpop.f32.mrb[243].mxu1  ;;  %v4083_v10 = vadd.f32 %v3754_v61, %v3443_v57  ;;  %v9293_v53 = vadd.f32 %v9225_v4, %v6452_v41 }
 0x4b5   : > { %10216 = vst [vmem:[#allocation46_spill] sm:$0xff] %v9273_v52  ;;  %v9280_v20 = vadd.f32 %v9225_v4, %v3329_v9  ;;  %v3756_v11 = vpop.permute.xlu1 %3755  ;;  %3869 = vrot.lane.b32.xlu0 %v9273_v52, %s6762_s23  ;;  %v3446_v9 = vmax.f32 %v10221_v27, 0.0 }
 0x4b6   : > { %v4084_v1 = vadd.f32 %v3756_v11, %v3444_v29  ;;  %6521 = vmatprep.mubr.msk.bf16.mxu0 %vm618_vm0, %v4183_v24 }
 0x4b7   : > { %10219 = vst [vmem:[#allocation45_spill] sm:$0xff] %v9280_v20  ;;  %3871 = vrot.lane.b32.xlu1 %v9280_v20, %s6762_s23  ;;  %v3758_v16 = vpop.permute.xlu0 %3757  ;;  %v3448_v20 = vmax.f32 %v8925_v31, 0.0  ;;  %v3449_v31 = vmax.f32 %v8932_v59, 0.0 }
 0x4b8   : > { %v4184_v23 = vpack.c.bf16 %v4084_v1, %v4083_v10  ;;  %v4085_v29 = vadd.f32 %v3758_v16, %v3445_v21  ;;  %v10222_v1 = vld [vmem:[#allocation36_spill] sm:$0xff] }
 0x4b9   : > { %v6455_v52 = vpop.f32.mrb[244].mxu1  ;;  %v3760_v61 = vpop.permute.xlu1 %3759  ;;  %3873 = vrot.lane.b32.xlu0 %v9286_v25, %s6762_s23  ;;  %v3447_v55 = vmax.f32 %v10222_v1, 0.0 }
 0x4ba   : > { %v4086_v49 = vadd.f32 %v3760_v61, %v3446_v9  ;;  %v3342_v24 = vpop.f32.mrb[245].mxu1  ;;  %6522 = vmatmul.mubr.msk.bf16.gmra.mrb[52].mxu0 %vm618_vm0, %v4184_v23  ;;  %v9312_v61 = vadd.f32 %v9225_v4, %v6455_v52 }
 0x4bb   : > { %v9299_v57 = vadd.f32 %v9225_v4, %v3342_v24  ;;  %v6456_v11 = vpop.f32.mrb[246].mxu1  ;;  %3875 = vrot.lane.b32.xlu1 %v9293_v53, %s6762_s23  ;;  %v3762_v10 = vpop.permute.xlu0 %3761  ;;  %v3450_v24 = vmax.f32 %v8937_v0, 0.0 }
 0x4bc   : > { %v4185_v41 = vpack.c.bf16 %v4086_v49, %v4085_v29  ;;  %v3345_v27 = vpop.f32.mrb[247].mxu1  ;;  %v4087_v23 = vadd.f32 %v3762_v10, %v3447_v55  ;;  %v9319_v1 = vadd.f32 %v9225_v4, %v6456_v11  ;;  %v3451_v11 = vmax.f32 %v8942_v35, 0.0 }
 0x4bd   : > { %v9306_v16 = vadd.f32 %v9225_v4, %v3345_v27  ;;  %v3764_v21 = vpop.permute.xlu1 %3763  ;;  %3877 = vrot.lane.b32.xlu0 %v9299_v57, %s6762_s23 }
 0x4be   : > { %v4088_v9 = vadd.f32 %v3764_v21, %v3448_v20  ;;  %6525 = vmatprep.mubr.msk.bf16.mxu0 %vm618_vm0, %v4185_v41 }
 0x4bf   : > { %3879 = vrot.lane.b32.xlu1 %v9306_v16, %s6762_s23  ;;  %v3766_v29 = vpop.permute.xlu0 %3765 }
 0x4c0   : > { %v4186_v49 = vpack.c.bf16 %v4088_v9, %v4087_v23  ;;  %v4089_v20 = vadd.f32 %v3766_v29, %v3449_v31  ;;  %v3452_v9 = vmax.f32 %v8950_v38, 0.0  ;;  %v3453_v38 = vmax.f32 %v8956_v62, 0.0 }
 0x4c1   : > { %v6459_v27 = vpop.f32.mrb[248].mxu1  ;;  %v3768_v10 = vpop.permute.xlu1 %3767  ;;  %3881 = vrot.lane.b32.xlu0 %v9312_v61, %s6762_s23 }
 0x4c2   : > { %v4090_v52 = vadd.f32 %v3768_v10, %v3450_v24  ;;  %v3358_v41 = vpop.f32.mrb[249].mxu1  ;;  %6526 = vmatmul.mubr.msk.bf16.gmra.mrb[56].mxu0 %vm618_vm0, %v4186_v49  ;;  %v9338_v10 = vadd.f32 %v9225_v4, %v6459_v27 }
 0x4c3   : > { %v9325_v55 = vadd.f32 %v9225_v4, %v3358_v41  ;;  %v6460_v21 = vpop.f32.mrb[250].mxu1  ;;  %3883 = vrot.lane.b32.xlu1 %v9319_v1, %s6762_s23  ;;  %v3770_v59 = vpop.permute.xlu0 %3769 }
 0x4c4   : > { %v4187_v0 = vpack.c.bf16 %v4090_v52, %v4089_v20  ;;  %v3361_v23 = vpop.f32.mrb[251].mxu1  ;;  %v4091_v49 = vadd.f32 %v3770_v59, %v3451_v11  ;;  %v3454_v52 = vmax.f32 %v8963_v43, 0.0  ;;  %v9345_v41 = vadd.f32 %v9225_v4, %v6460_v21 }
 0x4c5   : > { %v9332_v29 = vadd.f32 %v9225_v4, %v3361_v23  ;;  %v3772_v31 = vpop.permute.xlu1 %3771  ;;  %3885 = vrot.lane.b32.xlu0 %v9325_v55, %s6762_s23  ;;  %v3455_v21 = vmax.f32 %v8969_v44, 0.0 }
 0x4c6   : > { %v4092_v24 = vadd.f32 %v3772_v31, %v3452_v9  ;;  %6529 = vmatprep.mubr.msk.bf16.mxu0 %vm618_vm0, %v4187_v0 }
 0x4c7   : > { %3887 = vrot.lane.b32.xlu1 %v9332_v29, %s6762_s23  ;;  %v3774_v35 = vpop.permute.xlu0 %3773 }
 0x4c8   : > { %v4188_v20 = vpack.c.bf16 %v4092_v24, %v4091_v49  ;;  %v4093_v0 = vadd.f32 %v3774_v35, %v3453_v38  ;;  %v3456_v24 = vmax.f32 %v8976_v2, 0.0  ;;  %v3457_v2 = vmax.f32 %v8982_v47, 0.0 }
 0x4c9   : > { %v6463_v23 = vpop.f32.mrb[252].mxu1  ;;  %v3776_v59 = vpop.permute.xlu1 %3775  ;;  %3889 = vrot.lane.b32.xlu0 %v9338_v10, %s6762_s23  ;;  %v3459_v47 = vmax.f32 %v8995_v58, 0.0 }
 0x4ca   : > { %v4094_v27 = vadd.f32 %v3776_v59, %v3454_v52  ;;  %v3374_v11 = vpop.f32.mrb[253].mxu1  ;;  %6530 = vmatmul.mubr.msk.bf16.gmra.mrb[60].mxu0 %vm618_vm0, %v4188_v20  ;;  %v9364_v59 = vadd.f32 %v9225_v4, %v6463_v23 }
 0x4cb   : > { %v9351_v9 = vadd.f32 %v9225_v4, %v3374_v11  ;;  %v6464_v31 = vpop.f32.mrb[254].mxu1  ;;  %3891 = vrot.lane.b32.xlu1 %v9345_v41, %s6762_s23  ;;  %v3778_v62 = vpop.permute.xlu0 %3777 }
 0x4cc   : > { %v4189_v43 = vpack.c.bf16 %v4094_v27, %v4093_v0  ;;  %v3377_v49 = vpop.f32.mrb[255].mxu1  ;;  %v4095_v20 = vadd.f32 %v3778_v62, %v3455_v21  ;;  %v3458_v27 = vmax.f32 %v8989_v19, 0.0  ;;  %v9371_v11 = vadd.f32 %v9225_v4, %v6464_v31 }
 0x4cd   : > { %v9358_v35 = vadd.f32 %v9225_v4, %v3377_v49  ;;  %v3780_v38 = vpop.permute.xlu1 %3779  ;;  %3893 = vrot.lane.b32.xlu0 %v9351_v9, %s6762_s23  ;;  %v3460_v19 = vmax.f32 %v9002_v18, 0.0  ;;  %v3463_v18 = vmax.f32 %v9021_v30, 0.0 }
 0x4ce   : > { %v4096_v52 = vadd.f32 %v3780_v38, %v3456_v24  ;;  %6533 = vmatprep.mubr.msk.bf16.mxu0 %vm618_vm0, %v4189_v43 }
 0x4cf   : > { %3895 = vrot.lane.b32.xlu1 %v9358_v35, %s6762_s23  ;;  %v3782_v44 = vpop.permute.xlu0 %3781 }
 0x4d0   : > { %v4190_v0 = vpack.c.bf16 %v4096_v52, %v4095_v20  ;;  %v4097_v62 = vadd.f32 %v3782_v44, %v3457_v2  ;;  %v3461_v52 = vmax.f32 %v9008_v32, 0.0  ;;  %v3462_v44 = vmax.f32 %v9015_v36, 0.0 }
 0x4d1   : > { %v3784_v49 = vpop.permute.xlu1 %3783  ;;  %3897 = vrot.lane.b32.xlu0 %v9364_v59, %s6762_s23  ;;  %v3465_v36 = vmax.f32 %v9034_v60, 0.0 }
 0x4d2   : > { %v4098_v43 = vadd.f32 %v3784_v49, %v3458_v27  ;;  %6534 = vmatmul.mubr.msk.bf16.gmra.mrb[64].mxu0 %vm618_vm0, %v4190_v0 }
 0x4d3   : > { %3899 = vrot.lane.b32.xlu1 %v9371_v11, %s6762_s23  ;;  %v3786_v23 = vpop.permute.xlu0 %3785  ;;  %s380_s23 = sand.u32 1, %s6751_s20  }
 0x4d4   : > { %v4191_v21 = vpack.c.bf16 %v4098_v43, %v4097_v62  ;;  %v4099_v4 = vadd.f32 %v3786_v23, %v3459_v47  ;;  %v3464_v62 = vmax.f32 %v9028_v3, 0.0  ;;  %v3467_v3 = vmax.f32 %v9047_v26, 0.0  ;;  %s5681_s25 = sshll.u32 %s380_s23, 3  ;;  %s5604_s16 = scalar_lea.sflag [#allocation4], %s380_s23 }
 0x4d5   : > { %v3788_v24 = vpop.permute.xlu1 %3787  ;;  %s382_s26 = scalar_lea.vmem [#allocation3], %s5681_s25  ;;  %s6703_s25 = scalar_lea.vmem %s6702_s10, 256 }
 0x4d6   : > { %v4100_v31 = vadd.f32 %v3788_v24, %v3460_v19  ;;  %6537 = vmatprep.mubr.msk.bf16.mxu0 %vm618_vm0, %v4191_v21  ;;  %v3466_v19 = vmax.f32 %v9041_v37, 0.0  ;;  %v3469_v37 = vmax.f32 %v9060_v28, 0.0  ;;  %s5618_s30 = sshll.u32 %s382_s26, 4  ;;  %s9809_s30 = int_to_ptr.vmem [resolvable:$true] %s5618_s30 }
 0x4d7   : > { %v3790_v38 = vpop.permute.xlu0 %3789  ;;  %s6697_s17 = scalar_lea.vmem %s9809_s30, 128  ;;  %p6704_p0 = scmp.lt.s32.totalorder %s9809_s30, %s6702_s10 }
 0x4d8   : > { %v4192_v20 = vpack.c.bf16 %v4100_v31, %v4099_v4  ;;  %v4101_v2 = vadd.f32 %v3790_v38, %v3461_v52  ;;  %p6698_p11 = scmp.ne.s32.totalorder %s9809_s30, %s6697_s17  ;;  %p6705_p1 = scmp.lt.s32.totalorder %s6703_s25, %s6697_s17 }
 0x4d9   : > { %v3792_v0 = vpop.permute.xlu1 %3791 }
 0x4da   : > { %v4102_v27 = vadd.f32 %v3792_v0, %v3462_v44  ;;  %6538 = vmatmul.mubr.msk.bf16.gmra.mrb[68].mxu0 %vm618_vm0, %v4192_v20  ;;  %v3468_v20 = vmax.f32 %v9054_v17, 0.0  ;;  %v3471_v17 = vmax.f32 %v9073_v50, 0.0  ;;  %p6699_p12 = pnand %p6698_p11, %p6863_p5  ;;  %p6706_p2 = por %p6705_p1, %p6704_p0 }
 0x4db   : > { %v3794_v49 = vpop.permute.xlu0 %3793 }
 0x4dc   : > { %v4193_v58 = vpack.c.bf16 %v4102_v27, %v4101_v2  ;;  %v4103_v23 = vadd.f32 %v3794_v49, %v3463_v18  ;;  %v3470_v27 = vmax.f32 %v9067_v48, 0.0  ;;  %v3473_v48 = vmax.f32 %v9086_v45, 0.0  ;;  %p6700_p13 = pneg %p6699_p12 }
 0x4dd   : > { %v3796_v43 = vpop.permute.xlu1 %3795 }
 0x4de   : > { %v4104_v21 = vadd.f32 %v3796_v43, %v3464_v62  ;;  %6541 = vmatprep.mubr.msk.bf16.mxu0 %vm618_vm0, %v4193_v58  ;;  %v3472_v43 = vmax.f32 %v9080_v22, 0.0  ;;  %v3475_v22 = vmax.f32 %v9099_v15, 0.0  ;;  %p6707_p3 = pnand %p6706_p2, %p6700_p13 }
 0x4df   : > { %v3798_v47 = vpop.permute.xlu0 %3797 }
 0x4e0   : > { %v4194_v32 = vpack.c.bf16 %v4104_v21, %v4103_v23  ;;  %v4105_v4 = vadd.f32 %v3798_v47, %v3465_v36  ;;  %v3474_v36 = vmax.f32 %v9093_v12, 0.0  ;;  %v3477_v12 = vmax.f32 %v9112_v54, 0.0 }
 0x4e1   : > { %v3800_v24 = vpop.permute.xlu1 %3799 }
 0x4e2   : > { %v4106_v31 = vadd.f32 %v3800_v24, %v3466_v19  ;;  %6542 = vmatmul.mubr.msk.bf16.gmra.mrb[72].mxu0 %vm618_vm0, %v4194_v32 }
 0x4e3   : > { %v3802_v38 = vpop.permute.xlu0 %3801 }
 0x4e4   : > { %v4195_v30 = vpack.c.bf16 %v4106_v31, %v4105_v4  ;;  %v4107_v44 = vadd.f32 %v3802_v38, %v3467_v3  ;;  %v3476_v38 = vmax.f32 %v9106_v13, 0.0  ;;  %v3479_v13 = vmax.f32 %v9125_v46, 0.0 }
 0x4e5   : > { %v3804_v52 = vpop.permute.xlu1 %3803 }
 0x4e6   : > { %v4108_v0 = vadd.f32 %v3804_v52, %v3468_v20  ;;  %6545 = vmatprep.mubr.msk.bf16.mxu0 %vm618_vm0, %v4195_v30 }
 0x4e7   : > { %v3806_v2 = vpop.permute.xlu0 %3805 }
 0x4e8   : > { %v4196_v60 = vpack.c.bf16 %v4108_v0, %v4107_v44  ;;  %v4109_v58 = vadd.f32 %v3806_v2, %v3469_v37  ;;  %v3478_v44 = vmax.f32 %v9119_v51, 0.0  ;;  %v3481_v51 = vmax.f32 %v9138_v40, 0.0 }
 0x4e9   : > { %v3808_v49 = vpop.permute.xlu1 %3807 }
 0x4ea   : > { %v4110_v18 = vadd.f32 %v3808_v49, %v3470_v27  ;;  %6546 = vmatmul.mubr.msk.bf16.gmra.mrb[76].mxu0 %vm618_vm0, %v4196_v60  ;;  %v3480_v27 = vmax.f32 %v9132_v34, 0.0  ;;  %v3483_v34 = vmax.f32 %v9151_v33, 0.0 }
 0x4eb   : > { %v3810_v62 = vpop.permute.xlu0 %3809 }
 0x4ec   : > { %v4197_v26 = vpack.c.bf16 %v4110_v18, %v4109_v58  ;;  %v4111_v21 = vadd.f32 %v3810_v62, %v3471_v17 }
 0x4ed   : > { %v3812_v23 = vpop.permute.xlu1 %3811 }
 0x4ee   : > { %v4112_v47 = vadd.f32 %v3812_v23, %v3472_v43  ;;  %6549 = vmatprep.mubr.msk.bf16.mxu0 %vm618_vm0, %v4197_v26  ;;  %v3482_v26 = vmax.f32 %v9145_v14, 0.0  ;;  %v3485_v14 = vmax.f32 %v9164_v7, 0.0 }
 0x4ef   : > { %v3814_v32 = vpop.permute.xlu0 %3813 }
 0x4f0   : > { %v4198_v28 = vpack.c.bf16 %v4112_v47, %v4111_v21  ;;  %v4113_v24 = vadd.f32 %v3814_v32, %v3473_v48  ;;  %v3484_v47 = vmax.f32 %v9158_v56, 0.0  ;;  %v3487_v56 = vmax.f32 %v9177_v63, 0.0 }
 0x4f1   : > { %v3816_v19 = vpop.permute.xlu1 %3815  ;;  %v3489_v63 = vmax.f32 %v9190_v5, 0.0 }
 0x4f2   : > { %v4114_v4 = vadd.f32 %v3816_v19, %v3474_v36  ;;  %6550 = vmatmul.mubr.msk.bf16.gmra.mrb[80].mxu0 %vm618_vm0, %v4198_v28  ;;  %v3486_v19 = vmax.f32 %v9171_v8, 0.0 }
 0x4f3   : > { %v3818_v31 = vpop.permute.xlu0 %3817 }
 0x4f4   : > { %v4199_v50 = vpack.c.bf16 %v4114_v4, %v4113_v24  ;;  %v4115_v3 = vadd.f32 %v3818_v31, %v3475_v22  ;;  %v3488_v22 = vmax.f32 %v9184_v6, 0.0  ;;  %v3490_v6 = vmax.f32 %v9197_v42, 0.0 }
 0x4f5   : > { %v3820_v30 = vpop.permute.xlu1 %3819 }
 0x4f6   : > { %v4116_v20 = vadd.f32 %v3820_v30, %v3476_v38  ;;  %6553 = vmatprep.mubr.msk.bf16.mxu0 %vm618_vm0, %v4199_v50  ;;  %v9425_v30 = vld [vmem:[%s9858_s9] sm:$0x1] }
 0x4f7   : > { %v3822_v52 = vpop.permute.xlu0 %3821  ;;  %6129 = vmatprep.mubr.msk.bf16.mxu1 %vm5184_vm2, %v9425_v30 }
 0x4f8   : > { %v4200_v45 = vpack.c.bf16 %v4116_v20, %v4115_v3  ;;  %v4117_v2 = vadd.f32 %v3822_v52, %v3477_v12 }
 0x4f9   : > { %v3824_v0 = vpop.permute.xlu1 %3823 }
 0x4fa   : > { %v4118_v60 = vadd.f32 %v3824_v0, %v3478_v44  ;;  %6554 = vmatmul.mubr.msk.bf16.gmra.mrb[84].mxu0 %vm618_vm0, %v4200_v45 }
 0x4fb   : > { %v3826_v37 = vpop.permute.xlu0 %3825 }
 0x4fc   : > { %v4201_v15 = vpack.c.bf16 %v4118_v60, %v4117_v2  ;;  %v4119_v58 = vadd.f32 %v3826_v37, %v3479_v13  ;;  %v10223_v2 = vld [vmem:[#allocation40_spill] sm:$0xff]  ;;  %v10224_v37 = vld [vmem:[#allocation38_spill] sm:$0xff] }
 0x4fd   : > { %v3828_v49 = vpop.permute.xlu1 %3827  ;;  %v3491_v60 = vmax.f32 %v10223_v2, 0.0 }
 0x4fe   : > { %v4120_v18 = vadd.f32 %v3828_v49, %v3480_v27  ;;  %6557 = vmatprep.mubr.msk.bf16.mxu0 %vm618_vm0, %v4201_v15  ;;  %v3492_v15 = vmax.f32 %v10224_v37, 0.0 }
 0x4ff   : > { %v3830_v62 = vpop.permute.xlu0 %3829 }
 0x500   : > { %v4202_v54 = vpack.c.bf16 %v4120_v18, %v4119_v58  ;;  %v4121_v43 = vadd.f32 %v3830_v62, %v3481_v51  ;;  %v10225_v18 = vld [vmem:[#allocation39_spill] sm:$0xff]  ;;  %v10226_v62 = vld [vmem:[#allocation37_spill] sm:$0xff] }
 0x501   : > { %v3832_v17 = vpop.permute.xlu1 %3831  ;;  %v3493_v42 = vmax.f32 %v10225_v18, 0.0 }
 0x502   : > { %v4122_v23 = vadd.f32 %v3832_v17, %v3482_v26  ;;  %6558 = vmatmul.mubr.msk.bf16.gmra.mrb[88].mxu0 %vm618_vm0, %v4202_v54  ;;  %v3494_v54 = vmax.f32 %v10226_v62, 0.0 }
 0x503   : > { %v3834_v21 = vpop.permute.xlu0 %3833 }
 0x504   : > { %v4203_v46 = vpack.c.bf16 %v4122_v23, %v4121_v43  ;;  %v4123_v28 = vadd.f32 %v3834_v21, %v3483_v34  ;;  %v10227_v21 = vld [vmem:[#allocation44_spill] sm:$0xff]  ;;  %v10228_v34 = vld [vmem:[#allocation42_spill] sm:$0xff] }
 0x505   : > { %v3836_v32 = vpop.permute.xlu1 %3835 }
 0x506   : > { %v4124_v48 = vadd.f32 %v3836_v32, %v3484_v47  ;;  %6561 = vmatprep.mubr.msk.bf16.mxu0 %vm618_vm0, %v4203_v46  ;;  %v3495_v46 = vmax.f32 %v10227_v21, 0.0  ;;  %v3496_v47 = vmax.f32 %v10228_v34, 0.0  ;;  %v3504_v34 = vmax.f32 %v9293_v53, 0.0 }
 0x507   : > { %v3838_v36 = vpop.permute.xlu0 %3837  ;;  %v3506_v53 = vmax.f32 %v9306_v16, 0.0 }
 0x508   : > { %v4204_v40 = vpack.c.bf16 %v4124_v48, %v4123_v28  ;;  %v4125_v4 = vadd.f32 %v3838_v36, %v3485_v14  ;;  %v10229_v14 = vld [vmem:[#allocation43_spill] sm:$0xff] }
 0x509   : > { %v3840_v24 = vpop.permute.xlu1 %3839 }
 0x50a   : > { %v4126_v31 = vadd.f32 %v3840_v24, %v3486_v19  ;;  %6562 = vmatmul.mubr.msk.bf16.gmra.mrb[92].mxu0 %vm618_vm0, %v4204_v40  ;;  %v3497_v19 = vmax.f32 %v10229_v14, 0.0  ;;  %v10230_v24 = vld [vmem:[#allocation41_spill] sm:$0xff] }
 0x50b   : > { %v3842_v50 = vpop.permute.xlu0 %3841 }
 0x50c   : > { %v4205_v33 = vpack.c.bf16 %v4126_v31, %v4125_v4  ;;  %v4127_v7 = vadd.f32 %v3842_v50, %v3487_v56  ;;  %v3498_v4 = vmax.f32 %v10230_v24, 0.0  ;;  %v9448_v56 = vld [vmem:[%s9857_s8] ss:$0 sm:$0xff] }
 0x50d   : > { %v3844_v38 = vpop.permute.xlu1 %3843 }
 0x50e   : > { %v4128_v8 = vadd.f32 %v3844_v38, %v3488_v22  ;;  %6565 = vmatprep.mubr.msk.bf16.mxu0 %vm618_vm0, %v4205_v33 }
 0x50f   : > { %v3846_v3 = vpop.permute.xlu0 %3845 }
 0x510   : > { %v4206_v20 = vpack.c.bf16 %v4128_v8, %v4127_v7  ;;  %v4129_v45 = vadd.f32 %v3846_v3, %v3489_v63  ;;  %v3499_v7 = vmax.f32 %v9260_v39, 0.0  ;;  %v10231_v3 = vld [vmem:[#allocation47_spill] sm:$0xff]  ;;  %v10232_v39 = vld [vmem:[#allocation46_spill] sm:$0xff] }
 0x511   : > { %v3848_v52 = vpop.permute.xlu1 %3847 }
 0x512   : > { %v4130_v12 = vadd.f32 %v3848_v52, %v3490_v6  ;;  %6566 = vmatmul.mubr.msk.bf16.gmra.mrb[96].mxu0 %vm618_vm0, %v4206_v20  ;;  %v3500_v20 = vmax.f32 %v10231_v3, 0.0 }
 0x513   : > { %v3850_v44 = vpop.permute.xlu0 %3849 }
 0x514   : > { %v4207_v0 = vpack.c.bf16 %v4130_v12, %v4129_v45  ;;  %v4131_v27 = vadd.f32 %v3850_v44, %v3491_v60 }
 0x515   : > { %v3852_v13 = vpop.permute.xlu1 %3851 }
 0x516   : > { %v4132_v49 = vadd.f32 %v3852_v13, %v3492_v15  ;;  %6569 = vmatprep.mubr.msk.bf16.mxu0 %vm618_vm0, %v4207_v0  ;;  %v3501_v13 = vmax.f32 %v10232_v39, 0.0 }
 0x517   : > { %v3854_v58 = vpop.permute.xlu0 %3853 }
 0x518   : > { %v4208_v5 = vpack.c.bf16 %v4132_v49, %v4131_v27  ;;  %v4133_v26 = vadd.f32 %v3854_v58, %v3493_v42  ;;  %v10233_v49 = vld [vmem:[#allocation45_spill] sm:$0xff] }
 0x519   : > { %v3856_v51 = vpop.permute.xlu1 %3855  ;;  %v3502_v58 = vmax.f32 %v10233_v49, 0.0 }
 0x51a   : > { %v4134_v17 = vadd.f32 %v3856_v51, %v3494_v54  ;;  %6570 = vmatmul.mubr.msk.bf16.gmra.mrb[100].mxu0 %vm618_vm0, %v4208_v5 }
 0x51b   : > { %v3858_v43 = vpop.permute.xlu0 %3857 }
 0x51c   : > { %v4209_v23 = vpack.c.bf16 %v4134_v17, %v4133_v26  ;;  %v4135_v28 = vadd.f32 %v3858_v43, %v3495_v46  ;;  %v3503_v46 = vmax.f32 %v9286_v25, 0.0 }
 0x51d   : > { %v3860_v32 = vpop.permute.xlu1 %3859 }
 0x51e   : > { %v4136_v48 = vadd.f32 %v3860_v32, %v3496_v47  ;;  %6573 = vmatprep.mubr.msk.bf16.mxu0 %vm618_vm0, %v4209_v23 }
 0x51f   : > { %v3862_v36 = vpop.permute.xlu0 %3861 }
 0x520   : > { %v4210_v40 = vpack.c.bf16 %v4136_v48, %v4135_v28  ;;  %v4137_v50 = vadd.f32 %v3862_v36, %v3497_v19 }
 0x521   : > { %v3864_v31 = vpop.permute.xlu1 %3863 }
 0x522   : > { %v4138_v33 = vadd.f32 %v3864_v31, %v3498_v4  ;;  %6574 = vmatmul.mubr.msk.bf16.gmra.mrb[104].mxu0 %vm618_vm0, %v4210_v40  ;;  %v3505_v31 = vmax.f32 %v9299_v57, 0.0 }
 0x523   : > { %v3866_v22 = vpop.permute.xlu0 %3865 }
 0x524   : > { %v4211_v38 = vpack.c.bf16 %v4138_v33, %v4137_v50  ;;  %v6471_v8 = vpop.f32.mrb[0].mxu0  ;;  %v4139_v45 = vadd.f32 %v3866_v22, %v3499_v7 }
 0x525   : > { %v4479_v63 = vadd.f32 %v6471_v8, %v9448_v56  ;;  %v3868_v6 = vpop.permute.xlu1 %3867  ;;  %v4470_v52 = vpop.f32.mrb[1].mxu0 }
 0x526   : > { %v4140_v12 = vadd.f32 %v3868_v6, %v3500_v20  ;;  %v4471_v44 = vadd.f32 %v9448_v56, %v4470_v52  ;;  %v6472_v0 = vpop.f32.mrb[2].mxu0  ;;  %6577 = vmatprep.mubr.msk.bf16.mxu0 %vm618_vm0, %v4211_v38 }
 0x527   : > { %v4482_v2 = vadd.f32 %v6472_v0, %v9448_v56  ;;  %v3870_v60 = vpop.permute.xlu0 %3869  ;;  %v4473_v37 = vpop.f32.mrb[3].mxu0  ;;  %v4983_v5 = vmax.f32 %v4479_v63, 0.0 }
 0x528   : > { %v4212_v15 = vpack.c.bf16 %v4140_v12, %v4139_v45  ;;  %v4474_v27 = vadd.f32 %v9448_v56, %v4473_v37  ;;  %v4981_v62 = vmax.f32 %v4471_v44, 0.0  ;;  %v4141_v54 = vadd.f32 %v3870_v60, %v3501_v13 }
 0x529   : > { %v4984_v18 = vmax.f32 %v4482_v2, 0.0  ;;  %v3872_v42 = vpop.permute.xlu1 %3871  ;;  %v3507_v45 = vmax.f32 %v9312_v61, 0.0  ;;  %v3508_v12 = vmax.f32 %v9319_v1, 0.0  ;;  %v3509_v61 = vmax.f32 %v9325_v55, 0.0 }
 0x52a   : > { %v4982_v51 = vmax.f32 %v4474_v27, 0.0  ;;  %v4142_v26 = vadd.f32 %v3872_v42, %v3502_v58  ;;  %6578 = vmatmul.mubr.msk.bf16.gmra.mrb[108].mxu0 %vm618_vm0, %v4212_v15 }
 0x52b   : > { %v9460_v17 = vpack.c.bf16 %v4984_v18, %v4983_v5  ;;  %v3874_v43 = vpop.permute.xlu0 %3873  ;;  %v3510_v5 = vmax.f32 %v9332_v29, 0.0 }
 0x52c   : > { %v9462_v23 = vpack.c.bf16 %v4982_v51, %v4981_v62  ;;  %v4213_v21 = vpack.c.bf16 %v4142_v26, %v4141_v54  ;;  %v4143_v28 = vadd.f32 %v3874_v43, %v3503_v46 }
 0x52d   : > { %v3876_v47 = vpop.permute.xlu1 %3875  ;;  %v6475_v32 = vpop.f32.mrb[4].mxu0 }
 0x52e   : > { %v4144_v48 = vadd.f32 %v3876_v47, %v3504_v34  ;;  %v4495_v36 = vadd.f32 %v6475_v32, %v9448_v56  ;;  %v4486_v40 = vpop.f32.mrb[5].mxu0  ;;  %6581 = vmatprep.mubr.msk.bf16.mxu0 %vm618_vm0, %v4213_v21  ;;  %v3511_v47 = vmax.f32 %v9338_v10, 0.0  ;;  %v3512_v32 = vmax.f32 %v9345_v41, 0.0 }
 0x52f   : > { %v4487_v14 = vadd.f32 %v9448_v56, %v4486_v40  ;;  %v3878_v19 = vpop.permute.xlu0 %3877  ;;  %v6476_v24 = vpop.f32.mrb[6].mxu0  ;;  %v3513_v10 = vmax.f32 %v9351_v9, 0.0 }
 0x530   : > { %v4214_v4 = vpack.c.bf16 %v4144_v48, %v4143_v28  ;;  %v4498_v25 = vadd.f32 %v6476_v24, %v9448_v56  ;;  %v4489_v50 = vpop.f32.mrb[7].mxu0  ;;  %v4987_v38 = vmax.f32 %v4495_v36, 0.0  ;;  %v4145_v7 = vadd.f32 %v3878_v19, %v3505_v31 }
 0x531   : > { %v4490_v33 = vadd.f32 %v9448_v56, %v4489_v50  ;;  %v3880_v22 = vpop.permute.xlu1 %3879  ;;  %v4985_v20 = vmax.f32 %v4487_v14, 0.0 }
 0x532   : > { %v4988_v8 = vmax.f32 %v4498_v25, 0.0  ;;  %v4146_v3 = vadd.f32 %v3880_v22, %v3506_v53  ;;  %6582 = vmatmul.mubr.msk.bf16.gmra.mrb[112].mxu0 %vm618_vm0, %v4214_v4  ;;  %v3514_v53 = vmax.f32 %v9358_v35, 0.0 }
 0x533   : > { %v4986_v63 = vmax.f32 %v4490_v33, 0.0  ;;  %v3882_v6 = vpop.permute.xlu0 %3881 }
 0x534   : > { %v9474_v52 = vpack.c.bf16 %v4988_v8, %v4987_v38  ;;  %v4215_v57 = vpack.c.bf16 %v4146_v3, %v4145_v7  ;;  %v4147_v2 = vadd.f32 %v3882_v6, %v3507_v45  ;;  %v3515_v45 = vmax.f32 %v9364_v59, 0.0 }
 0x535   : > { %v9478_v16 = vpack.c.bf16 %v4986_v63, %v4985_v20  ;;  %v3884_v44 = vpop.permute.xlu1 %3883  ;;  %v6479_v0 = vpop.f32.mrb[8].mxu0 }
 0x536   : > { %v4148_v60 = vadd.f32 %v3884_v44, %v3508_v12  ;;  %v4511_v37 = vadd.f32 %v6479_v0, %v9448_v56  ;;  %v4502_v15 = vpop.f32.mrb[9].mxu0  ;;  %6585 = vmatprep.mubr.msk.bf16.mxu0 %vm618_vm0, %v4215_v57  ;;  %v3516_v12 = vmax.f32 %v9371_v11, 0.0 }
 0x537   : > { %v4503_v39 = vadd.f32 %v9448_v56, %v4502_v15  ;;  %v3886_v13 = vpop.permute.xlu0 %3885  ;;  %v6480_v27 = vpop.f32.mrb[10].mxu0 }
 0x538   : > { %v4216_v49 = vpack.c.bf16 %v4148_v60, %v4147_v2  ;;  %v4514_v1 = vadd.f32 %v6480_v27, %v9448_v56  ;;  %v4505_v58 = vpop.f32.mrb[11].mxu0  ;;  %v4991_v62 = vmax.f32 %v4511_v37, 0.0  ;;  %v4149_v54 = vadd.f32 %v3886_v13, %v3509_v61 }
 0x539   : > { %v4506_v18 = vadd.f32 %v9448_v56, %v4505_v58  ;;  %v3888_v42 = vpop.permute.xlu1 %3887  ;;  %v4989_v43 = vmax.f32 %v4503_v39, 0.0 }
 0x53a   : > { %v4992_v51 = vmax.f32 %v4514_v1, 0.0  ;;  %v4150_v26 = vadd.f32 %v3888_v42, %v3510_v5  ;;  %6586 = vmatmul.mubr.msk.bf16.gmra.mrb[116].mxu0 %vm618_vm0, %v4216_v49 }
 0x53b   : > { %v4990_v21 = vmax.f32 %v4506_v18, 0.0  ;;  %v3890_v46 = vpop.permute.xlu0 %3889 }
 0x53c   : > { %v9488_v34 = vpack.c.bf16 %v4992_v51, %v4991_v62  ;;  %v4217_v55 = vpack.c.bf16 %v4150_v26, %v4149_v54  ;;  %v4151_v36 = vadd.f32 %v3890_v46, %v3511_v47 }
 0x53d   : > { %v9492_v29 = vpack.c.bf16 %v4990_v21, %v4989_v43  ;;  %v3892_v28 = vpop.permute.xlu1 %3891  ;;  %v6483_v48 = vpop.f32.mrb[12].mxu0  ;;  %v5189_v21 = vsel %vm5184_vm2, %v9462_v23, 0 }
 0x53e   : > { %v4152_v40 = vadd.f32 %v3892_v28, %v3512_v32  ;;  %v4527_v14 = vadd.f32 %v6483_v48, %v9448_v56  ;;  %v4518_v19 = vpop.f32.mrb[13].mxu0  ;;  %6589 = vmatprep.mubr.msk.bf16.mxu0 %vm618_vm0, %v4217_v55 }
 0x53f   : > { %v4519_v24 = vadd.f32 %v9448_v56, %v4518_v19  ;;  %v3894_v4 = vpop.permute.xlu0 %3893  ;;  %v6484_v31 = vpop.f32.mrb[14].mxu0 }
 0x540   : > { %v4218_v25 = vpack.c.bf16 %v4152_v40, %v4151_v36  ;;  %v4530_v41 = vadd.f32 %v6484_v31, %v9448_v56  ;;  %v4521_v50 = vpop.f32.mrb[15].mxu0  ;;  %v4995_v38 = vmax.f32 %v4527_v14, 0.0  ;;  %v4153_v7 = vadd.f32 %v3894_v4, %v3513_v10 }
 0x541   : > { %v4522_v33 = vadd.f32 %v9448_v56, %v4521_v50  ;;  %v3896_v22 = vpop.permute.xlu1 %3895  ;;  %v4993_v20 = vmax.f32 %v4519_v24, 0.0 }
 0x542   : > { %v4996_v8 = vmax.f32 %v4530_v41, 0.0  ;;  %v4154_v3 = vadd.f32 %v3896_v22, %v3514_v53  ;;  %6590 = vmatmul.mubr.msk.bf16.gmra.mrb[120].mxu0 %vm618_vm0, %v4218_v25  ;;  %v5192_v25 = vsel %vm5184_vm2, %v9460_v17, 0 }
 0x543   : > { %v4994_v63 = vmax.f32 %v4522_v33, 0.0  ;;  %v3898_v6 = vpop.permute.xlu0 %3897 }
 0x544   : > { %v9502_v57 = vpack.c.bf16 %v4996_v8, %v4995_v38  ;;  %v4219_v9 = vpack.c.bf16 %v4154_v3, %v4153_v7  ;;  %v4155_v2 = vadd.f32 %v3898_v6, %v3515_v45 }
 0x545   : > { %v9506_v35 = vpack.c.bf16 %v4994_v63, %v4993_v20  ;;  %v3900_v44 = vpop.permute.xlu1 %3899  ;;  %v6487_v0 = vpop.f32.mrb[16].mxu0 }
 0x546   : > { %v4156_v60 = vadd.f32 %v3900_v44, %v3516_v12  ;;  %v4543_v37 = vadd.f32 %v6487_v0, %v9448_v56  ;;  %v4534_v15 = vpop.f32.mrb[17].mxu0  ;;  %6593 = vmatprep.mubr.msk.bf16.mxu0 %vm618_vm0, %v4219_v9  ;;  %v5195_v9 = vsel %vm5184_vm2, %v9478_v16, 0  ;;  %v5174_v0 = vld [vmem:[#allocation2] sm:$0x1] }
 0x547   : > { %v4535_v39 = vadd.f32 %v9448_v56, %v4534_v15  ;;  %v6488_v13 = vpop.f32.mrb[18].mxu0  ;;  %5177 = vperm.xlu0 %6671, %v5174_v0  }
 0x548   : > { %v4220_v27 = vpack.c.bf16 %v4156_v60, %v4155_v2  ;;  %v4546_v49 = vadd.f32 %v6488_v13, %v9448_v56  ;;  %v4537_v59 = vpop.f32.mrb[19].mxu0  ;;  %v4999_v61 = vmax.f32 %v4543_v37, 0.0 }
 0x549   : > { %v4538_v11 = vadd.f32 %v9448_v56, %v4537_v59  ;;  %v4997_v58 = vmax.f32 %v4535_v39, 0.0 }
 0x54a   : > { %v5000_v1 = vmax.f32 %v4546_v49, 0.0  ;;  %6594 = vmatmul.mubr.msk.bf16.gmra.mrb[124].mxu0 %vm618_vm0, %v4220_v27 }
 0x54b   : > { %v4998_v5 = vmax.f32 %v4538_v11, 0.0 }
 0x54c   : > { %v5119_v18 = vpack.c.bf16 %v5000_v1, %v4999_v61  ;;  %v5198_v61 = vsel %vm5184_vm2, %v9474_v52, 0 }
 0x54d   : > { %v5118_v42 = vpack.c.bf16 %v4998_v5, %v4997_v58  ;;  %v6491_v62 = vpop.f32.mrb[20].mxu0 }
 0x54e   : > { %v4559_v54 = vadd.f32 %v6491_v62, %v9448_v56  ;;  %v4550_v51 = vpop.f32.mrb[21].mxu0 }
 0x54f   : > { %v4551_v26 = vadd.f32 %v9448_v56, %v4550_v51  ;;  %v6492_v43 = vpop.f32.mrb[22].mxu0  ;;  %6597 = vmatprep.subr.msk.bf16.mxu1 %vm5184_vm2, %v5118_v42 }
 0x550   : > { %v4562_v46 = vadd.f32 %v6492_v43, %v9448_v56  ;;  %v4553_v55 = vpop.f32.mrb[23].mxu0  ;;  %6114 = vmatpush3.bf16.xpose.msra.mxu1 %v5189_v21  ;;  %v5003_v32 = vmax.f32 %v4559_v54, 0.0 }
 0x551   : > { %v4554_v47 = vadd.f32 %v9448_v56, %v4553_v55  ;;  %6598 = vmatprep.subr.msk.bf16.mxu1 %vm5184_vm2, %v5119_v18  ;;  %v5001_v48 = vmax.f32 %v4551_v26, 0.0 }
 0x552   : > { %v5004_v28 = vmax.f32 %v4562_v46, 0.0 }
 0x553   : > { %v5002_v36 = vmax.f32 %v4554_v47, 0.0  ;;  %v5201_v47 = vsel %vm5184_vm2, %v9492_v29, 0 }
 0x554   : > { %v5121_v40 = vpack.c.bf16 %v5004_v28, %v5003_v32 }
 0x555   : > { %v5120_v14 = vpack.c.bf16 %v5002_v36, %v5001_v48  ;;  %v6495_v19 = vpop.f32.mrb[24].mxu0 }
 0x556   : > { %v4575_v24 = vadd.f32 %v6495_v19, %v9448_v56  ;;  %v4566_v4 = vpop.f32.mrb[25].mxu0 }
 0x557   : > { %v4567_v23 = vadd.f32 %v9448_v56, %v4566_v4  ;;  %v6496_v31 = vpop.f32.mrb[26].mxu0 }
 0x558   : > { %v4578_v10 = vadd.f32 %v6496_v31, %v9448_v56  ;;  %v4569_v41 = vpop.f32.mrb[27].mxu0  ;;  %6116 = vmatpush3.bf16.xpose.msra.mxu1 %v5192_v25  ;;  %v5007_v53 = vmax.f32 %v4575_v24, 0.0 }
 0x559   : > { %v4570_v50 = vadd.f32 %v9448_v56, %v4569_v41  ;;  %6599 = vmatprep.subr.msk.bf16.mxu1 %vm5184_vm2, %v5120_v14  ;;  %v5005_v22 = vmax.f32 %v4567_v23, 0.0  ;;  %v5204_v41 = vsel %vm5184_vm2, %v9488_v34, 0 }
 0x55a   : > { %v5008_v33 = vmax.f32 %v4578_v10, 0.0 }
 0x55b   : > { %v5006_v38 = vmax.f32 %v4570_v50, 0.0 }
 0x55c   : > { %v5123_v7 = vpack.c.bf16 %v5008_v33, %v5007_v53 }
 0x55d   : > { %v5122_v8 = vpack.c.bf16 %v5006_v38, %v5005_v22  ;;  %v6499_v3 = vpop.f32.mrb[28].mxu0 }
 0x55e   : > { %v4591_v20 = vadd.f32 %v6499_v3, %v9448_v56  ;;  %v4582_v63 = vpop.f32.mrb[29].mxu0 }
 0x55f   : > { %v4583_v17 = vadd.f32 %v9448_v56, %v4582_v63  ;;  %v6500_v6 = vpop.f32.mrb[30].mxu0 }
 0x560   : > { %v4594_v45 = vadd.f32 %v6500_v6, %v9448_v56  ;;  %v4585_v12 = vpop.f32.mrb[31].mxu0  ;;  %6118 = vmatpush3.bf16.xpose.msra.mxu1 %v5195_v9  ;;  %v5011_v2 = vmax.f32 %v4591_v20, 0.0 }
 0x561   : > { %v4586_v44 = vadd.f32 %v9448_v56, %v4585_v12  ;;  %6600 = vmatprep.subr.msk.bf16.mxu1 %vm5184_vm2, %v5121_v40  ;;  %v5009_v37 = vmax.f32 %v4583_v17, 0.0 }
 0x562   : > { %v5012_v60 = vmax.f32 %v4594_v45, 0.0  ;;  %v5207_v45 = vsel %vm5184_vm2, %v9506_v35, 0 }
 0x563   : > { %v5010_v15 = vmax.f32 %v4586_v44, 0.0 }
 0x564   : > { %v9536_v39 = vpack.c.bf16 %v5012_v60, %v5011_v2 }
 0x565   : > { %v5124_v13 = vpack.c.bf16 %v5010_v15, %v5009_v37  ;;  %v6503_v27 = vpop.f32.mrb[32].mxu0 }
 0x566   : > { %v4607_v16 = vadd.f32 %v6503_v27, %v9448_v56  ;;  %v4598_v49 = vpop.f32.mrb[33].mxu0 }
 0x567   : > { %v4599_v59 = vadd.f32 %v9448_v56, %v4598_v49  ;;  %v6504_v11 = vpop.f32.mrb[34].mxu0 }
 0x568   : > { %v4610_v1 = vadd.f32 %v6504_v11, %v9448_v56  ;;  %v4601_v58 = vpop.f32.mrb[35].mxu0  ;;  %6120 = vmatpush3.bf16.xpose.msra.mxu1 %v5198_v61  ;;  %v5015_v18 = vmax.f32 %v4607_v16, 0.0  ;;  %v5210_v61 = vsel %vm5184_vm2, %v9502_v57, 0 }
 0x569   : > { %v4602_v5 = vadd.f32 %v9448_v56, %v4601_v58  ;;  %6601 = vmatprep.subr.msk.bf16.mxu1 %vm5184_vm2, %v5122_v8  ;;  %v5013_v62 = vmax.f32 %v4599_v59, 0.0 }
 0x56a   : > { %v5016_v42 = vmax.f32 %v4610_v1, 0.0 }
 0x56b   : > { %v5014_v54 = vmax.f32 %v4602_v5, 0.0 }
 0x56c   : > { %v9545_v51 = vpack.c.bf16 %v5016_v42, %v5015_v18 }
 0x56d   : > { %v9547_v26 = vpack.c.bf16 %v5014_v54, %v5013_v62  ;;  %v6507_v43 = vpop.f32.mrb[36].mxu0 }
 0x56e   : > { %v4623_v21 = vadd.f32 %v6507_v43, %v9448_v56  ;;  %v4614_v52 = vpop.f32.mrb[37].mxu0 }
 0x56f   : > { %v4615_v46 = vadd.f32 %v9448_v56, %v4614_v52  ;;  %v6508_v55 = vpop.f32.mrb[38].mxu0  ;;  %v5237_v57 = vsel %vm5184_vm2, %v9547_v26, 0 }
 0x570   : > { %v4626_v32 = vadd.f32 %v6508_v55, %v9448_v56  ;;  %v4617_v28 = vpop.f32.mrb[39].mxu0  ;;  %6122 = vmatpush3.bf16.xpose.msra.mxu1 %v5201_v47  ;;  %v5019_v36 = vmax.f32 %v4623_v21, 0.0 }
 0x571   : > { %v4618_v48 = vadd.f32 %v9448_v56, %v4617_v28  ;;  %6602 = vmatprep.subr.msk.bf16.mxu1 %vm5184_vm2, %v5123_v7  ;;  %v5017_v14 = vmax.f32 %v4615_v46, 0.0 }
 0x572   : > { %v5020_v40 = vmax.f32 %v4626_v32, 0.0 }
 0x573   : > { %v5018_v19 = vmax.f32 %v4618_v48, 0.0 }
 0x574   : > { %v9556_v24 = vpack.c.bf16 %v5020_v40, %v5019_v36 }
 0x575   : > { %v9558_v4 = vpack.c.bf16 %v5018_v19, %v5017_v14  ;;  %v6511_v23 = vpop.f32.mrb[40].mxu0 }
 0x576   : > { %v4639_v31 = vadd.f32 %v6511_v23, %v9448_v56  ;;  %v4630_v29 = vpop.f32.mrb[41].mxu0 }
 0x577   : > { %v4631_v25 = vadd.f32 %v9448_v56, %v4630_v29  ;;  %v6512_v10 = vpop.f32.mrb[42].mxu0 }
 0x578   : > { %v4642_v50 = vadd.f32 %v6512_v10, %v9448_v56  ;;  %v4633_v53 = vpop.f32.mrb[43].mxu0  ;;  %6124 = vmatpush3.bf16.xpose.msra.mxu1 %v5204_v41  ;;  %v5023_v22 = vmax.f32 %v4639_v31, 0.0 }
 0x579   : > { %v4634_v33 = vadd.f32 %v9448_v56, %v4633_v53  ;;  %6603 = vmatprep.subr.msk.bf16.mxu1 %vm5184_vm2, %v5124_v13  ;;  %v5021_v7 = vmax.f32 %v4631_v25, 0.0 }
 0x57a   : > { %v5024_v38 = vmax.f32 %v4642_v50, 0.0  ;;  %v5240_v50 = vsel %vm5184_vm2, %v9545_v51, 0 }
 0x57b   : > { %v5022_v8 = vmax.f32 %v4634_v33, 0.0 }
 0x57c   : > { %v9567_v3 = vpack.c.bf16 %v5024_v38, %v5023_v22 }
 0x57d   : > { %v9569_v20 = vpack.c.bf16 %v5022_v8, %v5021_v7  ;;  %v6515_v63 = vpop.f32.mrb[44].mxu0 }
 0x57e   : > { %v4655_v17 = vadd.f32 %v6515_v63, %v9448_v56  ;;  %v4646_v34 = vpop.f32.mrb[45].mxu0 }
 0x57f   : > { %v4647_v6 = vadd.f32 %v9448_v56, %v4646_v34  ;;  %v6516_v9 = vpop.f32.mrb[46].mxu0 }
 0x580   : > { %v4658_v12 = vadd.f32 %v6516_v9, %v9448_v56  ;;  %v4649_v44 = vpop.f32.mrb[47].mxu0  ;;  %6126 = vmatpush3.bf16.xpose.msra.mxu1 %v5207_v45  ;;  %v5027_v2 = vmax.f32 %v4655_v17, 0.0 }
 0x581   : > { %v4650_v0 = vadd.f32 %v9448_v56, %v4649_v44  ;;  %6604 = vmatprep.subr.msk.bf16.mxu1 %vm5184_vm2, %v9536_v39  ;;  %v5025_v37 = vmax.f32 %v4647_v6, 0.0  ;;  %v5243_v44 = vsel %vm5184_vm2, %v9558_v4, 0 }
 0x582   : > { %v5028_v60 = vmax.f32 %v4658_v12, 0.0 }
 0x583   : > { %v5026_v15 = vmax.f32 %v4650_v0, 0.0 }
 0x584   : > { %v9579_v13 = vpack.c.bf16 %v5028_v60, %v5027_v2 }
 0x585   : > { %v9581_v27 = vpack.c.bf16 %v5026_v15, %v5025_v37  ;;  %v6519_v16 = vpop.f32.mrb[48].mxu0 }
 0x586   : > { %v4671_v35 = vadd.f32 %v6519_v16, %v9448_v56  ;;  %v4662_v49 = vpop.f32.mrb[49].mxu0 }
 0x587   : > { %v4663_v59 = vadd.f32 %v9448_v56, %v4662_v49  ;;  %v6520_v11 = vpop.f32.mrb[50].mxu0 }
 0x588   : > { %v4674_v39 = vadd.f32 %v6520_v11, %v9448_v56  ;;  %v4665_v1 = vpop.f32.mrb[51].mxu0  ;;  %6128 = vmatpush3.bf16.xpose.msra.mxu1 %v5210_v61  ;;  %v5031_v5 = vmax.f32 %v4671_v35, 0.0 }
 0x589   : > { %v4666_v58 = vadd.f32 %v9448_v56, %v4665_v1  ;;  %v5029_v42 = vmax.f32 %v4663_v59, 0.0 }
 0x58a   : > { %v5032_v18 = vmax.f32 %v4674_v39, 0.0 }
 0x58b   : > { %v5030_v62 = vmax.f32 %v4666_v58, 0.0  ;;  %v5246_v58 = vsel %vm5184_vm2, %v9556_v24, 0 }
 0x58c   : > { %v5135_v54 = vpack.c.bf16 %v5032_v18, %v5031_v5 }
 0x58d   : > { %v5134_v43 = vpack.c.bf16 %v5030_v62, %v5029_v42  ;;  %v6523_v21 = vpop.f32.mrb[52].mxu0 }
 0x58e   : > { %v4687_v52 = vadd.f32 %v6523_v21, %v9448_v56  ;;  %v4678_v46 = vpop.f32.mrb[53].mxu0 }
 0x58f   : > { %v4679_v55 = vadd.f32 %v9448_v56, %v4678_v46  ;;  %v6524_v47 = vpop.f32.mrb[54].mxu0  ;;  %6605 = vmatprep.subr.msk.bf16.mxu1 %vm5184_vm2, %v5134_v43  ;;  %6130 = vmatmul.mubr.msk.bf16.vlgmr.msra.gmra.mrb[0].mxu1 %vm5184_vm2, %v9425_v30 }
 0x590   : > { %v4690_v32 = vadd.f32 %v6524_v47, %v9448_v56  ;;  %v4681_v28 = vpop.f32.mrb[55].mxu0  ;;  %6132 = vmatpush3.bf16.xpose.msra.mxu1 %v5237_v57  ;;  %6147 = vmatprep.mubr.msk.bf16.mxu1 %vm5184_vm2, %v9425_v30  ;;  %v5035_v36 = vmax.f32 %v4687_v52, 0.0 }
 0x591   : > { %v4682_v48 = vadd.f32 %v9448_v56, %v4681_v28  ;;  %6606 = vmatprep.subr.msk.bf16.mxu1 %vm5184_vm2, %v5135_v54  ;;  %v5033_v14 = vmax.f32 %v4679_v55, 0.0  ;;  %v5249_v28 = vsel %vm5184_vm2, %v9569_v20, 0 }
 0x592   : > { %v5036_v40 = vmax.f32 %v4690_v32, 0.0 }
 0x593   : > { %v5034_v19 = vmax.f32 %v4682_v48, 0.0 }
 0x594   : > { %v5137_v23 = vpack.c.bf16 %v5036_v40, %v5035_v36 }
 0x595   : > { %v5136_v31 = vpack.c.bf16 %v5034_v19, %v5033_v14  ;;  %v6527_v29 = vpop.f32.mrb[56].mxu0 }
 0x596   : > { %v4703_v26 = vadd.f32 %v6527_v29, %v9448_v56  ;;  %v4694_v25 = vpop.f32.mrb[57].mxu0 }
 0x597   : > { %v4695_v10 = vadd.f32 %v9448_v56, %v4694_v25  ;;  %v6528_v41 = vpop.f32.mrb[58].mxu0 }
 0x598   : > { %v4706_v53 = vadd.f32 %v6528_v41, %v9448_v56  ;;  %v4697_v33 = vpop.f32.mrb[59].mxu0  ;;  %6134 = vmatpush3.bf16.xpose.msra.mxu1 %v5240_v50  ;;  %v5039_v38 = vmax.f32 %v4703_v26, 0.0 }
 0x599   : > { %v4698_v22 = vadd.f32 %v9448_v56, %v4697_v33  ;;  %6607 = vmatprep.subr.msk.bf16.mxu1 %vm5184_vm2, %v5136_v31  ;;  %v5037_v8 = vmax.f32 %v4695_v10, 0.0 }
 0x59a   : > { %v5040_v7 = vmax.f32 %v4706_v53, 0.0  ;;  %v5252_v53 = vsel %vm5184_vm2, %v9567_v3, 0 }
 0x59b   : > { %v5038_v63 = vmax.f32 %v4698_v22, 0.0 }
 0x59c   : > { %v5139_v17 = vpack.c.bf16 %v5040_v7, %v5039_v38 }
 0x59d   : > { %v5138_v34 = vpack.c.bf16 %v5038_v63, %v5037_v8  ;;  %v6531_v6 = vpop.f32.mrb[60].mxu0 }
 0x59e   : > { %v4719_v9 = vadd.f32 %v6531_v6, %v9448_v56  ;;  %v4710_v45 = vpop.f32.mrb[61].mxu0 }
 0x59f   : > { %v4711_v51 = vadd.f32 %v9448_v56, %v4710_v45  ;;  %v6532_v12 = vpop.f32.mrb[62].mxu0 }
 0x5a0   : > { %v4722_v0 = vadd.f32 %v6532_v12, %v9448_v56  ;;  %v4713_v2 = vpop.f32.mrb[63].mxu0  ;;  %6136 = vmatpush3.bf16.xpose.msra.mxu1 %v5243_v44  ;;  %v5043_v37 = vmax.f32 %v4719_v9, 0.0  ;;  %v5255_v44 = vsel %vm5184_vm2, %v9581_v27, 0 }
 0x5a1   : > { %v4714_v60 = vadd.f32 %v9448_v56, %v4713_v2  ;;  %6608 = vmatprep.subr.msk.bf16.mxu1 %vm5184_vm2, %v5137_v23  ;;  %v5041_v16 = vmax.f32 %v4711_v51, 0.0 }
 0x5a2   : > { %v5044_v15 = vmax.f32 %v4722_v0, 0.0 }
 0x5a3   : > { %v5042_v35 = vmax.f32 %v4714_v60, 0.0 }
 0x5a4   : > { %v9615_v49 = vpack.c.bf16 %v5044_v15, %v5043_v37 }
 0x5a5   : > { %v5140_v59 = vpack.c.bf16 %v5042_v35, %v5041_v16  ;;  %v6535_v11 = vpop.f32.mrb[64].mxu0 }
 0x5a6   : > { %v4735_v61 = vadd.f32 %v6535_v11, %v9448_v56  ;;  %v4726_v39 = vpop.f32.mrb[65].mxu0 }
 0x5a7   : > { %v4727_v4 = vadd.f32 %v9448_v56, %v4726_v39  ;;  %v6536_v1 = vpop.f32.mrb[66].mxu0 }
 0x5a8   : > { %v4738_v5 = vadd.f32 %v6536_v1, %v9448_v56  ;;  %v4729_v18 = vpop.f32.mrb[67].mxu0  ;;  %6138 = vmatpush3.bf16.xpose.msra.mxu1 %v5246_v58  ;;  %v5047_v62 = vmax.f32 %v4735_v61, 0.0  ;;  %v5258_v58 = vsel %vm5184_vm2, %v9579_v13, 0 }
 0x5a9   : > { %v4730_v42 = vadd.f32 %v9448_v56, %v4729_v18  ;;  %6609 = vmatprep.subr.msk.bf16.mxu1 %vm5184_vm2, %v5138_v34  ;;  %v5045_v43 = vmax.f32 %v4727_v4, 0.0 }
 0x5aa   : > { %v5048_v54 = vmax.f32 %v4738_v5, 0.0 }
 0x5ab   : > { %v5046_v21 = vmax.f32 %v4730_v42, 0.0 }
 0x5ac   : > { %v9624_v52 = vpack.c.bf16 %v5048_v54, %v5047_v62 }
 0x5ad   : > { %v9626_v46 = vpack.c.bf16 %v5046_v21, %v5045_v43  ;;  %v6539_v55 = vpop.f32.mrb[68].mxu0 }
 0x5ae   : > { %v4751_v47 = vadd.f32 %v6539_v55, %v9448_v56  ;;  %v4742_v24 = vpop.f32.mrb[69].mxu0 }
 0x5af   : > { %v4743_v57 = vadd.f32 %v9448_v56, %v4742_v24  ;;  %v6540_v32 = vpop.f32.mrb[70].mxu0  ;;  %v5285_v13 = vsel %vm5184_vm2, %v9626_v46, 0 }
 0x5b0   : > { %v4754_v48 = vadd.f32 %v6540_v32, %v9448_v56  ;;  %v4745_v36 = vpop.f32.mrb[71].mxu0  ;;  %6140 = vmatpush3.bf16.xpose.msra.mxu1 %v5249_v28  ;;  %v5051_v14 = vmax.f32 %v4751_v47, 0.0 }
 0x5b1   : > { %v4746_v40 = vadd.f32 %v9448_v56, %v4745_v36  ;;  %6610 = vmatprep.subr.msk.bf16.mxu1 %vm5184_vm2, %v5139_v17  ;;  %v5049_v23 = vmax.f32 %v4743_v57, 0.0 }
 0x5b2   : > { %v5052_v19 = vmax.f32 %v4754_v48, 0.0 }
 0x5b3   : > { %v5050_v31 = vmax.f32 %v4746_v40, 0.0 }
 0x5b4   : > { %v9635_v29 = vpack.c.bf16 %v5052_v19, %v5051_v14 }
 0x5b5   : > { %v9637_v26 = vpack.c.bf16 %v5050_v31, %v5049_v23  ;;  %v6543_v25 = vpop.f32.mrb[72].mxu0 }
 0x5b6   : > { %v4767_v10 = vadd.f32 %v6543_v25, %v9448_v56  ;;  %v4758_v20 = vpop.f32.mrb[73].mxu0 }
 0x5b7   : > { %v4759_v41 = vadd.f32 %v9448_v56, %v4758_v20  ;;  %v6544_v50 = vpop.f32.mrb[74].mxu0 }
 0x5b8   : > { %v4770_v33 = vadd.f32 %v6544_v50, %v9448_v56  ;;  %v4761_v22 = vpop.f32.mrb[75].mxu0  ;;  %6142 = vmatpush3.bf16.xpose.msra.mxu1 %v5252_v53  ;;  %v5055_v7 = vmax.f32 %v4767_v10, 0.0 }
 0x5b9   : > { %v4762_v38 = vadd.f32 %v9448_v56, %v4761_v22  ;;  %6611 = vmatprep.subr.msk.bf16.mxu1 %vm5184_vm2, %v5140_v59  ;;  %v5053_v63 = vmax.f32 %v4759_v41, 0.0 }
 0x5ba   : > { %v5056_v8 = vmax.f32 %v4770_v33, 0.0 }
 0x5bb   : > { %v5054_v17 = vmax.f32 %v4762_v38, 0.0 }
 0x5bc   : > { %v9646_v34 = vpack.c.bf16 %v5056_v8, %v5055_v7 }
 0x5bd   : > { %v9648_v6 = vpack.c.bf16 %v5054_v17, %v5053_v63  ;;  %v6547_v9 = vpop.f32.mrb[76].mxu0 }
 0x5be   : > { %v4783_v45 = vadd.f32 %v6547_v9, %v9448_v56  ;;  %v4774_v3 = vpop.f32.mrb[77].mxu0 }
 0x5bf   : > { %v4775_v51 = vadd.f32 %v9448_v56, %v4774_v3  ;;  %v6548_v12 = vpop.f32.mrb[78].mxu0 }
 0x5c0   : > { %v4786_v0 = vadd.f32 %v6548_v12, %v9448_v56  ;;  %v4777_v2 = vpop.f32.mrb[79].mxu0  ;;  %6144 = vmatpush3.bf16.xpose.msra.mxu1 %v5255_v44  ;;  %v5059_v37 = vmax.f32 %v4783_v45, 0.0 }
 0x5c1   : > { %v4778_v60 = vadd.f32 %v9448_v56, %v4777_v2  ;;  %6612 = vmatprep.subr.msk.bf16.mxu1 %vm5184_vm2, %v9615_v49  ;;  %v5057_v16 = vmax.f32 %v4775_v51, 0.0 }
 0x5c2   : > { %v5060_v15 = vmax.f32 %v4786_v0, 0.0  ;;  %v5291_v0 = vsel %vm5184_vm2, %v9637_v26, 0 }
 0x5c3   : > { %v5058_v35 = vmax.f32 %v4778_v60, 0.0 }
 0x5c4   : > { %v9658_v59 = vpack.c.bf16 %v5060_v15, %v5059_v37 }
 0x5c5   : > { %v9660_v11 = vpack.c.bf16 %v5058_v35, %v5057_v16  ;;  %v6551_v61 = vpop.f32.mrb[80].mxu0 }
 0x5c6   : > { %v4799_v27 = vadd.f32 %v6551_v61, %v9448_v56  ;;  %v4790_v39 = vpop.f32.mrb[81].mxu0 }
 0x5c7   : > { %v4791_v4 = vadd.f32 %v9448_v56, %v4790_v39  ;;  %v6552_v1 = vpop.f32.mrb[82].mxu0 }
 0x5c8   : > { %v4802_v49 = vadd.f32 %v6552_v1, %v9448_v56  ;;  %v4793_v5 = vpop.f32.mrb[83].mxu0  ;;  %6146 = vmatpush3.bf16.xpose.msra.mxu1 %v5258_v58  ;;  %v5063_v42 = vmax.f32 %v4799_v27, 0.0 }
 0x5c9   : > { %v4794_v18 = vadd.f32 %v9448_v56, %v4793_v5  ;;  %v5061_v54 = vmax.f32 %v4791_v4, 0.0  ;;  %v5294_v5 = vsel %vm5184_vm2, %v9635_v29, 0 }
 0x5ca   : > { %v5064_v62 = vmax.f32 %v4802_v49, 0.0 }
 0x5cb   : > { %v5062_v43 = vmax.f32 %v4794_v18, 0.0 }
 0x5cc   : > { %v5151_v21 = vpack.c.bf16 %v5064_v62, %v5063_v42 }
 0x5cd   : > { %v5150_v55 = vpack.c.bf16 %v5062_v43, %v5061_v54  ;;  %v6555_v47 = vpop.f32.mrb[84].mxu0 }
 0x5ce   : > { %v4815_v24 = vadd.f32 %v6555_v47, %v9448_v56  ;;  %v4806_v57 = vpop.f32.mrb[85].mxu0 }
 0x5cf   : > { %v4807_v32 = vadd.f32 %v9448_v56, %v4806_v57  ;;  %v6556_v28 = vpop.f32.mrb[86].mxu0  ;;  %6613 = vmatprep.subr.msk.bf16.mxu1 %vm5184_vm2, %v5150_v55  ;;  %6148 = vmatmul.mubr.msk.bf16.vlgmr.msra.gmra.mrb[4].mxu1 %vm5184_vm2, %v9425_v30 }
 0x5d0   : > { %v4818_v48 = vadd.f32 %v6556_v28, %v9448_v56  ;;  %v4809_v36 = vpop.f32.mrb[87].mxu0  ;;  %6150 = vmatpush3.bf16.xpose.msra.mxu1 %v5285_v13  ;;  %6165 = vmatprep.mubr.msk.bf16.mxu1 %vm5184_vm2, %v9425_v30  ;;  %v5067_v14 = vmax.f32 %v4815_v24, 0.0  ;;  %v5288_v30 = vsel %vm5184_vm2, %v9624_v52, 0 }
 0x5d1   : > { %v4810_v40 = vadd.f32 %v9448_v56, %v4809_v36  ;;  %6614 = vmatprep.subr.msk.bf16.mxu1 %vm5184_vm2, %v5151_v21  ;;  %v5065_v23 = vmax.f32 %v4807_v32, 0.0 }
 0x5d2   : > { %v5068_v19 = vmax.f32 %v4818_v48, 0.0  ;;  %v5297_v48 = vsel %vm5184_vm2, %v9648_v6, 0 }
 0x5d3   : > { %v5066_v31 = vmax.f32 %v4810_v40, 0.0 }
 0x5d4   : > { %v5153_v25 = vpack.c.bf16 %v5068_v19, %v5067_v14 }
 0x5d5   : > { %v5152_v10 = vpack.c.bf16 %v5066_v31, %v5065_v23  ;;  %v6559_v20 = vpop.f32.mrb[88].mxu0 }
 0x5d6   : > { %v4831_v46 = vadd.f32 %v6559_v20, %v9448_v56  ;;  %v4822_v41 = vpop.f32.mrb[89].mxu0 }
 0x5d7   : > { %v4823_v50 = vadd.f32 %v9448_v56, %v4822_v41  ;;  %v6560_v53 = vpop.f32.mrb[90].mxu0 }
 0x5d8   : > { %v4834_v33 = vadd.f32 %v6560_v53, %v9448_v56  ;;  %v4825_v22 = vpop.f32.mrb[91].mxu0  ;;  %6152 = vmatpush3.bf16.xpose.msra.mxu1 %v5288_v30  ;;  %v5071_v7 = vmax.f32 %v4831_v46, 0.0 }
 0x5d9   : > { %v4826_v38 = vadd.f32 %v9448_v56, %v4825_v22  ;;  %6615 = vmatprep.subr.msk.bf16.mxu1 %vm5184_vm2, %v5152_v10  ;;  %v5069_v63 = vmax.f32 %v4823_v50, 0.0  ;;  %v9722_v50 = vld [vmem:[%s9857_s8] ss:$0 sm:$0xff] }
 0x5da   : > { %v5072_v8 = vmax.f32 %v4834_v33, 0.0  ;;  %v5300_v33 = vsel %vm5184_vm2, %v9646_v34, 0 }
 0x5db   : > { %v5070_v17 = vmax.f32 %v4826_v38, 0.0 }
 0x5dc   : > { %v5155_v9 = vpack.c.bf16 %v5072_v8, %v5071_v7 }
 0x5dd   : > { %v5154_v45 = vpack.c.bf16 %v5070_v17, %v5069_v63  ;;  %v6563_v3 = vpop.f32.mrb[92].mxu0 }
 0x5de   : > { %v4847_v51 = vadd.f32 %v6563_v3, %v9448_v56  ;;  %v4838_v12 = vpop.f32.mrb[93].mxu0 }
 0x5df   : > { %v4839_v52 = vadd.f32 %v9448_v56, %v4838_v12  ;;  %v6564_v44 = vpop.f32.mrb[94].mxu0 }
 0x5e0   : > { %v4850_v2 = vadd.f32 %v6564_v44, %v9448_v56  ;;  %v4841_v60 = vpop.f32.mrb[95].mxu0  ;;  %6154 = vmatpush3.bf16.xpose.msra.mxu1 %v5291_v0  ;;  %v5075_v15 = vmax.f32 %v4847_v51, 0.0  ;;  %v5303_v44 = vsel %vm5184_vm2, %v9660_v11, 0 }
 0x5e1   : > { %v4842_v37 = vadd.f32 %v9448_v56, %v4841_v60  ;;  %6616 = vmatprep.subr.msk.bf16.mxu1 %vm5184_vm2, %v5153_v25  ;;  %v5073_v35 = vmax.f32 %v4839_v52, 0.0 }
 0x5e2   : > { %v5076_v16 = vmax.f32 %v4850_v2, 0.0 }
 0x5e3   : > { %v5074_v61 = vmax.f32 %v4842_v37, 0.0 }
 0x5e4   : > { %v9694_v27 = vpack.c.bf16 %v5076_v16, %v5075_v15 }
 0x5e5   : > { %v5156_v39 = vpack.c.bf16 %v5074_v61, %v5073_v35  ;;  %v6567_v4 = vpop.f32.mrb[96].mxu0 }
 0x5e6   : > { %v4863_v1 = vadd.f32 %v6567_v4, %v9448_v56  ;;  %v4854_v58 = vpop.f32.mrb[97].mxu0 }
 0x5e7   : > { %v4855_v26 = vadd.f32 %v9448_v56, %v4854_v58  ;;  %v6568_v49 = vpop.f32.mrb[98].mxu0 }
 0x5e8   : > { %v4866_v18 = vadd.f32 %v6568_v49, %v9448_v56  ;;  %v4857_v42 = vpop.f32.mrb[99].mxu0  ;;  %6156 = vmatpush3.bf16.xpose.msra.mxu1 %v5294_v5  ;;  %v5079_v54 = vmax.f32 %v4863_v1, 0.0  ;;  %v5306_v49 = vsel %vm5184_vm2, %v9658_v59, 0  ;;  %v9758_v59 = vld [vmem:[%s9858_s9] sm:$0x1] }
 0x5e9   : > { %v4858_v62 = vadd.f32 %v9448_v56, %v4857_v42  ;;  %6617 = vmatprep.subr.msk.bf16.mxu1 %vm5184_vm2, %v5154_v45  ;;  %v5077_v21 = vmax.f32 %v4855_v26, 0.0 }
 0x5ea   : > { %v5080_v43 = vmax.f32 %v4866_v18, 0.0 }
 0x5eb   : > { %v5078_v55 = vmax.f32 %v4858_v62, 0.0 }
 0x5ec   : > { %v9703_v47 = vpack.c.bf16 %v5080_v43, %v5079_v54 }
 0x5ed   : > { %v9705_v24 = vpack.c.bf16 %v5078_v55, %v5077_v21  ;;  %v6571_v57 = vpop.f32.mrb[100].mxu0 }
 0x5ee   : > { %v4879_v32 = vadd.f32 %v6571_v57, %v9448_v56  ;;  %v4870_v29 = vpop.f32.mrb[101].mxu0 }
 0x5ef   : > { %v4871_v28 = vadd.f32 %v9448_v56, %v4870_v29  ;;  %v6572_v13 = vpop.f32.mrb[102].mxu0 }
 0x5f0   : > { %v4882_v36 = vadd.f32 %v6572_v13, %v9448_v56  ;;  %v4873_v40 = vpop.f32.mrb[103].mxu0  ;;  %6158 = vmatpush3.bf16.xpose.msra.mxu1 %v5297_v48  ;;  %v5083_v19 = vmax.f32 %v4879_v32, 0.0  ;;  %v5333_v48 = vsel %vm5184_vm2, %v9705_v24, 0 }
 0x5f1   : > { %v4874_v14 = vadd.f32 %v9448_v56, %v4873_v40  ;;  %6618 = vmatprep.subr.msk.bf16.mxu1 %vm5184_vm2, %v5155_v9  ;;  %v5081_v31 = vmax.f32 %v4871_v28, 0.0 }
 0x5f2   : > { %v5084_v23 = vmax.f32 %v4882_v36, 0.0 }
 0x5f3   : > { %v5082_v25 = vmax.f32 %v4874_v14, 0.0 }
 0x5f4   : > { %v9714_v10 = vpack.c.bf16 %v5084_v23, %v5083_v19 }
 0x5f5   : > { %v9716_v20 = vpack.c.bf16 %v5082_v25, %v5081_v31  ;;  %v6575_v46 = vpop.f32.mrb[104].mxu0 }
 0x5f6   : > { %v4895_v41 = vadd.f32 %v6575_v46, %v9448_v56  ;;  %v4886_v6 = vpop.f32.mrb[105].mxu0 }
 0x5f7   : > { %v4887_v53 = vadd.f32 %v9722_v50, %v4886_v6  ;;  %v6576_v30 = vpop.f32.mrb[106].mxu0 }
 0x5f8   : > { %v4898_v22 = vadd.f32 %v9722_v50, %v6576_v30  ;;  %v4889_v38 = vpop.f32.mrb[107].mxu0  ;;  %6160 = vmatpush3.bf16.xpose.msra.mxu1 %v5300_v33  ;;  %v5087_v56 = vmax.f32 %v4895_v41, 0.0 }
 0x5f9   : > { %v4890_v7 = vadd.f32 %v9722_v50, %v4889_v38  ;;  %6619 = vmatprep.subr.msk.bf16.mxu1 %vm5184_vm2, %v5156_v39  ;;  %v5085_v63 = vmax.f32 %v4887_v53, 0.0 }
 0x5fa   : > { %v5088_v8 = vmax.f32 %v4898_v22, 0.0  ;;  %v5336_v22 = vsel %vm5184_vm2, %v9703_v47, 0 }
 0x5fb   : > { %v5086_v17 = vmax.f32 %v4890_v7, 0.0 }
 0x5fc   : > { %v9730_v9 = vpack.c.bf16 %v5088_v8, %v5087_v56 }
 0x5fd   : > { %v9732_v45 = vpack.c.bf16 %v5086_v17, %v5085_v63  ;;  %v6579_v3 = vpop.f32.mrb[108].mxu0 }
 0x5fe   : > { %v4911_v51 = vadd.f32 %v9722_v50, %v6579_v3  ;;  %v4902_v34 = vpop.f32.mrb[109].mxu0 }
 0x5ff   : > { %v4903_v12 = vadd.f32 %v9722_v50, %v4902_v34  ;;  %v6580_v52 = vpop.f32.mrb[110].mxu0 }
 0x600   : > { %v4914_v0 = vadd.f32 %v9722_v50, %v6580_v52  ;;  %v4905_v2 = vpop.f32.mrb[111].mxu0  ;;  %6162 = vmatpush3.bf16.xpose.msra.mxu1 %v5303_v44  ;;  %v5091_v37 = vmax.f32 %v4911_v51, 0.0 }
 0x601   : > { %v4906_v60 = vadd.f32 %v9722_v50, %v4905_v2  ;;  %6620 = vmatprep.subr.msk.bf16.mxu1 %vm5184_vm2, %v9694_v27  ;;  %v5089_v16 = vmax.f32 %v4903_v12, 0.0  ;;  %v5339_v2 = vsel %vm5184_vm2, %v9716_v20, 0  ;;  %v5345_v20 = vsel %vm5184_vm2, %v9732_v45, 0  ;;  %v5178_v45 = vpop.permute.xlu0 %5177 }
 0x602   : > { %v5092_v15 = vmax.f32 %v4914_v0, 0.0 }
 0x603   : > { %v5090_v35 = vmax.f32 %v4906_v60, 0.0 }
 0x604   : > { %v9742_v61 = vpack.c.bf16 %v5092_v15, %v5091_v37 }
 0x605   : > { %v9744_v39 = vpack.c.bf16 %v5090_v35, %v5089_v16  ;;  %v6583_v4 = vpop.f32.mrb[112].mxu0 }
 0x606   : > { %v4927_v11 = vadd.f32 %v9722_v50, %v6583_v4  ;;  %v4918_v1 = vpop.f32.mrb[113].mxu0 }
 0x607   : > { %v4919_v58 = vadd.f32 %v9722_v50, %v4918_v1  ;;  %v6584_v26 = vpop.f32.mrb[114].mxu0 }
 0x608   : > { %v4930_v27 = vadd.f32 %v9722_v50, %v6584_v26  ;;  %v4921_v5 = vpop.f32.mrb[115].mxu0  ;;  %6164 = vmatpush3.bf16.xpose.msra.mxu1 %v5306_v49  ;;  %v5095_v42 = vmax.f32 %v4927_v11, 0.0  ;;  %v5342_v26 = vsel %vm5184_vm2, %v9714_v10, 0  ;;  %v5351_v49 = vsel %vm5184_vm2, %v9744_v39, 0 }
 0x609   : > { %v4922_v18 = vadd.f32 %v9722_v50, %v4921_v5  ;;  %v5093_v54 = vmax.f32 %v4919_v58, 0.0  ;;  %v5354_v10 = vsel %vm5184_vm2, %v9742_v61, 0 }
 0x60a   : > { %v5096_v62 = vmax.f32 %v4930_v27, 0.0  ;;  %v10234_v27 = vld [vmem:[#allocation6_spill] sm:$0xff] }
 0x60b   : > { %v5094_v43 = vmax.f32 %v4922_v18, 0.0  ;;  %v10235_v5 = vsub.s32 0, %v10234_v27 }
 0x60c   : > { %v5167_v21 = vpack.c.bf16 %v5096_v62, %v5095_v42 }
 0x60d   : > { %v5166_v55 = vpack.c.bf16 %v5094_v43, %v5093_v54  ;;  %v6587_v57 = vpop.f32.mrb[116].mxu0 }
 0x60e   : > { %v4943_v32 = vadd.f32 %v9722_v50, %v6587_v57  ;;  %v4934_v29 = vpop.f32.mrb[117].mxu0 }
 0x60f   : > { %v4935_v28 = vadd.f32 %v9722_v50, %v4934_v29  ;;  %v6588_v13 = vpop.f32.mrb[118].mxu0  ;;  %6621 = vmatprep.subr.msk.bf16.mxu1 %vm5184_vm2, %v5166_v55  ;;  %6166 = vmatmul.mubr.msk.bf16.vlgmr.msra.gmra.mrb[8].mxu1 %vm5184_vm2, %v9758_v59  ;;  %v6763_v55 = vmov 1966171168  }
 0x610   : > { %v4946_v36 = vadd.f32 %v9722_v50, %v6588_v13  ;;  %v4937_v40 = vpop.f32.mrb[119].mxu0  ;;  %6168 = vmatpush3.bf16.xpose.msra.mxu1 %v5333_v48  ;;  %6183 = vmatprep.mubr.msk.bf16.mxu1 %vm5184_vm2, %v9758_v59  ;;  %v5099_v19 = vmax.f32 %v4943_v32, 0.0  ;;  %v5557_v57 = vunpack.c.l.s4 %v6763_v55 }
 0x611   : > { %v4938_v14 = vadd.f32 %v9722_v50, %v4937_v40  ;;  %6622 = vmatprep.subr.msk.bf16.mxu1 %vm5184_vm2, %v5167_v21  ;;  %v5097_v31 = vmax.f32 %v4935_v28, 0.0 }
 0x612   : > { %v5100_v23 = vmax.f32 %v4946_v36, 0.0  ;;  %v5558_v32 = vunpack.c.0.s8 %v5557_v57 }
 0x613   : > { %v5098_v25 = vmax.f32 %v4938_v14, 0.0 }
 0x614   : > { %v5169_v46 = vpack.c.bf16 %v5100_v23, %v5099_v19 }
 0x615   : > { %v5168_v41 = vpack.c.bf16 %v5098_v25, %v5097_v31  ;;  %v6591_v6 = vpop.f32.mrb[120].mxu0 }
 0x616   : > { %v4959_v24 = vadd.f32 %v9722_v50, %v6591_v6  ;;  %v4950_v53 = vpop.f32.mrb[121].mxu0 }
 0x617   : > { %v4951_v30 = vadd.f32 %v9722_v50, %v4950_v53  ;;  %v6592_v33 = vpop.f32.mrb[122].mxu0 }
 0x618   : > { %v4962_v38 = vadd.f32 %v9722_v50, %v6592_v33  ;;  %v4953_v7 = vpop.f32.mrb[123].mxu0  ;;  %6170 = vmatpush3.bf16.xpose.msra.mxu1 %v5336_v22  ;;  %v5103_v8 = vmax.f32 %v4959_v24, 0.0 }
 0x619   : > { %v4954_v56 = vadd.f32 %v9722_v50, %v4953_v7  ;;  %6623 = vmatprep.subr.msk.bf16.mxu1 %vm5184_vm2, %v5168_v41  ;;  %v5101_v17 = vmax.f32 %v4951_v30, 0.0 }
 0x61a   : > { %v5104_v63 = vmax.f32 %v4962_v38, 0.0 }
 0x61b   : > { %v5102_v3 = vmax.f32 %v4954_v56, 0.0 }
 0x61c   : > { %v5171_v51 = vpack.c.bf16 %v5104_v63, %v5103_v8 }
 0x61d   : > { %v5170_v34 = vpack.c.bf16 %v5102_v3, %v5101_v17  ;;  %v6595_v12 = vpop.f32.mrb[124].mxu0 }
 0x61e   : > { %v4975_v52 = vadd.f32 %v9722_v50, %v6595_v12  ;;  %v4966_v44 = vpop.f32.mrb[125].mxu0 }
 0x61f   : > { %v4967_v47 = vadd.f32 %v9722_v50, %v4966_v44  ;;  %v6596_v0 = vpop.f32.mrb[126].mxu0 }
 0x620   : > { %v4978_v60 = vadd.f32 %v9722_v50, %v6596_v0  ;;  %v4969_v37 = vpop.f32.mrb[127].mxu0  ;;  %6172 = vmatpush3.bf16.xpose.msra.mxu1 %v5339_v2  ;;  %v5107_v16 = vmax.f32 %v4975_v52, 0.0 }
 0x621   : > { %v4970_v15 = vadd.f32 %v9722_v50, %v4969_v37  ;;  %6624 = vmatprep.subr.msk.bf16.mxu1 %vm5184_vm2, %v5169_v46  ;;  %v5105_v4 = vmax.f32 %v4967_v47, 0.0  ;;  %v5348_v50 = vsel %vm5184_vm2, %v9730_v9, 0  ;;  %v5183_v9 = vrot.slane %v5178_v45, %v10235_v5 }
 0x622   : > { %v5108_v35 = vmax.f32 %v4978_v60, 0.0 }
 0x623   : > { %v5106_v11 = vmax.f32 %v4970_v15, 0.0 }
 0x624   : > { %v5173_v1 = vpack.c.bf16 %v5108_v35, %v5107_v16 }
 0x625   : > { %v5172_v58 = vpack.c.bf16 %v5106_v11, %v5105_v4 }
 0x628   : > { %6174 = vmatpush3.bf16.xpose.msra.mxu1 %v5342_v26 }
 0x629   : > { %6625 = vmatprep.subr.msk.bf16.mxu1 %vm5184_vm2, %v5170_v34 }
 0x630   : > { %6176 = vmatpush3.bf16.xpose.msra.mxu1 %v5345_v20 }
 0x631   : > { %6626 = vmatprep.subr.msk.bf16.mxu1 %vm5184_vm2, %v5171_v51 }
 0x638   : > { %6178 = vmatpush3.bf16.xpose.msra.mxu1 %v5348_v50 }
 0x639   : > { %6627 = vmatprep.subr.msk.bf16.mxu1 %vm5184_vm2, %v5172_v58 }
 0x640   : > { %6180 = vmatpush3.bf16.xpose.msra.mxu1 %v5351_v49 }
 0x641   : > { %6628 = vmatprep.subr.msk.bf16.mxu1 %vm5184_vm2, %v5173_v1 }
 0x648   : > { %6182 = vmatpush3.bf16.xpose.msra.mxu1 %v5354_v10 }
 0x64f   : > { %6184 = vmatmul.mubr.msk.bf16.vlgmr.msra.gmra.mrb[12].mxu1 %vm5184_vm2, %v9758_v59  ;;  %v5561_v59 = vsub.s32 %v5558_v32, %v10234_v27 }
 0x662   : > { %v5414_v18 = vpop.f32.mrb[0].mxu1 }
 0x663   : > { %v5416_v42 = vpop.f32.mrb[1].mxu1  ;;  %v5415_v62 = vadd.f32 %v5414_v18, %v5183_v9 }
 0x664   : > { %v5418_v54 = vpop.f32.mrb[2].mxu1  ;;  %v5417_v43 = vadd.f32 %v5416_v42, %v5183_v9 }
 0x665   : > { %v5419_v39 = vpop.f32.mrb[3].mxu1 }
 0x666   : > { %v5552_v21 = vcombine.low %v5415_v62, %v5417_v43 }
 0x668   : > { %v5562_v14 = vrot.slane %v5552_v21, %v5561_v59 }
 0x6a2   : > { %v5455_v29 = vpop.f32.mrb[4].mxu1 }
 0x6a3   : > { %v5457_v61 = vpop.f32.mrb[5].mxu1  ;;  %v5456_v28 = vadd.f32 %v5455_v29, %v5183_v9 }
 0x6a4   : > { %v5459_v13 = vpop.f32.mrb[6].mxu1  ;;  %v5458_v48 = vadd.f32 %v5457_v61, %v5183_v9 }
 0x6a5   : > { %v5460_v36 = vpop.f32.mrb[7].mxu1 }
 0x6a6   : > { %v5553_v40 = vcombine.low %v5456_v28, %v5458_v48 }
 0x6a8   : > { %v5569_v19 = vrot.slane %v5553_v40, %v5561_v59 }
 0x6aa   : > { %v5584_v23 = vcombine.low %v5562_v14, %v5569_v19 }
 0x6ac   : > { %v5592_v51 = vrot.slane %v5584_v23, %v5561_v59 }
 0x6e2   : > { %v5496_v31 = vpop.f32.mrb[8].mxu1 }
 0x6e3   : > { %v5498_v25 = vpop.f32.mrb[9].mxu1  ;;  %v5497_v46 = vadd.f32 %v5496_v31, %v5183_v9 }
 0x6e4   : > { %v5500_v41 = vpop.f32.mrb[10].mxu1  ;;  %v5499_v6 = vadd.f32 %v5498_v25, %v5183_v9 }
 0x6e5   : > { %v5501_v24 = vpop.f32.mrb[11].mxu1 }
 0x6e6   : > { %v5554_v53 = vcombine.low %v5497_v46, %v5499_v6 }
 0x6e8   : > { %v5576_v63 = vrot.slane %v5554_v53, %v5561_v59 }
 0x722   : > { %v5537_v30 = vpop.f32.mrb[12].mxu1 }
 0x723   : > { %v5538_v33 = vadd.f32 %v5537_v30, %v5183_v9  ;;  %v5539_v22 = vpop.f32.mrb[13].mxu1 }
 0x724   : > { %v5540_v38 = vadd.f32 %v5539_v22, %v5183_v9  ;;  %v5541_v7 = vpop.f32.mrb[14].mxu1 }
 0x725   : > { %v5542_v56 = vpop.f32.mrb[15].mxu1 }
 0x726   : > { %v5555_v8 = vcombine.low %v5538_v33, %v5540_v38 }
 0x728   : > { %v5583_v17 = vrot.slane %v5555_v8, %v5561_v59 }
 0x72a   : > { %v5585_v3 = vcombine.low %v5576_v63, %v5583_v17 }
 0x72c   : > { %v5599_v34 = vrot.slane %v5585_v3, %v5561_v59 }
 0x72e   : > { %v5600_v12 = vcombine.low %v5592_v51, %v5599_v34 }
 0x730   : > { %5602 = vst [vmem:[%s382_s26] sm:$0xff] %v5600_v12 }
 0x731   : > { %6710 = shalt.err (!%p6707_p3)
}
 0x732   : > { %s6711_s13 = scalar_lea.hbm %s9807_s15, 128  ;;  %s6715_s12 = scalar_lea.hbm %s9860_s11, 256 }
 0x733   : > { %p6712_p4 = scmp.ne.s32.totalorder %s9807_s15, %s6711_s13  ;;  %p6716_p9 = scmp.lt.u32.totalorder %s9807_s15, %s9860_s11 }
 0x734   : > { %p6717_p10 = scmp.lt.u32.totalorder %s6715_s12, %s6711_s13  ;;  %p6719_p12 = scmp.lt.u32.totalorder %s6711_s13, %s9807_s15 }
 0x735   : > { %p6713_p7 = pnand %p6712_p4, %p6863_p5 }
 0x736   : > { %p6718_p11 = por %p6717_p10, %p6716_p9 }
 0x737   : > { %p6714_p8 = pneg %p6713_p7 }
 0x738   : > { %p6720_p13 = por %p6719_p12, %p6718_p11 }
 0x73a   : > { %p6721_p0 = pnand %p6720_p13, %p6714_p8 }
 0x73c   : > { %6724 = shalt.err (!%p6721_p0)
}
 0x73d   : > { %6629 = dma.vmem_to_hbm [thread:$0]  (%p6863_p5), %s9809_s30, 128, %s9807_s15, %s5604_s16  }
 0x73e PF: > { %p6635_p1 = scmp.ge.s32.totalorder %s6759_s22, 2  ;;  %s5630_s17 = sand.u32 1, %s6747_s19  }
 0x73f   : > { %s5631_s10 = scalar_lea.sflag [#allocation4], %s5630_s17 }
 0x740   : > { %p6632_p2 = pnand %p6635_p1, %p6867_p6 }
 0x742   : > { %6742 = dma.done.wait (!%p6632_p2), %s5631_s10, 128  }
 0x743   : > { %6744 = vsyncadd (!%p6632_p2), %s5631_s10, 4294967168  ;;  %p23_p3 = scmp.ge.s32.totalorder %s6851_s24, 4   ;;  %s10236_s19 = smov %s6751_s20 }
 0x744   : > { %s10237_s20 = smov %s6755_s21  ;;  %s10238_s21 = smov %s6861_s27 }
 0x745   : > { %s10239_s22 = smov %s6851_s24  ;;  %25 = sbr.rel (!%p23_p3) target bundleno = 6 (0x6), region = 99 }
 0x74c   :  { %5636 = vsyncpa [#allocation4], 1 }
 0x74d   :  { %5638 = vsyncpa [#allocation4 + $0x1], 1 }

</bundles_post_ra>
